<compile_context>
chip_gen: v7x
topology: tpu7x:2x2x1
jax: 0.10.0
libtpu: 0.0.40
codegen_flags: <defaults>
</compile_context>

<pallas_src>
import functools

import jax
import jax.numpy as jnp
from jax.experimental import pallas as pl
from jax.experimental.pallas import tpu as pltpu

# ---------------- configuration (small, consistent with module) ----------------
B = 2          # batch
N_SEQ = 8      # MSA sequences (attention axis)
N_RES = 16     # residues (power of two -> residue ids via bitwise AND)
C_M = 32       # MSA channel dim
C_HIDDEN = 16  # per-head hidden dim
NUM_HEADS = 4
INF = 1e9
LN_EPS = 1e-5
NEG_BIG = -1e30   # cross-residue bias; strictly dominates the (mask-1)*INF bias


# --------------------------------- kernel --------------------------------------
def _msa_col_attn_kernel(m_ref, mask_ref, ln_w_ref, ln_b_ref,
                         w_qkvg_ref, b_qkvg_ref, wo_ref, bo_ref, out_ref,
                         *, num_heads, c_hidden, n_res, inf, eps):
    # m_ref:    (1, S*R, c_m)   one whole batch slab, rows ordered (seq, res)
    # mask_ref: (1, 1, S*R)     mask flattened in the same (seq, res) order
    H, D = num_heads, c_hidden
    HD = H * D
    R = n_res

    x = m_ref[0]                                     # [rows, c_m] f32
    rows, c_m = x.shape

    # --- LayerNorm over c_m ---
    mu = jnp.mean(x, axis=-1, keepdims=True)
    xc = x - mu
    var = jnp.mean(xc * xc, axis=-1, keepdims=True)
    xn = xc * jax.lax.rsqrt(var + eps) * ln_w_ref[...] + ln_b_ref[...]

    # --- fused q|k|v|g projection: one [rows,32]@[32,256] MXU matmul ---
    proj = jnp.dot(xn, w_qkvg_ref[...],
                   preferred_element_type=jnp.float32) + b_qkvg_ref[...]
    scale = 1.0 / (float(D) ** 0.5)
    q = proj[:, 0 * HD:1 * HD] * scale               # [rows, H*D]
    k = proj[:, 1 * HD:2 * HD]
    v = proj[:, 2 * HD:3 * HD]
    g = jax.nn.sigmoid(proj[:, 3 * HD:4 * HD])

    # --- pair bias: attention only within the same residue column + key mask ---
    # rows are flattened (seq, res) with res minor => residue id = index & (R-1).
    row_ids = jax.lax.broadcasted_iota(jnp.int32, (rows, rows), 0)
    col_ids = jax.lax.broadcasted_iota(jnp.int32, (rows, rows), 1)
    same_res = jnp.bitwise_and(row_ids, R - 1) == jnp.bitwise_and(col_ids, R - 1)
    col_bias = (mask_ref[0] - 1.0) * inf             # [1, rows]  (broadcast over q rows)
    pair_bias = jnp.where(same_res, jnp.float32(0.0), jnp.float32(NEG_BIG)) + col_bias

    # --- per-head attention as full-width masked matmuls; accumulate into Wo ---
    wo = wo_ref[...]                                 # [H*D, c_m]
    acc = jnp.zeros((rows, c_m), jnp.float32)
    for h in range(H):                               # static 4-way unroll, no concat
        sl = slice(h * D, (h + 1) * D)
        logits = jnp.einsum('qd,kd->qk', q[:, sl], k[:, sl],
                            preferred_element_type=jnp.float32) + pair_bias
        logits = logits - jnp.max(logits, axis=-1, keepdims=True)
        p = jnp.exp(logits)                          # cross-residue entries underflow to 0
        p = p * pl.reciprocal(jnp.sum(p, axis=-1, keepdims=True), approx=True)
        oh = jnp.dot(p, v[:, sl], preferred_element_type=jnp.float32) * g[:, sl]
        acc = acc + jnp.dot(oh, wo[sl, :], preferred_element_type=jnp.float32)

    out_ref[0] = acc + bo_ref[...]


# -------------------------------- wrapper ---------------------------------------
def msa_column_attention(m, mask, params):
    """m: [B, N_seq, N_res, c_m], mask: [B, N_seq, N_res] -> [B, N_seq, N_res, c_m]."""
    b, n_seq, n_res, c_m = m.shape
    assert (n_res & (n_res - 1)) == 0, "kernel assumes N_res is a power of two"
    rows = n_seq * n_res
    hxd = NUM_HEADS * C_HIDDEN

    # Free, metadata-only reshapes (no HBM transpose round trips).
    m_flat = m.reshape(b, rows, c_m)                 # rows ordered (seq, res)
    mask_flat = mask.reshape(b, 1, rows)             # key mask in the same order

    ln_w = params["ln_w"].reshape(1, c_m)
    ln_b = params["ln_b"].reshape(1, c_m)
    # Fuse the four projections into one weight; only the gate carries a bias.
    w_qkvg = jnp.concatenate(
        [params["wq"], params["wk"], params["wv"], params["wg"]], axis=1)     # [c_m, 4*hxd]
    b_qkvg = jnp.concatenate(
        [jnp.zeros((3 * hxd,), jnp.float32), params["bg"]]).reshape(1, 4 * hxd)
    bo = params["bo"].reshape(1, c_m)

    kernel = functools.partial(_msa_col_attn_kernel,
                               num_heads=NUM_HEADS, c_hidden=C_HIDDEN,
                               n_res=n_res, inf=INF, eps=LN_EPS)

    rep = lambda shape: pl.BlockSpec(shape, lambda i: (0,) * len(shape))

    out_flat = pl.pallas_call(
        kernel,
        out_shape=jax.ShapeDtypeStruct((b, rows, c_m), jnp.float32),
        grid=(b,),
        in_specs=[
            pl.BlockSpec((1, rows, c_m), lambda i: (i, 0, 0)),   # m slab
            pl.BlockSpec((1, 1, rows), lambda i: (i, 0, 0)),     # mask slab
            rep((1, c_m)),            # ln_w
            rep((1, c_m)),            # ln_b
            rep((c_m, 4 * hxd)),      # fused Wq|Wk|Wv|Wg
            rep((1, 4 * hxd)),        # fused bias (zeros | bg)
            rep((hxd, c_m)),          # Wo
            rep((1, c_m)),            # bo
        ],
        out_specs=pl.BlockSpec((1, rows, c_m), lambda i: (i, 0, 0)),
        compiler_params=pltpu.CompilerParams(
            dimension_semantics=("parallel",)),      # lets v7x use both TensorCores
    )(m_flat, mask_flat, ln_w, ln_b, w_qkvg, b_qkvg, params["wo"], bo)

    return out_flat.reshape(b, n_seq, n_res, c_m)


# --------------------------- pure-JAX reference ----------------------------------
def msa_column_attention_ref(m, mask, params):
    m_t = jnp.swapaxes(m, 1, 2)                                  # [B, R, S, c_m]
    mask_t = jnp.swapaxes(mask, 1, 2)[:, :, None, None, :]       # [B, R, 1, 1, S]
    mu = jnp.mean(m_t, -1, keepdims=True)
    var = jnp.mean((m_t - mu) ** 2, -1, keepdims=True)
    xn = (m_t - mu) / jnp.sqrt(var + LN_EPS) * params["ln_w"] + params["ln_b"]

    def split(x):  # [..., S, H*Dh] -> [..., H, S, Dh]
        b_, r_, s_, _ = x.shape
        return jnp.moveaxis(x.reshape(b_, r_, s_, NUM_HEADS, C_HIDDEN), -2, 2)

    q = split(xn @ params["wq"]) / jnp.sqrt(C_HIDDEN)
    k = split(xn @ params["wk"])
    v = split(xn @ params["wv"])
    g = jax.nn.sigmoid(xn @ params["wg"] + params["bg"])
    logits = jnp.einsum("brhqd,brhkd->brhqk", q, k) + (mask_t - 1.0) * INF
    a = jax.nn.softmax(logits, axis=-1)
    o = jnp.einsum("brhqk,brhkd->brhqd", a, v)                   # [B,R,H,S,Dh]
    o = jnp.moveaxis(o, 2, -2).reshape(*xn.shape[:-1], NUM_HEADS * C_HIDDEN)
    y = (o * g) @ params["wo"] + params["bo"]
    return jnp.swapaxes(y, 1, 2)


# ----------------------------------- main -----------------------------------------
if __name__ == "__main__":
    key = jax.random.PRNGKey(0)
    keys = jax.random.split(key, 12)
    hxd = NUM_HEADS * C_HIDDEN

    params = {
        "ln_w": jax.random.normal(keys[0], (C_M,), jnp.float32) * 0.1 + 1.0,
        "ln_b": jax.random.normal(keys[1], (C_M,), jnp.float32) * 0.1,
        "wq": jax.random.normal(keys[2], (C_M, hxd), jnp.float32) * 0.1,
        "wk": jax.random.normal(keys[3], (C_M, hxd), jnp.float32) * 0.1,
        "wv": jax.random.normal(keys[4], (C_M, hxd), jnp.float32) * 0.1,
        "wg": jax.random.normal(keys[5], (C_M, hxd), jnp.float32) * 0.1,
        "bg": jnp.ones((hxd,), jnp.float32),       # gating bias init = 1 (OpenFold)
        "wo": jax.random.normal(keys[6], (hxd, C_M), jnp.float32) * 0.1,
        "bo": jnp.zeros((C_M,), jnp.float32),
    }

    m = jax.random.normal(keys[7], (B, N_SEQ, N_RES, C_M), jnp.float32)
    mask = (jax.random.uniform(keys[8], (B, N_SEQ, N_RES)) > 0.2).astype(jnp.float32)

    out = jax.block_until_ready(msa_column_attention(m, mask, params))
    ref = jax.block_until_ready(msa_column_attention_ref(m, mask, params))

    assert out.shape == (B, N_SEQ, N_RES, C_M), out.shape
    # Tolerance slightly loosened vs. exact-division version because the softmax
    # denominator uses the EUP approximate reciprocal (pl.reciprocal(approx=True)).
    assert jnp.allclose(out, ref, atol=2e-3, rtol=2e-3), float(jnp.max(jnp.abs(out - ref)))
    print("KERNEL_OK")
</pallas_src>

<mosaic_0001>
module attributes {stable_mosaic.version = 11 : i64} {
  func.func @_msa_col_attn_kernel(%arg0: i32, %arg1: memref<1x128x32xf32, #tpu.memory_space<vmem>>, %arg2: memref<1x1x128xf32, #tpu.memory_space<vmem>>, %arg3: memref<1x32xf32, #tpu.memory_space<vmem>>, %arg4: memref<1x32xf32, #tpu.memory_space<vmem>>, %arg5: memref<32x256xf32, #tpu.memory_space<vmem>>, %arg6: memref<1x256xf32, #tpu.memory_space<vmem>>, %arg7: memref<64x32xf32, #tpu.memory_space<vmem>>, %arg8: memref<1x32xf32, #tpu.memory_space<vmem>>, %arg9: memref<1x128x32xf32, #tpu.memory_space<vmem>>) attributes {dimension_semantics = [#tpu.dimension_semantics<parallel>], iteration_bounds = array<i64: 2>, scalar_prefetch = 0 : i64, scratch_operands = 0 : i64, tpu.core_type = #tpu.core_type<tc>, window_params = [{transform_indices = @transform_0, window_bounds = array<i64: 1, 128, 32>}, {transform_indices = @transform_1, window_bounds = array<i64: 1, 1, 128>}, {pipeline_mode = #tpu.pipeline_mode<synchronous>, transform_indices = @transform_2, window_bounds = array<i64: 1, 32>}, {pipeline_mode = #tpu.pipeline_mode<synchronous>, transform_indices = @transform_3, window_bounds = array<i64: 1, 32>}, {pipeline_mode = #tpu.pipeline_mode<synchronous>, transform_indices = @transform_4, window_bounds = array<i64: 32, 256>}, {pipeline_mode = #tpu.pipeline_mode<synchronous>, transform_indices = @transform_5, window_bounds = array<i64: 1, 256>}, {pipeline_mode = #tpu.pipeline_mode<synchronous>, transform_indices = @transform_6, window_bounds = array<i64: 64, 32>}, {pipeline_mode = #tpu.pipeline_mode<synchronous>, transform_indices = @transform_7, window_bounds = array<i64: 1, 32>}, {transform_indices = @transform_8, window_bounds = array<i64: 1, 128, 32>}]} {
    %c0 = arith.constant 0 : index
    %c0_0 = arith.constant 0 : index
    %c0_1 = arith.constant 0 : index
    %0 = vector.load %arg1[%c0, %c0_0, %c0_1] : memref<1x128x32xf32, #tpu.memory_space<vmem>>, vector<1x128x32xf32>
    %1 = vector.shape_cast %0 : vector<1x128x32xf32> to vector<128x32xf32>
    %cst = arith.constant dense<0.000000e+00> : vector<128xf32>
    %2 = vector.multi_reduction <add>, %1, %cst [1] : vector<128x32xf32> to vector<128xf32>
    %3 = vector.shape_cast %2 : vector<128xf32> to vector<128x1xf32>
    %cst_2 = arith.constant 3.200000e+01 : f32
    %4 = vector.broadcast %cst_2 : f32 to vector<128x1xf32>
    %5 = arith.divf %3, %4 : vector<128x1xf32>
    %6 = vector.broadcast %5 : vector<128x1xf32> to vector<128x32xf32>
    %7 = arith.subf %1, %6 : vector<128x32xf32>
    %8 = arith.mulf %7, %7 : vector<128x32xf32>
    %cst_3 = arith.constant dense<0.000000e+00> : vector<128xf32>
    %9 = vector.multi_reduction <add>, %8, %cst_3 [1] : vector<128x32xf32> to vector<128xf32>
    %10 = vector.shape_cast %9 : vector<128xf32> to vector<128x1xf32>
    %cst_4 = arith.constant 3.200000e+01 : f32
    %11 = vector.broadcast %cst_4 : f32 to vector<128x1xf32>
    %12 = arith.divf %10, %11 : vector<128x1xf32>
    %cst_5 = arith.constant 9.99999974E-6 : f32
    %13 = vector.broadcast %cst_5 : f32 to vector<128x1xf32>
    %14 = arith.addf %12, %13 : vector<128x1xf32>
    %15 = math.rsqrt %14 : vector<128x1xf32>
    %16 = vector.broadcast %15 : vector<128x1xf32> to vector<128x32xf32>
    %17 = arith.mulf %7, %16 : vector<128x32xf32>
    %c0_6 = arith.constant 0 : index
    %c0_7 = arith.constant 0 : index
    %18 = vector.load %arg3[%c0_6, %c0_7] : memref<1x32xf32, #tpu.memory_space<vmem>>, vector<1x32xf32>
    %19 = vector.broadcast %18 : vector<1x32xf32> to vector<128x32xf32>
    %20 = arith.mulf %17, %19 : vector<128x32xf32>
    %c0_8 = arith.constant 0 : index
    %c0_9 = arith.constant 0 : index
    %21 = vector.load %arg4[%c0_8, %c0_9] : memref<1x32xf32, #tpu.memory_space<vmem>>, vector<1x32xf32>
    %22 = vector.broadcast %21 : vector<1x32xf32> to vector<128x32xf32>
    %23 = arith.addf %20, %22 : vector<128x32xf32>
    %c0_10 = arith.constant 0 : index
    %c0_11 = arith.constant 0 : index
    %24 = vector.load %arg5[%c0_10, %c0_11] : memref<32x256xf32, #tpu.memory_space<vmem>>, vector<32x256xf32>
    %cst_12 = arith.constant dense<0.000000e+00> : vector<128x256xf32>
    %25 = tpu.matmul %23, %24, %cst_12 {dimension_numbers = #tpu.dot_dimension_numbers<[1], [0], [0], [1], [0, 0, 1, 1], [], []>} : vector<128x32xf32>, vector<32x256xf32>, vector<128x256xf32> -> vector<128x256xf32>
    %c0_13 = arith.constant 0 : index
    %c0_14 = arith.constant 0 : index
    %26 = vector.load %arg6[%c0_13, %c0_14] : memref<1x256xf32, #tpu.memory_space<vmem>>, vector<1x256xf32>
    %27 = vector.broadcast %26 : vector<1x256xf32> to vector<128x256xf32>
    %28 = arith.addf %25, %27 : vector<128x256xf32>
    %29 = vector.extract_strided_slice %28 {offsets = [0, 0], sizes = [128, 64], strides = [1, 1]} : vector<128x256xf32> to vector<128x64xf32>
    %cst_15 = arith.constant 2.500000e-01 : f32
    %30 = vector.broadcast %cst_15 : f32 to vector<128x64xf32>
    %31 = arith.mulf %29, %30 : vector<128x64xf32>
    %32 = vector.extract_strided_slice %28 {offsets = [0, 64], sizes = [128, 64], strides = [1, 1]} : vector<128x256xf32> to vector<128x64xf32>
    %33 = vector.extract_strided_slice %28 {offsets = [0, 128], sizes = [128, 64], strides = [1, 1]} : vector<128x256xf32> to vector<128x64xf32>
    %34 = vector.extract_strided_slice %28 {offsets = [0, 192], sizes = [128, 64], strides = [1, 1]} : vector<128x256xf32> to vector<128x64xf32>
    %35 = arith.negf %34 : vector<128x64xf32>
    %36 = math.exp %35 : vector<128x64xf32>
    %cst_16 = arith.constant 1.000000e+00 : f32
    %37 = vector.broadcast %cst_16 : f32 to vector<128x64xf32>
    %38 = arith.addf %37, %36 : vector<128x64xf32>
    %39 = arith.divf %37, %38 : vector<128x64xf32>
    %40 = tpu.iota {dimensions = array<i32: 0>} : vector<128x128xi32>
    %41 = tpu.iota {dimensions = array<i32: 1>} : vector<128x128xi32>
    %c15_i32 = arith.constant 15 : i32
    %42 = vector.broadcast %c15_i32 : i32 to vector<128x128xi32>
    %43 = arith.andi %40, %42 : vector<128x128xi32>
    %c15_i32_17 = arith.constant 15 : i32
    %44 = vector.broadcast %c15_i32_17 : i32 to vector<128x128xi32>
    %45 = arith.andi %41, %44 : vector<128x128xi32>
    %46 = arith.cmpi eq, %43, %45 : vector<128x128xi32>
    %c0_18 = arith.constant 0 : index
    %c0_19 = arith.constant 0 : index
    %c0_20 = arith.constant 0 : index
    %47 = vector.load %arg2[%c0_18, %c0_19, %c0_20] : memref<1x1x128xf32, #tpu.memory_space<vmem>>, vector<1x1x128xf32>
    %48 = vector.shape_cast %47 : vector<1x1x128xf32> to vector<1x128xf32>
    %cst_21 = arith.constant 1.000000e+00 : f32
    %49 = vector.broadcast %cst_21 : f32 to vector<1x128xf32>
    %50 = arith.subf %48, %49 : vector<1x128xf32>
    %cst_22 = arith.constant 1.000000e+09 : f32
    %51 = vector.broadcast %cst_22 : f32 to vector<1x128xf32>
    %52 = arith.mulf %50, %51 : vector<1x128xf32>
    %cst_23 = arith.constant 0.000000e+00 : f32
    %cst_24 = arith.constant -1.000000e+30 : f32
    %53 = vector.broadcast %cst_23 : f32 to vector<128x128xf32>
    %54 = vector.broadcast %cst_24 : f32 to vector<128x128xf32>
    %55 = arith.select %46, %53, %54 : vector<128x128xi1>, vector<128x128xf32>
    %56 = vector.broadcast %52 : vector<1x128xf32> to vector<128x128xf32>
    %57 = arith.addf %55, %56 : vector<128x128xf32>
    %c0_25 = arith.constant 0 : index
    %c0_26 = arith.constant 0 : index
    %58 = vector.load %arg7[%c0_25, %c0_26] : memref<64x32xf32, #tpu.memory_space<vmem>>, vector<64x32xf32>
    %cst_27 = arith.constant 0.000000e+00 : f32
    %59 = vector.broadcast %cst_27 : f32 to vector<128x32xf32>
    %60 = vector.extract_strided_slice %31 {offsets = [0, 0], sizes = [128, 16], strides = [1, 1]} : vector<128x64xf32> to vector<128x16xf32>
    %61 = vector.extract_strided_slice %32 {offsets = [0, 0], sizes = [128, 16], strides = [1, 1]} : vector<128x64xf32> to vector<128x16xf32>
    "tpu.trace_start"() <{level = 10 : i32, message = "qd,kd->qk"}> : () -> ()
    %cst_28 = arith.constant dense<0.000000e+00> : vector<128x128xf32>
    %62 = tpu.matmul %60, %61, %cst_28 {dimension_numbers = #tpu.dot_dimension_numbers<[1], [1], [0], [0], [0, 0, 1, 0], [], []>} : vector<128x16xf32>, vector<128x16xf32>, vector<128x128xf32> -> vector<128x128xf32>
    "tpu.trace_stop"() : () -> ()
    %63 = arith.addf %62, %57 : vector<128x128xf32>
    %cst_29 = arith.constant dense<0xFF800000> : vector<128xf32>
    %64 = vector.multi_reduction <maximumf>, %63, %cst_29 [1] : vector<128x128xf32> to vector<128xf32>
    %65 = vector.shape_cast %64 : vector<128xf32> to vector<128x1xf32>
    %66 = vector.broadcast %65 : vector<128x1xf32> to vector<128x128xf32>
    %67 = arith.subf %63, %66 : vector<128x128xf32>
    %68 = math.exp %67 : vector<128x128xf32>
    %cst_30 = arith.constant dense<0.000000e+00> : vector<128xf32>
    %69 = vector.multi_reduction <add>, %68, %cst_30 [1] : vector<128x128xf32> to vector<128xf32>
    %70 = vector.shape_cast %69 : vector<128xf32> to vector<128x1xf32>
    %71 = tpu.reciprocal %70 {approx = true} : vector<128x1xf32> -> vector<128x1xf32>
    %72 = vector.broadcast %71 : vector<128x1xf32> to vector<128x128xf32>
    %73 = arith.mulf %68, %72 : vector<128x128xf32>
    %74 = vector.extract_strided_slice %33 {offsets = [0, 0], sizes = [128, 16], strides = [1, 1]} : vector<128x64xf32> to vector<128x16xf32>
    %cst_31 = arith.constant dense<0.000000e+00> : vector<128x16xf32>
    %75 = tpu.matmul %73, %74, %cst_31 {dimension_numbers = #tpu.dot_dimension_numbers<[1], [0], [0], [1], [0, 0, 1, 1], [], []>} : vector<128x128xf32>, vector<128x16xf32>, vector<128x16xf32> -> vector<128x16xf32>
    %76 = vector.extract_strided_slice %39 {offsets = [0, 0], sizes = [128, 16], strides = [1, 1]} : vector<128x64xf32> to vector<128x16xf32>
    %77 = arith.mulf %75, %76 : vector<128x16xf32>
    %78 = vector.extract_strided_slice %58 {offsets = [0, 0], sizes = [16, 32], strides = [1, 1]} : vector<64x32xf32> to vector<16x32xf32>
    %cst_32 = arith.constant dense<0.000000e+00> : vector<128x32xf32>
    %79 = tpu.matmul %77, %78, %cst_32 {dimension_numbers = #tpu.dot_dimension_numbers<[1], [0], [0], [1], [0, 0, 1, 1], [], []>} : vector<128x16xf32>, vector<16x32xf32>, vector<128x32xf32> -> vector<128x32xf32>
    %80 = arith.addf %59, %79 : vector<128x32xf32>
    %81 = vector.extract_strided_slice %31 {offsets = [0, 16], sizes = [128, 16], strides = [1, 1]} : vector<128x64xf32> to vector<128x16xf32>
    %82 = vector.extract_strided_slice %32 {offsets = [0, 16], sizes = [128, 16], strides = [1, 1]} : vector<128x64xf32> to vector<128x16xf32>
    "tpu.trace_start"() <{level = 10 : i32, message = "qd,kd->qk"}> : () -> ()
    %cst_33 = arith.constant dense<0.000000e+00> : vector<128x128xf32>
    %83 = tpu.matmul %81, %82, %cst_33 {dimension_numbers = #tpu.dot_dimension_numbers<[1], [1], [0], [0], [0, 0, 1, 0], [], []>} : vector<128x16xf32>, vector<128x16xf32>, vector<128x128xf32> -> vector<128x128xf32>
    "tpu.trace_stop"() : () -> ()
    %84 = arith.addf %83, %57 : vector<128x128xf32>
    %cst_34 = arith.constant dense<0xFF800000> : vector<128xf32>
    %85 = vector.multi_reduction <maximumf>, %84, %cst_34 [1] : vector<128x128xf32> to vector<128xf32>
    %86 = vector.shape_cast %85 : vector<128xf32> to vector<128x1xf32>
    %87 = vector.broadcast %86 : vector<128x1xf32> to vector<128x128xf32>
    %88 = arith.subf %84, %87 : vector<128x128xf32>
    %89 = math.exp %88 : vector<128x128xf32>
    %cst_35 = arith.constant dense<0.000000e+00> : vector<128xf32>
    %90 = vector.multi_reduction <add>, %89, %cst_35 [1] : vector<128x128xf32> to vector<128xf32>
    %91 = vector.shape_cast %90 : vector<128xf32> to vector<128x1xf32>
    %92 = tpu.reciprocal %91 {approx = true} : vector<128x1xf32> -> vector<128x1xf32>
    %93 = vector.broadcast %92 : vector<128x1xf32> to vector<128x128xf32>
    %94 = arith.mulf %89, %93 : vector<128x128xf32>
    %95 = vector.extract_strided_slice %33 {offsets = [0, 16], sizes = [128, 16], strides = [1, 1]} : vector<128x64xf32> to vector<128x16xf32>
    %cst_36 = arith.constant dense<0.000000e+00> : vector<128x16xf32>
    %96 = tpu.matmul %94, %95, %cst_36 {dimension_numbers = #tpu.dot_dimension_numbers<[1], [0], [0], [1], [0, 0, 1, 1], [], []>} : vector<128x128xf32>, vector<128x16xf32>, vector<128x16xf32> -> vector<128x16xf32>
    %97 = vector.extract_strided_slice %39 {offsets = [0, 16], sizes = [128, 16], strides = [1, 1]} : vector<128x64xf32> to vector<128x16xf32>
    %98 = arith.mulf %96, %97 : vector<128x16xf32>
    %99 = vector.extract_strided_slice %58 {offsets = [16, 0], sizes = [16, 32], strides = [1, 1]} : vector<64x32xf32> to vector<16x32xf32>
    %cst_37 = arith.constant dense<0.000000e+00> : vector<128x32xf32>
    %100 = tpu.matmul %98, %99, %cst_37 {dimension_numbers = #tpu.dot_dimension_numbers<[1], [0], [0], [1], [0, 0, 1, 1], [], []>} : vector<128x16xf32>, vector<16x32xf32>, vector<128x32xf32> -> vector<128x32xf32>
    %101 = arith.addf %80, %100 : vector<128x32xf32>
    %102 = vector.extract_strided_slice %31 {offsets = [0, 32], sizes = [128, 16], strides = [1, 1]} : vector<128x64xf32> to vector<128x16xf32>
    %103 = vector.extract_strided_slice %32 {offsets = [0, 32], sizes = [128, 16], strides = [1, 1]} : vector<128x64xf32> to vector<128x16xf32>
    "tpu.trace_start"() <{level = 10 : i32, message = "qd,kd->qk"}> : () -> ()
    %cst_38 = arith.constant dense<0.000000e+00> : vector<128x128xf32>
    %104 = tpu.matmul %102, %103, %cst_38 {dimension_numbers = #tpu.dot_dimension_numbers<[1], [1], [0], [0], [0, 0, 1, 0], [], []>} : vector<128x16xf32>, vector<128x16xf32>, vector<128x128xf32> -> vector<128x128xf32>
    "tpu.trace_stop"() : () -> ()
    %105 = arith.addf %104, %57 : vector<128x128xf32>
    %cst_39 = arith.constant dense<0xFF800000> : vector<128xf32>
    %106 = vector.multi_reduction <maximumf>, %105, %cst_39 [1] : vector<128x128xf32> to vector<128xf32>
    %107 = vector.shape_cast %106 : vector<128xf32> to vector<128x1xf32>
    %108 = vector.broadcast %107 : vector<128x1xf32> to vector<128x128xf32>
    %109 = arith.subf %105, %108 : vector<128x128xf32>
    %110 = math.exp %109 : vector<128x128xf32>
    %cst_40 = arith.constant dense<0.000000e+00> : vector<128xf32>
    %111 = vector.multi_reduction <add>, %110, %cst_40 [1] : vector<128x128xf32> to vector<128xf32>
    %112 = vector.shape_cast %111 : vector<128xf32> to vector<128x1xf32>
    %113 = tpu.reciprocal %112 {approx = true} : vector<128x1xf32> -> vector<128x1xf32>
    %114 = vector.broadcast %113 : vector<128x1xf32> to vector<128x128xf32>
    %115 = arith.mulf %110, %114 : vector<128x128xf32>
    %116 = vector.extract_strided_slice %33 {offsets = [0, 32], sizes = [128, 16], strides = [1, 1]} : vector<128x64xf32> to vector<128x16xf32>
    %cst_41 = arith.constant dense<0.000000e+00> : vector<128x16xf32>
    %117 = tpu.matmul %115, %116, %cst_41 {dimension_numbers = #tpu.dot_dimension_numbers<[1], [0], [0], [1], [0, 0, 1, 1], [], []>} : vector<128x128xf32>, vector<128x16xf32>, vector<128x16xf32> -> vector<128x16xf32>
    %118 = vector.extract_strided_slice %39 {offsets = [0, 32], sizes = [128, 16], strides = [1, 1]} : vector<128x64xf32> to vector<128x16xf32>
    %119 = arith.mulf %117, %118 : vector<128x16xf32>
    %120 = vector.extract_strided_slice %58 {offsets = [32, 0], sizes = [16, 32], strides = [1, 1]} : vector<64x32xf32> to vector<16x32xf32>
    %cst_42 = arith.constant dense<0.000000e+00> : vector<128x32xf32>
    %121 = tpu.matmul %119, %120, %cst_42 {dimension_numbers = #tpu.dot_dimension_numbers<[1], [0], [0], [1], [0, 0, 1, 1], [], []>} : vector<128x16xf32>, vector<16x32xf32>, vector<128x32xf32> -> vector<128x32xf32>
    %122 = arith.addf %101, %121 : vector<128x32xf32>
    %123 = vector.extract_strided_slice %31 {offsets = [0, 48], sizes = [128, 16], strides = [1, 1]} : vector<128x64xf32> to vector<128x16xf32>
    %124 = vector.extract_strided_slice %32 {offsets = [0, 48], sizes = [128, 16], strides = [1, 1]} : vector<128x64xf32> to vector<128x16xf32>
    "tpu.trace_start"() <{level = 10 : i32, message = "qd,kd->qk"}> : () -> ()
    %cst_43 = arith.constant dense<0.000000e+00> : vector<128x128xf32>
    %125 = tpu.matmul %123, %124, %cst_43 {dimension_numbers = #tpu.dot_dimension_numbers<[1], [1], [0], [0], [0, 0, 1, 0], [], []>} : vector<128x16xf32>, vector<128x16xf32>, vector<128x128xf32> -> vector<128x128xf32>
    "tpu.trace_stop"() : () -> ()
    %126 = arith.addf %125, %57 : vector<128x128xf32>
    %cst_44 = arith.constant dense<0xFF800000> : vector<128xf32>
    %127 = vector.multi_reduction <maximumf>, %126, %cst_44 [1] : vector<128x128xf32> to vector<128xf32>
    %128 = vector.shape_cast %127 : vector<128xf32> to vector<128x1xf32>
    %129 = vector.broadcast %128 : vector<128x1xf32> to vector<128x128xf32>
    %130 = arith.subf %126, %129 : vector<128x128xf32>
    %131 = math.exp %130 : vector<128x128xf32>
    %cst_45 = arith.constant dense<0.000000e+00> : vector<128xf32>
    %132 = vector.multi_reduction <add>, %131, %cst_45 [1] : vector<128x128xf32> to vector<128xf32>
    %133 = vector.shape_cast %132 : vector<128xf32> to vector<128x1xf32>
    %134 = tpu.reciprocal %133 {approx = true} : vector<128x1xf32> -> vector<128x1xf32>
    %135 = vector.broadcast %134 : vector<128x1xf32> to vector<128x128xf32>
    %136 = arith.mulf %131, %135 : vector<128x128xf32>
    %137 = vector.extract_strided_slice %33 {offsets = [0, 48], sizes = [128, 16], strides = [1, 1]} : vector<128x64xf32> to vector<128x16xf32>
    %cst_46 = arith.constant dense<0.000000e+00> : vector<128x16xf32>
    %138 = tpu.matmul %136, %137, %cst_46 {dimension_numbers = #tpu.dot_dimension_numbers<[1], [0], [0], [1], [0, 0, 1, 1], [], []>} : vector<128x128xf32>, vector<128x16xf32>, vector<128x16xf32> -> vector<128x16xf32>
    %139 = vector.extract_strided_slice %39 {offsets = [0, 48], sizes = [128, 16], strides = [1, 1]} : vector<128x64xf32> to vector<128x16xf32>
    %140 = arith.mulf %138, %139 : vector<128x16xf32>
    %141 = vector.extract_strided_slice %58 {offsets = [48, 0], sizes = [16, 32], strides = [1, 1]} : vector<64x32xf32> to vector<16x32xf32>
    %cst_47 = arith.constant dense<0.000000e+00> : vector<128x32xf32>
    %142 = tpu.matmul %140, %141, %cst_47 {dimension_numbers = #tpu.dot_dimension_numbers<[1], [0], [0], [1], [0, 0, 1, 1], [], []>} : vector<128x16xf32>, vector<16x32xf32>, vector<128x32xf32> -> vector<128x32xf32>
    %143 = arith.addf %122, %142 : vector<128x32xf32>
    %c0_48 = arith.constant 0 : index
    %c0_49 = arith.constant 0 : index
    %144 = vector.load %arg8[%c0_48, %c0_49] : memref<1x32xf32, #tpu.memory_space<vmem>>, vector<1x32xf32>
    %145 = vector.broadcast %144 : vector<1x32xf32> to vector<128x32xf32>
    %146 = arith.addf %143, %145 : vector<128x32xf32>
    %c0_50 = arith.constant 0 : index
    %c0_51 = arith.constant 0 : index
    %c0_52 = arith.constant 0 : index
    %147 = vector.load %arg9[%c0_50, %c0_51, %c0_52] : memref<1x128x32xf32, #tpu.memory_space<vmem>>, vector<1x128x32xf32>
    %148 = vector.shape_cast %147 : vector<1x128x32xf32> to vector<128x32xf32>
    %149 = vector.shape_cast %146 : vector<128x32xf32> to vector<1x128x32xf32>
    tpu.vector_store %arg9[%c0_50, %c0_51, %c0_52], %149 {strides = array<i32>} : memref<1x128x32xf32, #tpu.memory_space<vmem>>, vector<1x128x32xf32>,
    return
  }
  func.func @transform_0(%arg0: i32) -> (i32, i32, i32) {
    %c0_i32 = arith.constant 0 : i32
    %c0_i32_0 = arith.constant 0 : i32
    %c0_i32_1 = arith.constant 0 : i32
    return %arg0, %c0_i32, %c0_i32_0 : i32, i32, i32
  }
  func.func @transform_1(%arg0: i32) -> (i32, i32, i32) {
    %c0_i32 = arith.constant 0 : i32
    %c0_i32_0 = arith.constant 0 : i32
    %c0_i32_1 = arith.constant 0 : i32
    return %arg0, %c0_i32, %c0_i32_0 : i32, i32, i32
  }
  func.func @transform_2(%arg0: i32) -> (i32, i32) {
    %c0_i32 = arith.constant 0 : i32
    %c0_i32_0 = arith.constant 0 : i32
    %c0_i32_1 = arith.constant 0 : i32
    return %c0_i32, %c0_i32_0 : i32, i32
  }
  func.func @transform_3(%arg0: i32) -> (i32, i32) {
    %c0_i32 = arith.constant 0 : i32
    %c0_i32_0 = arith.constant 0 : i32
    %c0_i32_1 = arith.constant 0 : i32
    return %c0_i32, %c0_i32_0 : i32, i32
  }
  func.func @transform_4(%arg0: i32) -> (i32, i32) {
    %c0_i32 = arith.constant 0 : i32
    %c0_i32_0 = arith.constant 0 : i32
    %c0_i32_1 = arith.constant 0 : i32
    return %c0_i32, %c0_i32_0 : i32, i32
  }
  func.func @transform_5(%arg0: i32) -> (i32, i32) {
    %c0_i32 = arith.constant 0 : i32
    %c0_i32_0 = arith.constant 0 : i32
    %c0_i32_1 = arith.constant 0 : i32
    return %c0_i32, %c0_i32_0 : i32, i32
  }
  func.func @transform_6(%arg0: i32) -> (i32, i32) {
    %c0_i32 = arith.constant 0 : i32
    %c0_i32_0 = arith.constant 0 : i32
    %c0_i32_1 = arith.constant 0 : i32
    return %c0_i32, %c0_i32_0 : i32, i32
  }
  func.func @transform_7(%arg0: i32) -> (i32, i32) {
    %c0_i32 = arith.constant 0 : i32
    %c0_i32_0 = arith.constant 0 : i32
    %c0_i32_1 = arith.constant 0 : i32
    return %c0_i32, %c0_i32_0 : i32, i32
  }
  func.func @transform_8(%arg0: i32) -> (i32, i32, i32) {
    %c0_i32 = arith.constant 0 : i32
    %c0_i32_0 = arith.constant 0 : i32
    %c0_i32_1 = arith.constant 0 : i32
    return %arg0, %c0_i32, %c0_i32_0 : i32, i32, i32
  }
}

</mosaic_0001>

<bundles_post_ra>
// kernel: tpu_custom_call.1
= control target key start
LH: loop header
LB: loop body
LE: loop exit
PB: predicated region body
PF: predicated region fallthrough
CT: control target
= control target key end

     0   :  { %s6854_s27 = smov 0   ;;  %s9312_s0 = inlined_call_operand.vmem [shape: f32[2,128,32], index: 0, kind: input, shape index: {}]   ;;  %s9313_s1 = inlined_call_operand.vmem [shape: f32[2,1,128], index: 1, kind: input, shape index: {}]   ;;  %s9314_s2 = inlined_call_operand.vmem [shape: f32[1,32], index: 2, kind: input, shape index: {}]   ;;  %s9315_s3 = inlined_call_operand.vmem [shape: f32[1,32], index: 3, kind: input, shape index: {}]   ;;  %s9316_s4 = inlined_call_operand.vmem [shape: f32[32,256], index: 4, kind: input, shape index: {}]   ;;  %s9317_s5 = inlined_call_operand.vmem [shape: f32[1,256], index: 5, kind: input, shape index: {}]   ;;  %s9318_s6 = inlined_call_operand.vmem [shape: f32[64,32], index: 6, kind: input, shape index: {}]   ;;  %s9319_s7 = inlined_call_operand.vmem [shape: f32[1,32], index: 7, kind: input, shape index: {}]   ;;  %s9320_s8 = inlined_call_operand.vmem [shape: f32[2,128,32], index: 8, kind: output, shape index: {}]  }
   0x1 LB: > { %s4622_s28 = sadd.s32 4294967295, %s6798_s27   ;;  %p4626_p0 = scmp.ge.s32.totalorder %s6798_s27, 1  ;;  %s6798_s27 = sphi %s6854_s27, %s18_s27  }
   0x2   : > { %p270_p1 = scmp.lt.s32.totalorder %s6798_s27, 3 }
   0x4   : > { %p271_p2 = pnand %p4626_p0, %p270_p1 }
   0x6   : > { %274 = sbr.rel (%p271_p2) target bundleno = 2510 (0x9ce), region = 52 }
   0xd   : > { %p307_p3 = scmp.lt.s32.totalorder %s4622_s28, 1  ;;  %vm336_vm0 = vcmask 261120   ;;  %vm1082_vm1 = vcmask 130048   ;;  %s6801_s14 = smov 64  }
   0xe   : > { %s6802_s15 = smov 48   ;;  %s6803_s16 = smov 112   ;;  %vm7440_vm2 = vmpackc.low %vm1082_vm1, %vm1082_vm1 }
   0xf   : > { %s9713_s28 = smov (!%p307_p3, %s4622_s28), 1  ;;  %s6804_s17 = smov 32  }
  0x10   : > { %s4861_s29 = sshll.u32 %s9713_s28, 7  ;;  %s6805_s18 = smov 96  }
  0x11   : > { %s6870_s10 = scalar_lea.vmem %s9312_s0, %s4861_s29  ;;  %s6806_s19 = smov 16  }
  0x12   : > { %v320_v0 = vld [vmem:[%s6870_s10] sm:$0xff]  ;;  %v322_v1 = vld [vmem:[%s6870_s10 + $0x10] sm:$0xff]  ;;  %v321_v2 = vld [vmem:[%s6870_s10 + $0x8] sm:$0xff]  ;;  %s6807_s20 = smov 80   ;;  %s314_s23 = scalar_lea.vmem %s9313_s1, %s9713_s28 }
  0x13   : > { %v337_v3 = vsel %vm336_vm0, %v320_v0, 0.0  ;;  %v343_v4 = vsel %vm336_vm0, %v322_v1, 0.0  ;;  %v323_v5 = vld [vmem:[%s6870_s10 + $0x18] sm:$0xff]  ;;  %v340_v6 = vsel %vm336_vm0, %v321_v2, 0.0  ;;  %v324_v8 = vld [vmem:[%s6870_s10 + $0x20] sm:$0xff]  ;;  %v325_v9 = vld [vmem:[%s6870_s10 + $0x28] sm:$0xff]  ;;  %s9275_s25 = scalar_lea.vmem %s9320_s8, %s4861_s29 }
  0x14   : > { %338 = vadd.xlane.f32.xlu0 %v337_v3  ;;  %344 = vadd.xlane.f32.xlu1 %v343_v4  ;;  %v346_v7 = vsel %vm336_vm0, %v323_v5, 0.0  ;;  %v349_v10 = vsel %vm336_vm0, %v324_v8, 0.0  ;;  %v352_v11 = vsel %vm336_vm0, %v325_v9, 0.0  ;;  %v6885_v12 = vld [vmem:[%s6870_s10 + $0x30] sm:$0xff]  ;;  %v6888_v13 = vld [vmem:[%s6870_s10 + $0x38] sm:$0xff]  ;;  %v6895_v16 = vld [vmem:[%s6870_s10 + $0x40] sm:$0xff] }
  0x15   : > { %v355_v14 = vsel %vm336_vm0, %v6885_v12, 0.0  ;;  %v358_v15 = vsel %vm336_vm0, %v6888_v13, 0.0  ;;  %v6898_v17 = vld [vmem:[%s6870_s10 + $0x48] sm:$0xff]  ;;  %v361_v18 = vsel %vm336_vm0, %v6895_v16, 0.0  ;;  %v6905_v20 = vld [vmem:[%s6870_s10 + $0x50] sm:$0xff]  ;;  %v6908_v21 = vld [vmem:[%s6870_s10 + $0x58] sm:$0xff] }
  0x16   : > { %v364_v19 = vsel %vm336_vm0, %v6898_v17, 0.0  ;;  %v367_v22 = vsel %vm336_vm0, %v6905_v20, 0.0  ;;  %v370_v23 = vsel %vm336_vm0, %v6908_v21, 0.0  ;;  %v6915_v24 = vld [vmem:[%s6870_s10 + $0x60] sm:$0xff]  ;;  %v6918_v25 = vld [vmem:[%s6870_s10 + $0x68] sm:$0xff]  ;;  %v6925_v28 = vld [vmem:[%s6870_s10 + $0x70] sm:$0xff] }
  0x17   : > { %v373_v26 = vsel %vm336_vm0, %v6915_v24, 0.0  ;;  %v376_v27 = vsel %vm336_vm0, %v6918_v25, 0.0  ;;  %v6928_v29 = vld [vmem:[%s6870_s10 + $0x78] sm:$0xff]  ;;  %v379_v30 = vsel %vm336_vm0, %v6925_v28, 0.0 }
  0x18   : > { %341 = vadd.xlane.f32.xlu0 %v340_v6  ;;  %347 = vadd.xlane.f32.xlu1 %v346_v7  ;;  %v382_v31 = vsel %vm336_vm0, %v6928_v29, 0.0 }
  0x1c   : > { %350 = vadd.xlane.f32.xlu0 %v349_v10  ;;  %353 = vadd.xlane.f32.xlu1 %v352_v11 }
  0x20   : > { %356 = vadd.xlane.f32.xlu0 %v355_v14  ;;  %359 = vadd.xlane.f32.xlu1 %v358_v15 }
  0x24   : > { %362 = vadd.xlane.f32.xlu0 %v361_v18  ;;  %365 = vadd.xlane.f32.xlu1 %v364_v19 }
  0x28   : > { %368 = vadd.xlane.f32.xlu0 %v367_v22  ;;  %371 = vadd.xlane.f32.xlu1 %v370_v23 }
  0x2c   : > { %374 = vadd.xlane.f32.xlu0 %v373_v26  ;;  %377 = vadd.xlane.f32.xlu1 %v376_v27 }
  0x30   : > { %380 = vadd.xlane.f32.xlu0 %v379_v30  ;;  %383 = vadd.xlane.f32.xlu1 %v382_v31 }
  0xa1   : > { %v339_v32 = vpop.xlane.xlu0 %338  ;;  %v345_v33 = vpop.xlane.xlu1 %344 }
  0xa2   : > { %v386_v34 = vmul.f32 0.03125, %v339_v32  ;;  %v388_v35 = vmul.f32 0.03125, %v345_v33 }
  0xa4   : > { %v6934_v36 = vsub.f32 %v320_v0, %v386_v34  ;;  %v6936_v37 = vsub.f32 %v322_v1, %v388_v35 }
  0xa5   : > { %v342_v38 = vpop.xlane.xlu0 %341  ;;  %v348_v39 = vpop.xlane.xlu1 %347 }
  0xa6   : > { %v387_v40 = vmul.f32 0.03125, %v342_v38  ;;  %v389_v41 = vmul.f32 0.03125, %v348_v39  ;;  %v418_v42 = vmul.f32 %v6934_v36, %v6934_v36  ;;  %v420_v43 = vmul.f32 %v6936_v37, %v6936_v37 }
  0xa8   : > { %v6942_v44 = vsub.f32 %v321_v2, %v387_v40  ;;  %v6944_v45 = vsub.f32 %v323_v5, %v389_v41  ;;  %v434_v46 = vsel %vm336_vm0, %v418_v42, 0.0  ;;  %v440_v49 = vsel %vm336_vm0, %v420_v43, 0.0 }
  0xa9   : > { %435 = vadd.xlane.f32.xlu0 %v434_v46  ;;  %v351_v47 = vpop.xlane.xlu0 %350  ;;  %v354_v48 = vpop.xlane.xlu1 %353 }
  0xaa   : > { %v390_v50 = vmul.f32 0.03125, %v351_v47  ;;  %v391_v51 = vmul.f32 0.03125, %v354_v48  ;;  %v419_v52 = vmul.f32 %v6942_v44, %v6942_v44  ;;  %v421_v53 = vmul.f32 %v6944_v45, %v6944_v45 }
  0xac   : > { %v6952_v54 = vsub.f32 %v324_v8, %v390_v50  ;;  %v6954_v55 = vsub.f32 %v325_v9, %v391_v51  ;;  %v437_v56 = vsel %vm336_vm0, %v419_v52, 0.0  ;;  %v443_v59 = vsel %vm336_vm0, %v421_v53, 0.0  ;;  %v592_v53 = vld [vmem:[%s9316_s4] sm:$0xff] }
  0xad   : > { %441 = vadd.xlane.f32.xlu0 %v440_v49  ;;  %438 = vadd.xlane.f32.xlu1 %v437_v56  ;;  %v357_v57 = vpop.xlane.xlu0 %356  ;;  %v360_v58 = vpop.xlane.xlu1 %359  ;;  %v594_v56 = vld [vmem:[%s9316_s4 + $0x10] sm:$0xff] }
  0xae   : > { %v392_v60 = vmul.f32 0.03125, %v357_v57  ;;  %v393_v61 = vmul.f32 0.03125, %v360_v58  ;;  %v422_v62 = vmul.f32 %v6952_v54, %v6952_v54  ;;  %v423_v63 = vmul.f32 %v6954_v55, %v6954_v55 }
  0xaf   : > { %v5753_v58 = vpack.c.bf16 %v594_v56, %v592_v53 }
  0xb0   : > { %v6963_v0 = vsub.f32 %v6885_v12, %v392_v60  ;;  %v6966_v1 = vsub.f32 %v6888_v13, %v393_v61  ;;  %v446_v2 = vsel %vm336_vm0, %v422_v62, 0.0  ;;  %v449_v5 = vsel %vm336_vm0, %v423_v63, 0.0  ;;  %v597_v60 = vld [vmem:[%s9316_s4 + $0x28] sm:$0xff]  ;;  %v599_v61 = vld [vmem:[%s9316_s4 + $0x38] sm:$0xff]  ;;  %v596_v63 = vld [vmem:[%s9316_s4 + $0x20] sm:$0xff] }
  0xb1   : > { %444 = vadd.xlane.f32.xlu1 %v443_v59  ;;  %447 = vadd.xlane.f32.xlu0 %v446_v2  ;;  %v363_v3 = vpop.xlane.xlu0 %362  ;;  %v366_v4 = vpop.xlane.xlu1 %365  ;;  %v5755_v62 = vpack.c.bf16 %v599_v61, %v597_v60  ;;  %v598_v2 = vld [vmem:[%s9316_s4 + $0x30] sm:$0xff] }
  0xb2   : > { %v394_v6 = vmul.f32 0.03125, %v363_v3  ;;  %v395_v7 = vmul.f32 0.03125, %v366_v4  ;;  %v424_v8 = vmul.f32 %v6963_v0, %v6963_v0  ;;  %v425_v9 = vmul.f32 %v6966_v1, %v6966_v1 }
  0xb3   : > { %v5757_v3 = vpack.c.bf16 %v598_v2, %v596_v63  ;;  %v6800_v4 = vmov 0.0  }
  0xb4   : > { %v6975_v10 = vsub.f32 %v6895_v16, %v394_v6  ;;  %v6978_v11 = vsub.f32 %v6898_v17, %v395_v7  ;;  %v452_v12 = vsel %vm336_vm0, %v424_v8, 0.0  ;;  %v455_v15 = vsel %vm336_vm0, %v425_v9, 0.0  ;;  %724 = vmatprep.mubr.f32.mxu1 %v6800_v4 }
  0xb5   : > { %450 = vadd.xlane.f32.xlu1 %v449_v5  ;;  %453 = vadd.xlane.f32.xlu0 %v452_v12  ;;  %v369_v13 = vpop.xlane.xlu0 %368  ;;  %v372_v14 = vpop.xlane.xlu1 %371 }
  0xb6   : > { %v396_v18 = vmul.f32 0.03125, %v369_v13  ;;  %v397_v19 = vmul.f32 0.03125, %v372_v14  ;;  %v426_v22 = vmul.f32 %v6975_v10, %v6975_v10  ;;  %v427_v16 = vmul.f32 %v6978_v11, %v6978_v11 }
  0xb8   : > { %v6987_v23 = vsub.f32 %v6905_v20, %v396_v18  ;;  %v6990_v17 = vsub.f32 %v6908_v21, %v397_v19  ;;  %v458_v26 = vsel %vm336_vm0, %v426_v22, 0.0  ;;  %v461_v31 = vsel %vm336_vm0, %v427_v16, 0.0 }
  0xb9   : > { %456 = vadd.xlane.f32.xlu1 %v455_v15  ;;  %459 = vadd.xlane.f32.xlu0 %v458_v26  ;;  %v375_v27 = vpop.xlane.xlu0 %374  ;;  %v378_v30 = vpop.xlane.xlu1 %377 }
  0xba   : > { %v398_v32 = vmul.f32 0.03125, %v375_v27  ;;  %v399_v33 = vmul.f32 0.03125, %v378_v30  ;;  %v428_v34 = vmul.f32 %v6987_v23, %v6987_v23  ;;  %v429_v20 = vmul.f32 %v6990_v17, %v6990_v17 }
  0xbc   : > { %v6999_v35 = vsub.f32 %v6915_v24, %v398_v32  ;;  %v7002_v21 = vsub.f32 %v6918_v25, %v399_v33  ;;  %v464_v38 = vsel %vm336_vm0, %v428_v34, 0.0  ;;  %v467_v41 = vsel %vm336_vm0, %v429_v20, 0.0 }
  0xbd   : > { %462 = vadd.xlane.f32.xlu1 %v461_v31  ;;  %465 = vadd.xlane.f32.xlu0 %v464_v38  ;;  %v381_v39 = vpop.xlane.xlu0 %380  ;;  %v384_v40 = vpop.xlane.xlu1 %383  ;;  %v7052_v38 = vld [vmem:[%s9314_s2] ss:$0 sm:$0xff] }
  0xbe   : > { %v400_v42 = vmul.f32 0.03125, %v381_v39  ;;  %v401_v43 = vmul.f32 0.03125, %v384_v40  ;;  %v430_v46 = vmul.f32 %v6999_v35, %v6999_v35  ;;  %v431_v24 = vmul.f32 %v7002_v21, %v7002_v21 }
  0xc0   : > { %v7011_v47 = vsub.f32 %v6925_v28, %v400_v42  ;;  %v7014_v25 = vsub.f32 %v6928_v29, %v401_v43  ;;  %v470_v48 = vsel %vm336_vm0, %v430_v46, 0.0  ;;  %v473_v49 = vsel %vm336_vm0, %v431_v24, 0.0  ;;  %v593_v28 = vld [vmem:[%s9316_s4 + $0x8] sm:$0xff]  ;;  %v595_v29 = vld [vmem:[%s9316_s4 + $0x18] sm:$0xff] }
  0xc1   : > { %468 = vadd.xlane.f32.xlu1 %v467_v41  ;;  %471 = vadd.xlane.f32.xlu0 %v470_v48  ;;  %v5751_v52 = vpack.c.bf16 %v595_v29, %v593_v28  ;;  %v7058_v41 = vld [vmem:[%s9315_s3] ss:$0 sm:$0xff] }
  0xc2   : > { %v432_v50 = vmul.f32 %v7011_v47, %v7011_v47  ;;  %v433_v51 = vmul.f32 %v7014_v25, %v7014_v25 }
  0xc3   : > { %5752 = vmatprep.subr.bf16.mxu1 %v5751_v52 }
  0xc4   : > { %v476_v57 = vsel %vm336_vm0, %v432_v50, 0.0  ;;  %v479_v59 = vsel %vm336_vm0, %v433_v51, 0.0  ;;  %5754 = vmatpush1.bf16.msra.mxu1 %v5753_v58 }
  0xc5   : > { %474 = vadd.xlane.f32.xlu1 %v473_v49  ;;  %477 = vadd.xlane.f32.xlu0 %v476_v57 }
  0xc6   : > { %5756 = vmatprep.subr.bf16.mxu1 %v5755_v62 }
  0xc8   : > { %5758 = vmatpush1.bf16.msra.mxu1 %v5757_v3 }
  0xc9   : > { %480 = vadd.xlane.f32.xlu1 %v479_v59 }
 0x136   : > { %v436_v5 = vpop.xlane.xlu0 %435 }
 0x137   : > { %v482_v6 = vmul.f32 0.03125, %v436_v5 }
 0x139   : > { %v498_v7 = vadd.f32 1e-05, %v482_v6 }
 0x13a   : > { %v439_v8 = vpop.xlane.xlu1 %438  ;;  %v442_v9 = vpop.xlane.xlu0 %441 }
 0x13b   : > { %6440 = vrsqrt.f32 %v498_v7  ;;  %v483_v12 = vmul.f32 0.03125, %v439_v8  ;;  %v484_v13 = vmul.f32 0.03125, %v442_v9 }
 0x13d   : > { %v499_v14 = vadd.f32 1e-05, %v483_v12  ;;  %v500_v15 = vadd.f32 1e-05, %v484_v13 }
 0x13e   : > { %v445_v18 = vpop.xlane.xlu1 %444  ;;  %v448_v19 = vpop.xlane.xlu0 %447 }
 0x13f   : > { %6442 = vrsqrt.f32 %v499_v14  ;;  %v485_v22 = vmul.f32 0.03125, %v445_v18  ;;  %v486_v16 = vmul.f32 0.03125, %v448_v19 }
 0x140   : > { %6444 = vrsqrt.f32 %v500_v15 }
 0x141   : > { %v501_v26 = vadd.f32 1e-05, %v485_v22  ;;  %v502_v27 = vadd.f32 1e-05, %v486_v16 }
 0x142   : > { %v451_v30 = vpop.xlane.xlu1 %450  ;;  %v454_v31 = vpop.xlane.xlu0 %453 }
 0x143   : > { %6446 = vrsqrt.f32 %v501_v26  ;;  %v487_v32 = vmul.f32 0.03125, %v451_v30  ;;  %v488_v20 = vmul.f32 0.03125, %v454_v31 }
 0x144   : > { %6448 = vrsqrt.f32 %v502_v27 }
 0x145   : > { %v6441_v33 = vpop.eup %6440  ;;  %v503_v34 = vadd.f32 1e-05, %v487_v32  ;;  %v504_v46 = vadd.f32 1e-05, %v488_v20 }
 0x146   : > { %v457_v39 = vpop.xlane.xlu1 %456  ;;  %v530_v40 = vmul.f32 %v6441_v33, %v6934_v36  ;;  %v460_v49 = vpop.xlane.xlu0 %459 }
 0x147   : > { %6450 = vrsqrt.f32 %v503_v34  ;;  %v489_v24 = vmul.f32 0.03125, %v457_v39  ;;  %v490_v53 = vmul.f32 0.03125, %v460_v49 }
 0x148   : > { %v553_v42 = vmul.f32 %v7052_v38, %v530_v40  ;;  %6452 = vrsqrt.f32 %v504_v46 }
 0x149   : > { %v6443_v43 = vpop.eup %6442  ;;  %v505_v52 = vadd.f32 1e-05, %v489_v24 }
 0x14a   : > { %v6445_v48 = vpop.eup %6444  ;;  %v576_v50 = vadd.f32 %v7058_v41, %v553_v42  ;;  %v531_v51 = vmul.f32 %v6443_v43, %v6942_v44  ;;  %v463_v56 = vpop.xlane.xlu1 %462 }
 0x14b   : > { %v532_v28 = vmul.f32 %v6445_v48, %v6936_v37  ;;  %6454 = vrsqrt.f32 %v505_v52  ;;  %v506_v37 = vadd.f32 1e-05, %v490_v53  ;;  %v491_v60 = vmul.f32 0.03125, %v463_v56  ;;  %v466_v61 = vpop.xlane.xlu0 %465 }
 0x14c   : > { %4633 = vmatmul.mubr.msk.f32.vlgmr.msra.gmra.mrb[0].mxu1 %vm336_vm0, %v576_v50  ;;  %v554_v36 = vmul.f32 %v7052_v38, %v531_v51  ;;  %v492_v5 = vmul.f32 0.03125, %v466_v61 }
 0x14d   : > { %v6447_v29 = vpop.eup %6446  ;;  %730 = vmatprep.mubr.f32.mxu1 %v6800_v4  ;;  %v555_v58 = vmul.f32 %v7052_v38, %v532_v28  ;;  %6456 = vrsqrt.f32 %v506_v37 }
 0x14e   : > { %v577_v57 = vadd.f32 %v7058_v41, %v554_v36  ;;  %v533_v59 = vmul.f32 %v6447_v29, %v6944_v45  ;;  %v6449_v44 = vpop.eup %6448  ;;  %v507_v45 = vadd.f32 1e-05, %v491_v60  ;;  %v469_v6 = vpop.xlane.xlu1 %468 }
 0x14f   : > { %v578_v62 = vadd.f32 %v7058_v41, %v555_v58  ;;  %v534_v2 = vmul.f32 %v6449_v44, %v6952_v54  ;;  %v508_v54 = vadd.f32 1e-05, %v492_v5  ;;  %v493_v13 = vmul.f32 0.03125, %v469_v6  ;;  %v472_v14 = vpop.xlane.xlu0 %471 }
 0x150   : > { %4634 = vmatmul.mubr.msk.f32.gmra.mrb[2].mxu1 %vm336_vm0, %v577_v57  ;;  %v556_v63 = vmul.f32 %v7052_v38, %v533_v59  ;;  %6458 = vrsqrt.f32 %v507_v45  ;;  %v494_v16 = vmul.f32 0.03125, %v472_v14 }
 0x151   : > { %736 = vmatprep.mubr.f32.mxu1 %v6800_v4  ;;  %v6451_v3 = vpop.eup %6450  ;;  %v557_v8 = vmul.f32 %v7052_v38, %v534_v2  ;;  %6460 = vrsqrt.f32 %v508_v54 }
 0x152   : > { %v579_v7 = vadd.f32 %v7058_v41, %v556_v63  ;;  %v535_v9 = vmul.f32 %v6451_v3, %v6954_v55  ;;  %v6453_v12 = vpop.eup %6452  ;;  %v509_v55 = vadd.f32 1e-05, %v493_v13  ;;  %v475_v26 = vpop.xlane.xlu1 %474 }
 0x153   : > { %v580_v15 = vadd.f32 %v7058_v41, %v557_v8  ;;  %v536_v19 = vmul.f32 %v6453_v12, %v6963_v0  ;;  %v510_v0 = vadd.f32 1e-05, %v494_v16  ;;  %v495_v33 = vmul.f32 0.03125, %v475_v26  ;;  %v478_v34 = vpop.xlane.xlu0 %477  ;;  %v600_v12 = vld [vmem:[%s9317_s5] sm:$0x3] }
 0x154   : > { %4635 = vmatmul.mubr.msk.f32.gmra.mrb[4].mxu1 %vm336_vm0, %v578_v62  ;;  %v558_v18 = vmul.f32 %v7052_v38, %v535_v9  ;;  %6462 = vrsqrt.f32 %v509_v55  ;;  %v496_v43 = vmul.f32 0.03125, %v478_v34  ;;  %v9322_v8 = vlaneseq }
 0x155   : > { %742 = vmatprep.mubr.f32.mxu1 %v6800_v4  ;;  %v6455_v22 = vpop.eup %6454  ;;  %v559_v30 = vmul.f32 %v7052_v38, %v536_v19  ;;  %6464 = vrsqrt.f32 %v510_v0 }
 0x156   : > { %v581_v27 = vadd.f32 %v7058_v41, %v558_v18  ;;  %v537_v31 = vmul.f32 %v6455_v22, %v6966_v1  ;;  %v511_v1 = vadd.f32 1e-05, %v495_v33  ;;  %v481_v46 = vpop.xlane.xlu1 %480  ;;  %v7139_v9 = vshrl.u32 %v9322_v8, 7 }
 0x157   : > { %v6457_v32 = vpop.eup %6456  ;;  %v582_v20 = vadd.f32 %v7058_v41, %v559_v30  ;;  %v497_v51 = vmul.f32 0.03125, %v481_v46 }
 0x158   : > { %4636 = vmatmul.mubr.msk.f32.gmra.mrb[6].mxu1 %vm336_vm0, %v579_v7  ;;  %v560_v39 = vmul.f32 %v7052_v38, %v537_v31  ;;  %v538_v40 = vmul.f32 %v6457_v32, %v6975_v10  ;;  %6466 = vrsqrt.f32 %v511_v1  ;;  %v512_v10 = vadd.f32 1e-05, %v496_v43 }
 0x159   : > { %748 = vmatprep.mubr.f32.mxu1 %v6800_v4  ;;  %v513_v53 = vadd.f32 1e-05, %v497_v51 }
 0x15a   : > { %v6459_v42 = vpop.eup %6458  ;;  %v583_v24 = vadd.f32 %v7058_v41, %v560_v39  ;;  %v561_v48 = vmul.f32 %v7052_v38, %v538_v40  ;;  %6468 = vrsqrt.f32 %v512_v10 }
 0x15b   : > { %v539_v49 = vmul.f32 %v6459_v42, %v6978_v11  ;;  %v6461_v50 = vpop.eup %6460  ;;  %6470 = vrsqrt.f32 %v513_v53 }
 0x15c   : > { %4637 = vmatmul.mubr.msk.f32.gmra.mrb[8].mxu1 %vm336_vm0, %v580_v15  ;;  %v584_v28 = vadd.f32 %v7058_v41, %v561_v48  ;;  %v540_v29 = vmul.f32 %v6461_v50, %v6987_v23 }
 0x15d   : > { %754 = vmatprep.mubr.f32.mxu1 %v6800_v4  ;;  %v562_v36 = vmul.f32 %v7052_v38, %v539_v49 }
 0x15e   : > { %v6463_v52 = vpop.eup %6462  ;;  %v563_v56 = vmul.f32 %v7052_v38, %v540_v29 }
 0x15f   : > { %v585_v11 = vadd.f32 %v7058_v41, %v562_v36  ;;  %v541_v57 = vmul.f32 %v6463_v52, %v6990_v17  ;;  %v6465_v58 = vpop.eup %6464 }
 0x160   : > { %4638 = vmatmul.mubr.msk.f32.gmra.mrb[10].mxu1 %vm336_vm0, %v581_v27  ;;  %v586_v23 = vadd.f32 %v7058_v41, %v563_v56  ;;  %v542_v44 = vmul.f32 %v6465_v58, %v6999_v35 }
 0x161   : > { %760 = vmatprep.mubr.f32.mxu1 %v6800_v4  ;;  %v564_v59 = vmul.f32 %v7052_v38, %v541_v57 }
 0x162   : > { %v6467_v37 = vpop.eup %6466  ;;  %v565_v17 = vmul.f32 %v7052_v38, %v542_v44 }
 0x163   : > { %v587_v60 = vadd.f32 %v7058_v41, %v564_v59  ;;  %v543_v61 = vmul.f32 %v6467_v37, %v7002_v21 }
 0x164   : > { %4639 = vmatmul.mubr.msk.f32.gmra.mrb[12].mxu1 %vm336_vm0, %v582_v20  ;;  %v6469_v62 = vpop.eup %6468  ;;  %v588_v63 = vadd.f32 %v7058_v41, %v565_v17 }
 0x165   : > { %766 = vmatprep.mubr.f32.mxu1 %v6800_v4  ;;  %v566_v35 = vmul.f32 %v7052_v38, %v543_v61  ;;  %v544_v2 = vmul.f32 %v6469_v62, %v7011_v47  ;;  %v6471_v3 = vpop.eup %6470 }
 0x166   : > { %v545_v5 = vmul.f32 %v6471_v3, %v7014_v25  ;;  %v9321_v25 = vsub.s32 0, %v7139_v9 }
 0x167   : > { %v589_v45 = vadd.f32 %v7058_v41, %v566_v35  ;;  %v567_v21 = vmul.f32 %v7052_v38, %v544_v2 }
 0x168   : > { %4640 = vmatmul.mubr.msk.f32.gmra.mrb[14].mxu1 %vm336_vm0, %v583_v24  ;;  %v568_v7 = vmul.f32 %v7052_v38, %v545_v5  ;;  %v7147_v38 = vrot.slane %v600_v12, %v9321_v25 }
 0x169   : > { %772 = vmatprep.mubr.f32.mxu1 %v6800_v4  ;;  %v590_v6 = vadd.f32 %v7058_v41, %v567_v21 }
 0x16a   : > { %v591_v47 = vadd.f32 %v7058_v41, %v568_v7 }
 0x16c   : > { %4641 = vmatmul.mubr.msk.f32.gmra.mrb[16].mxu1 %vm336_vm0, %v584_v28 }
 0x16d   : > { %778 = vmatprep.mubr.f32.mxu1 %v6800_v4 }
 0x170   : > { %4642 = vmatmul.mubr.msk.f32.gmra.mrb[18].mxu1 %vm336_vm0, %v585_v11 }
 0x171   : > { %784 = vmatprep.mubr.f32.mxu1 %v6800_v4 }
 0x174   : > { %4643 = vmatmul.mubr.msk.f32.gmra.mrb[20].mxu1 %vm336_vm0, %v586_v23 }
 0x175   : > { %790 = vmatprep.mubr.f32.mxu1 %v6800_v4 }
 0x178   : > { %4644 = vmatmul.mubr.msk.f32.gmra.mrb[22].mxu1 %vm336_vm0, %v587_v60 }
 0x179   : > { %796 = vmatprep.mubr.f32.mxu1 %v6800_v4 }
 0x17c   : > { %4645 = vmatmul.mubr.msk.f32.gmra.mrb[24].mxu1 %vm336_vm0, %v588_v63 }
 0x17d   : > { %802 = vmatprep.mubr.f32.mxu1 %v6800_v4 }
 0x180   : > { %4646 = vmatmul.mubr.msk.f32.gmra.mrb[26].mxu1 %vm336_vm0, %v589_v45 }
 0x181   : > { %808 = vmatprep.mubr.f32.mxu1 %v6800_v4 }
 0x184   : > { %4647 = vmatmul.mubr.msk.f32.gmra.mrb[28].mxu1 %vm336_vm0, %v590_v6 }
 0x185   : > { %814 = vmatprep.mubr.f32.mxu1 %v6800_v4  ;;  %v608_v4 = vsub.s32 1, %v7139_v9 }
 0x187   : > { %v7151_v14 = vrot.slane %v600_v12, %v608_v4 }
 0x188   : > { %4648 = vmatmul.mubr.msk.f32.gmra.mrb[30].mxu1 %vm336_vm0, %v591_v47 }
 0x21f   : > { %v726_v54 = vpop.f32.mrb[0].mxu1 }
 0x220   : > { %v727_v41 = vadd.f32 %v726_v54, %v7147_v38  ;;  %v728_v13 = vpop.f32.mrb[1].mxu1 }
 0x221   : > { %v7161_v55 = vadd.f32 %v728_v13, %v7151_v14 }
 0x222   : > { %v7153_v15 = vmul.f32 0.25, %v727_v41 }
 0x223   : > { %v732_v18 = vpop.f32.mrb[2].mxu1 }
 0x224   : > { %v7156_v19 = vadd.f32 %v732_v18, %v7147_v38  ;;  %v734_v22 = vpop.f32.mrb[3].mxu1  ;;  %5223 = vmatprep.mubr.msk.f32.mxu1 %vm1082_vm1, %v7153_v15 }
 0x225   : > { %v7164_v16 = vadd.f32 %v734_v22, %v7151_v14 }
 0x226   : > { %v7167_v26 = vpack.i.bf16 %v7156_v19, %v727_v41 }
 0x227   : > { %v738_v27 = vpop.f32.mrb[4].mxu1  ;;  %v5807_v30 = vpack.c.bf16 %v7164_v16, %v7161_v55  ;;  %v7173_v31 = vpack.i.bf16 %v7164_v16, %v7161_v55 }
 0x228   : > { %6161 = vrot.lane.b32.xlu0 %v7167_v26, %s6801_s14  ;;  %v740_v32 = vpop.f32.mrb[5].mxu1  ;;  %v7178_v33 = vadd.f32 %v738_v27, %v7147_v38 }
 0x229   : > { %9431 = vst [vmem:[#allocation2_spill] sm:$0xff] %v7173_v31  ;;  %5808 = vmatprep.subr.bf16.mxu0 %v5807_v30  ;;  %v7184_v39 = vadd.f32 %v740_v32, %v7151_v14 }
 0x22a   : > { %5810 = vmatpush3.bf16.msra.mxu0 %v5807_v30 }
 0x22b   : > { %v744_v0 = vpop.f32.mrb[6].mxu1 }
 0x22c   : > { %v7181_v34 = vadd.f32 %v744_v0, %v7147_v38  ;;  %v746_v20 = vpop.f32.mrb[7].mxu1 }
 0x22d   : > { %v7187_v40 = vadd.f32 %v746_v20, %v7151_v14 }
 0x22e   : > { %v7191_v42 = vpack.i.bf16 %v7181_v34, %v7178_v33 }
 0x22f   : > { %v750_v1 = vpop.f32.mrb[8].mxu1  ;;  %v5811_v43 = vpack.c.bf16 %v7187_v40, %v7184_v39  ;;  %v7197_v46 = vpack.i.bf16 %v7187_v40, %v7184_v39 }
 0x230   : > { %6166 = vrot.lane.b32.xlu1 %v7191_v42, %s6801_s14  ;;  %v752_v24 = vpop.f32.mrb[9].mxu1  ;;  %v7202_v49 = vadd.f32 %v750_v1, %v7147_v38 }
 0x231   : > { %9432 = vst [vmem:[#allocation3_spill] sm:$0xff] %v7197_v46  ;;  %5812 = vmatprep.subr.bf16.mxu0 %v5811_v43  ;;  %v7208_v51 = vadd.f32 %v752_v24, %v7151_v14 }
 0x232   : > { %5814 = vmatpush3.bf16.msra.mxu0 %v5811_v43 }
 0x233   : > { %v756_v48 = vpop.f32.mrb[10].mxu1 }
 0x234   : > { %v7205_v50 = vadd.f32 %v756_v48, %v7147_v38  ;;  %v758_v10 = vpop.f32.mrb[11].mxu1 }
 0x235   : > { %v7211_v28 = vadd.f32 %v758_v10, %v7151_v14 }
 0x236   : > { %v7215_v36 = vpack.i.bf16 %v7205_v50, %v7202_v49 }
 0x237   : > { %v762_v29 = vpop.f32.mrb[12].mxu1  ;;  %v5815_v52 = vpack.c.bf16 %v7211_v28, %v7208_v51  ;;  %v7221_v53 = vpack.i.bf16 %v7211_v28, %v7208_v51 }
 0x238   : > { %6171 = vrot.lane.b32.xlu1 %v7215_v36, %s6801_s14  ;;  %v764_v11 = vpop.f32.mrb[13].mxu1  ;;  %v7226_v57 = vadd.f32 %v762_v29, %v7147_v38 }
 0x239   : > { %9433 = vst [vmem:[#allocation4_spill] sm:$0xff] %v7221_v53  ;;  %5816 = vmatprep.subr.bf16.mxu0 %v5815_v52  ;;  %v7232_v59 = vadd.f32 %v764_v11, %v7151_v14 }
 0x23a   : > { %5818 = vmatpush3.bf16.msra.mxu0 %v5815_v52 }
 0x23b   : > { %v768_v56 = vpop.f32.mrb[14].mxu1 }
 0x23c   : > { %v7229_v58 = vadd.f32 %v768_v56, %v7147_v38  ;;  %v770_v23 = vpop.f32.mrb[15].mxu1 }
 0x23d   : > { %v7235_v44 = vadd.f32 %v770_v23, %v7151_v14 }
 0x23e   : > { %v7239_v37 = vpack.i.bf16 %v7229_v58, %v7226_v57 }
 0x23f   : > { %v774_v60 = vpop.f32.mrb[16].mxu1  ;;  %v5819_v17 = vpack.c.bf16 %v7235_v44, %v7232_v59  ;;  %v7245_v61 = vpack.i.bf16 %v7235_v44, %v7232_v59 }
 0x240   : > { %6176 = vrot.lane.b32.xlu1 %v7239_v37, %s6801_s14  ;;  %v776_v62 = vpop.f32.mrb[17].mxu1  ;;  %v7250_v35 = vadd.f32 %v774_v60, %v7147_v38 }
 0x241   : > { %9434 = vst [vmem:[#allocation5_spill] sm:$0xff] %v7245_v61  ;;  %5820 = vmatprep.subr.bf16.mxu0 %v5819_v17  ;;  %v7256_v45 = vadd.f32 %v776_v62, %v7151_v14 }
 0x242   : > { %5822 = vmatpush3.bf16.msra.mxu0 %v5819_v17 }
 0x243   : > { %v780_v63 = vpop.f32.mrb[18].mxu1 }
 0x244   : > { %v7253_v2 = vadd.f32 %v780_v63, %v7147_v38  ;;  %v782_v3 = vpop.f32.mrb[19].mxu1 }
 0x245   : > { %v7259_v21 = vadd.f32 %v782_v3, %v7151_v14 }
 0x246   : > { %v7263_v5 = vpack.i.bf16 %v7253_v2, %v7250_v35 }
 0x247   : > { %v786_v6 = vpop.f32.mrb[20].mxu1  ;;  %v5823_v7 = vpack.c.bf16 %v7259_v21, %v7256_v45  ;;  %v7269_v47 = vpack.i.bf16 %v7259_v21, %v7256_v45 }
 0x248   : > { %6181 = vrot.lane.b32.xlu0 %v7263_v5, %s6801_s14  ;;  %v788_v12 = vpop.f32.mrb[21].mxu1  ;;  %v7274_v54 = vadd.f32 %v786_v6, %v7147_v38 }
 0x249   : > { %9435 = vst [vmem:[#allocation6_spill] sm:$0xff] %v7269_v47  ;;  %5824 = vmatprep.subr.bf16.mxu0 %v5823_v7  ;;  %v7280_v18 = vadd.f32 %v788_v12, %v7151_v14 }
 0x24a   : > { %5826 = vmatpush3.bf16.msra.mxu0 %v5823_v7 }
 0x24b   : > { %v792_v4 = vpop.f32.mrb[22].mxu1 }
 0x24c   : > { %v7277_v41 = vadd.f32 %v792_v4, %v7147_v38  ;;  %v794_v13 = vpop.f32.mrb[23].mxu1 }
 0x24d   : > { %v7283_v22 = vadd.f32 %v794_v13, %v7151_v14 }
 0x24e   : > { %v7287_v27 = vpack.i.bf16 %v7277_v41, %v7274_v54 }
 0x24f   : > { %v798_v30 = vpop.f32.mrb[24].mxu1  ;;  %v5827_v32 = vpack.c.bf16 %v7283_v22, %v7280_v18  ;;  %v7293_v0 = vpack.i.bf16 %v7283_v22, %v7280_v18 }
 0x250   : > { %6186 = vrot.lane.b32.xlu1 %v7287_v27, %s6801_s14  ;;  %v800_v20 = vpop.f32.mrb[25].mxu1  ;;  %v799_v43 = vadd.f32 %v798_v30, %v7147_v38  ;;  %v7360_v30 = vmul.f32 0.25, %v7156_v19  ;;  %v7377_v19 = vmul.f32 0.25, %v7250_v35  ;;  %v7399_v35 = vmul.f32 0.25, %v7253_v2 }
 0x251   : > { %9436 = vst [vmem:[#allocation7_spill] sm:$0xff] %v7293_v0  ;;  %5828 = vmatprep.subr.bf16.mxu0 %v5827_v32  ;;  %v7300_v10 = vadd.f32 %v800_v20, %v7151_v14 }
 0x252   : > { %5830 = vmatpush3.bf16.msra.mxu0 %v5827_v32  ;;  %v7370_v32 = vmul.f32 0.25, %v7181_v34  ;;  %v7387_v34 = vmul.f32 0.25, %v7274_v54 }
 0x253   : > { %v804_v1 = vpop.f32.mrb[26].mxu1 }
 0x254   : > { %v805_v24 = vadd.f32 %v804_v1, %v7147_v38  ;;  %v806_v48 = vpop.f32.mrb[27].mxu1 }
 0x255   : > { %v7303_v29 = vadd.f32 %v806_v48, %v7151_v14 }
 0x256   : > { %v7305_v52 = vpack.i.bf16 %v805_v24, %v799_v43  ;;  %v7414_v20 = vmul.f32 0.25, %v805_v24 }
 0x257   : > { %v810_v11 = vpop.f32.mrb[28].mxu1  ;;  %v5831_v56 = vpack.c.bf16 %v7303_v29, %v7300_v10  ;;  %v7311_v23 = vpack.i.bf16 %v7303_v29, %v7300_v10 }
 0x258   : > { %6191 = vrot.lane.b32.xlu0 %v7305_v52, %s6801_s14  ;;  %v812_v60 = vpop.f32.mrb[29].mxu1  ;;  %v811_v62 = vadd.f32 %v810_v11, %v7147_v38 }
 0x259   : > { %9437 = vst [vmem:[#allocation8_spill] sm:$0xff] %v7311_v23  ;;  %5832 = vmatprep.subr.bf16.mxu0 %v5831_v56  ;;  %v7320_v6 = vadd.f32 %v812_v60, %v7151_v14 }
 0x25a   : > { %5834 = vmatpush3.bf16.msra.mxu0 %v5831_v56  ;;  %v7408_v54 = vmul.f32 0.25, %v811_v62 }
 0x25b   : > { %v816_v17 = vpop.f32.mrb[30].mxu1 }
 0x25c   : > { %v817_v63 = vadd.f32 %v816_v17, %v7147_v38  ;;  %6201 = vrot.lane.b32.xlu0 %v7167_v26, %s6802_s15  ;;  %v818_v3 = vpop.f32.mrb[31].mxu1  ;;  %v7350_v38 = vmul.f32 0.25, %v7178_v33  ;;  %v7367_v33 = vmul.f32 0.25, %v7226_v57  ;;  %v7390_v57 = vmul.f32 0.25, %v7229_v58 }
 0x25d   : > { %v7323_v7 = vadd.f32 %v818_v3, %v7151_v14  ;;  %v7357_v14 = vmul.f32 0.25, %v7202_v49  ;;  %v7380_v49 = vmul.f32 0.25, %v7205_v50  ;;  %v7396_v50 = vmul.f32 0.25, %v799_v43 }
 0x25e   : > { %v7325_v12 = vpack.i.bf16 %v817_v63, %v811_v62  ;;  %v7406_v58 = vmul.f32 0.25, %v7277_v41  ;;  %v7420_v2 = vmul.f32 0.25, %v817_v63 }
 0x25f   : > { %v5835_v4 = vpack.c.bf16 %v7323_v7, %v7320_v6  ;;  %v7331_v13 = vpack.i.bf16 %v7323_v7, %v7320_v6 }
 0x260   : > { %6211 = vrot.lane.b32.xlu0 %v7215_v36, %s6802_s15  ;;  %6196 = vrot.lane.b32.xlu1 %v7325_v12, %s6801_s14 }
 0x261   : > { %9438 = vst [vmem:[#allocation9_spill] sm:$0xff] %v7331_v13  ;;  %5836 = vmatprep.subr.bf16.mxu0 %v5835_v4 }
 0x262   : > { %5838 = vmatpush3.bf16.msra.mxu0 %v5835_v4 }
 0x264   : > { %6221 = vrot.lane.b32.xlu0 %v7263_v5, %s6802_s15  ;;  %6206 = vrot.lane.b32.xlu1 %v7191_v42, %s6802_s15 }
 0x268   : > { %6231 = vrot.lane.b32.xlu0 %v7305_v52, %s6802_s15  ;;  %6216 = vrot.lane.b32.xlu1 %v7239_v37, %s6802_s15 }
 0x26c   : > { %1677 = vrot.lane.b32.xlu0 %v7153_v15, %s6803_s16  ;;  %6226 = vrot.lane.b32.xlu1 %v7287_v27, %s6802_s15 }
 0x270   : > { %1681 = vrot.lane.b32.xlu0 %v7350_v38, %s6803_s16  ;;  %6236 = vrot.lane.b32.xlu1 %v7325_v12, %s6802_s15 }
 0x274   : > { %1685 = vrot.lane.b32.xlu0 %v7357_v14, %s6803_s16  ;;  %1679 = vrot.lane.b32.xlu1 %v7360_v30, %s6803_s16 }
 0x278   : > { %1689 = vrot.lane.b32.xlu0 %v7367_v33, %s6803_s16  ;;  %1683 = vrot.lane.b32.xlu1 %v7370_v32, %s6803_s16 }
 0x27c   : > { %1693 = vrot.lane.b32.xlu0 %v7377_v19, %s6803_s16  ;;  %1687 = vrot.lane.b32.xlu1 %v7380_v49, %s6803_s16 }
 0x280   : > { %1697 = vrot.lane.b32.xlu0 %v7387_v34, %s6803_s16  ;;  %1691 = vrot.lane.b32.xlu1 %v7390_v57, %s6803_s16 }
 0x284   : > { %1701 = vrot.lane.b32.xlu0 %v7396_v50, %s6803_s16  ;;  %1695 = vrot.lane.b32.xlu1 %v7399_v35, %s6803_s16 }
 0x288   : > { %1699 = vrot.lane.b32.xlu1 %v7406_v58, %s6803_s16  ;;  %1705 = vrot.lane.b32.xlu0 %v7408_v54, %s6803_s16 }
 0x28c   : > { %1703 = vrot.lane.b32.xlu1 %v7414_v20, %s6803_s16  ;;  %6241 = vrot.lane.b32.xlu0 %v7167_v26, %s6804_s17 }
 0x290   : > { %1707 = vrot.lane.b32.xlu1 %v7420_v2, %s6803_s16  ;;  %6251 = vrot.lane.b32.xlu0 %v7215_v36, %s6804_s17 }
 0x294   : > { %6246 = vrot.lane.b32.xlu1 %v7191_v42, %s6804_s17  ;;  %6261 = vrot.lane.b32.xlu0 %v7263_v5, %s6804_s17 }
 0x298   : > { %6256 = vrot.lane.b32.xlu1 %v7239_v37, %s6804_s17  ;;  %6271 = vrot.lane.b32.xlu0 %v7305_v52, %s6804_s17 }
 0x29a   : > { %v6162_v41 = vpop.permute.xlu0 %6161 }
 0x29b   : > { %v6164_v1 = vunpack.i.h.bf16 %v6162_v41  ;;  %v6163_v43 = vunpack.i.l.bf16 %v6162_v41 }
 0x29c   : > { %6266 = vrot.lane.b32.xlu1 %v7287_v27, %s6804_s17  ;;  %6276 = vrot.lane.b32.xlu0 %v7325_v12, %s6804_s17 }
 0x29d   : > { %v5759_v48 = vpack.c.bf16 %v6164_v1, %v6163_v43 }
 0x29f   : > { %5761 = vmatprep.subr.msk.bf16.mxu1 %vm7440_vm2, %v5759_v48 }
 0x2a0   : > { %2753 = vrot.lane.b32.xlu1 %v7153_v15, %s6805_s18  ;;  %2757 = vrot.lane.b32.xlu0 %v7350_v38, %s6805_s18 }
 0x2a1   : > { %5764 = vmatpush3.bf16.xpose.msk.msra.mxu1 %vm7440_vm2, %v5759_v48 }
 0x2a2   : > { %v6167_v11 = vpop.permute.xlu1 %6166 }
 0x2a3   : > { %v6169_v56 = vunpack.i.h.bf16 %v6167_v11  ;;  %v6168_v60 = vunpack.i.l.bf16 %v6167_v11 }
 0x2a4   : > { %2755 = vrot.lane.b32.xlu1 %v7360_v30, %s6805_s18  ;;  %2759 = vrot.lane.b32.xlu0 %v7370_v32, %s6805_s18 }
 0x2a5   : > { %v5765_v17 = vpack.c.bf16 %v6169_v56, %v6168_v60 }
 0x2a7   : > { %5767 = vmatprep.subr.msk.bf16.mxu1 %vm7440_vm2, %v5765_v17 }
 0x2a8   : > { %2761 = vrot.lane.b32.xlu1 %v7357_v14, %s6805_s18  ;;  %2765 = vrot.lane.b32.xlu0 %v7367_v33, %s6805_s18 }
 0x2a9   : > { %5770 = vmatpush3.bf16.xpose.msk.msra.mxu1 %vm7440_vm2, %v5765_v17 }
 0x2aa   : > { %v6172_v62 = vpop.permute.xlu1 %6171 }
 0x2ab   : > { %v6174_v63 = vunpack.i.h.bf16 %v6172_v62  ;;  %v6173_v3 = vunpack.i.l.bf16 %v6172_v62 }
 0x2ac   : > { %2763 = vrot.lane.b32.xlu1 %v7380_v49, %s6805_s18  ;;  %2767 = vrot.lane.b32.xlu0 %v7390_v57, %s6805_s18 }
 0x2ad   : > { %v5771_v4 = vpack.c.bf16 %v6174_v63, %v6173_v3 }
 0x2af   : > { %5773 = vmatprep.subr.msk.bf16.mxu1 %vm7440_vm2, %v5771_v4 }
 0x2b0   : > { %2769 = vrot.lane.b32.xlu1 %v7377_v19, %s6805_s18  ;;  %2773 = vrot.lane.b32.xlu0 %v7387_v34, %s6805_s18 }
 0x2b1   : > { %5776 = vmatpush3.bf16.xpose.msk.msra.mxu1 %vm7440_vm2, %v5771_v4 }
 0x2b2   : > { %v6177_v41 = vpop.permute.xlu1 %6176 }
 0x2b3   : > { %v6179_v1 = vunpack.i.h.bf16 %v6177_v41  ;;  %v6178_v43 = vunpack.i.l.bf16 %v6177_v41 }
 0x2b4   : > { %2771 = vrot.lane.b32.xlu1 %v7399_v35, %s6805_s18  ;;  %2775 = vrot.lane.b32.xlu0 %v7406_v58, %s6805_s18 }
 0x2b5   : > { %v5777_v48 = vpack.c.bf16 %v6179_v1, %v6178_v43 }
 0x2b7   : > { %5779 = vmatprep.subr.msk.bf16.mxu1 %vm7440_vm2, %v5777_v48 }
 0x2b8   : > { %2777 = vrot.lane.b32.xlu1 %v7396_v50, %s6805_s18  ;;  %2781 = vrot.lane.b32.xlu0 %v7408_v54, %s6805_s18 }
 0x2b9   : > { %5782 = vmatpush3.bf16.xpose.msk.msra.mxu1 %vm7440_vm2, %v5777_v48 }
 0x2ba   : > { %v6182_v11 = vpop.permute.xlu0 %6181 }
 0x2bb   : > { %v6184_v56 = vunpack.i.h.bf16 %v6182_v11  ;;  %v6183_v60 = vunpack.i.l.bf16 %v6182_v11 }
 0x2bc   : > { %2779 = vrot.lane.b32.xlu1 %v7414_v20, %s6805_s18  ;;  %6281 = vrot.lane.b32.xlu0 %v7173_v31, %s6803_s16 }
 0x2bd   : > { %v5783_v17 = vpack.c.bf16 %v6184_v56, %v6183_v60 }
 0x2bf   : > { %5785 = vmatprep.subr.msk.bf16.mxu1 %vm7440_vm2, %v5783_v17 }
 0x2c0   : > { %6286 = vrot.lane.b32.xlu1 %v7197_v46, %s6803_s16  ;;  %6291 = vrot.lane.b32.xlu0 %v7221_v53, %s6803_s16 }
 0x2c1   : > { %5788 = vmatpush3.bf16.xpose.msk.msra.mxu1 %vm7440_vm2, %v5783_v17 }
 0x2c2   : > { %v6187_v62 = vpop.permute.xlu1 %6186 }
 0x2c3   : > { %v6189_v63 = vunpack.i.h.bf16 %v6187_v62  ;;  %v6188_v3 = vunpack.i.l.bf16 %v6187_v62 }
 0x2c4   : > { %6296 = vrot.lane.b32.xlu1 %v7245_v61, %s6803_s16  ;;  %6301 = vrot.lane.b32.xlu0 %v7269_v47, %s6803_s16 }
 0x2c5   : > { %v5789_v4 = vpack.c.bf16 %v6189_v63, %v6188_v3 }
 0x2c7   : > { %5791 = vmatprep.subr.msk.bf16.mxu1 %vm7440_vm2, %v5789_v4 }
 0x2c8   : > { %6306 = vrot.lane.b32.xlu1 %v7293_v0, %s6803_s16  ;;  %6311 = vrot.lane.b32.xlu0 %v7311_v23, %s6803_s16 }
 0x2c9   : > { %5794 = vmatpush3.bf16.xpose.msk.msra.mxu1 %vm7440_vm2, %v5789_v4 }
 0x2ca   : > { %v6192_v41 = vpop.permute.xlu0 %6191 }
 0x2cb   : > { %v6194_v1 = vunpack.i.h.bf16 %v6192_v41  ;;  %v6193_v43 = vunpack.i.l.bf16 %v6192_v41 }
 0x2cc   : > { %6316 = vrot.lane.b32.xlu1 %v7331_v13, %s6803_s16  ;;  %6321 = vrot.lane.b32.xlu0 %v7167_v26, %s6806_s19 }
 0x2cd   : > { %v5795_v48 = vpack.c.bf16 %v6194_v1, %v6193_v43 }
 0x2ce   : > { %v6202_v11 = vpop.permute.xlu0 %6201 }
 0x2cf   : > { %5797 = vmatprep.subr.msk.bf16.mxu1 %vm7440_vm2, %v5795_v48  ;;  %v6204_v63 = vunpack.i.h.bf16 %v6202_v11  ;;  %v6203_v26 = vunpack.i.l.bf16 %v6202_v11 }
 0x2d0   : > { %6326 = vrot.lane.b32.xlu1 %v7191_v42, %s6806_s19  ;;  %6331 = vrot.lane.b32.xlu0 %v7215_v36, %s6806_s19  ;;  %v4650_v42 = vmul.f32 -1.442695, %v7164_v16 }
 0x2d1   : > { %5800 = vmatpush3.bf16.xpose.msk.msra.mxu1 %vm7440_vm2, %v5795_v48  ;;  %v5839_v41 = vpack.c.bf16 %v6204_v63, %v6203_v26  ;;  %v4653_v48 = vmul.f32 -1.442695, %v7208_v51  ;;  %v4657_v63 = vmul.f32 -1.442695, %v7256_v45 }
 0x2d2   : > { %v6197_v56 = vpop.permute.xlu1 %6196  ;;  %v6212_v60 = vpop.permute.xlu0 %6211  ;;  %6472 = vpow2.f32 %v4650_v42 }
 0x2d3   : > { %v6199_v17 = vunpack.i.h.bf16 %v6197_v56  ;;  %v6198_v62 = vunpack.i.l.bf16 %v6197_v56  ;;  %v6213_v56 = vunpack.i.l.bf16 %v6212_v60 }
 0x2d4   : > { %6341 = vrot.lane.b32.xlu1 %v7263_v5, %s6806_s19  ;;  %6336 = vrot.lane.b32.xlu0 %v7239_v37, %s6806_s19  ;;  %v4651_v5 = vmul.f32 -1.442695, %v7184_v39 }
 0x2d5   : > { %v5801_v3 = vpack.c.bf16 %v6199_v17, %v6198_v62 }
 0x2d6   : > { %v6207_v4 = vpop.permute.xlu1 %6206  ;;  %v7529_v36 = vpop.permute.xlu0 %6221  ;;  %6474 = vpow2.f32 %v4651_v5 }
 0x2d7   : > { %5803 = vmatprep.subr.msk.bf16.mxu1 %vm7440_vm2, %v5801_v3  ;;  %6476 = vpow2.f32 %v4653_v48  ;;  %v4658_v48 = vmul.f32 -1.442695, %v7259_v21 }
 0x2d8   : > { %6351 = vrot.lane.b32.xlu1 %v7305_v52, %s6806_s19  ;;  %6346 = vrot.lane.b32.xlu0 %v7287_v27, %s6806_s19  ;;  %v6209_v27 = vunpack.i.h.bf16 %v6207_v4  ;;  %v6208_v52 = vunpack.i.l.bf16 %v6207_v4 }
 0x2d9   : > { %5806 = vmatpush3.bf16.xpose.msk.msra.mxu1 %vm7440_vm2, %v5801_v3 }
 0x2da   : > { %5841 = vmatprep.subr.msk.bf16.mxu1 %vm7440_vm2, %v5839_v41  ;;  %v7541_v16 = vpop.permute.xlu1 %6216  ;;  %v7543_v37 = vpop.permute.xlu0 %6231  ;;  %v5845_v39 = vpack.c.bf16 %v6209_v27, %v6208_v52 }
 0x2dc   : > { %3636 = vrot.lane.b32.xlu1 %v7153_v15, %s6807_s20  ;;  %6356 = vrot.lane.b32.xlu0 %v7325_v12, %s6806_s19  ;;  %v4649_v15 = vmul.f32 -1.442695, %v7161_v55  ;;  %v6473_v11 = vpop.eup %6472  ;;  %v4655_v55 = vmul.f32 -1.442695, %v7232_v59 }
 0x2dd   : > { %v886_v62 = vadd.f32 1.0, %v6473_v11 }
 0x2de   : > { %v7550_v1 = vpop.permute.xlu1 %6226  ;;  %v7552_v43 = vpop.permute.xlu0 %1677  ;;  %6478 = vpow2.f32 %v4649_v15  ;;  %v6224_v15 = vunpack.i.h.bf16 %v7529_v36 }
 0x2df   : > { %6480 = vpow2.f32 %v4655_v55 }
 0x2e0   : > { %5224 = vmatmul.mubr.msk.f32.vlgmr.msra.gmra.mrb[32].mxu1 %vm1082_vm1, %v7360_v30  ;;  %3640 = vrot.lane.b32.xlu1 %v7350_v38, %s6807_s20 }
 0x2e1   : > { %3638 = vrot.lane.b32.xlu0 %v7360_v30, %s6807_s20  ;;  %5226 = vmatprep.mubr.msk.f32.mxu1 %vm1082_vm1, %v7350_v38  ;;  %v4652_v38 = vmul.f32 -1.442695, %v7187_v40  ;;  %v6214_v30 = vunpack.i.h.bf16 %v6212_v60  ;;  %v6475_v40 = vpop.eup %6474 }
 0x2e2   : > { %5844 = vmatpush3.bf16.xpose.msk.msra.mxu1 %vm7440_vm2, %v5839_v41  ;;  %v7566_v12 = vpop.permute.xlu1 %6236  ;;  %v7568_v51 = vpop.permute.xlu0 %1681  ;;  %v887_v26 = vadd.f32 1.0, %v6475_v40 }
 0x2e3   : > { %5847 = vmatprep.subr.msk.bf16.mxu1 %vm7440_vm2, %v5845_v39  ;;  %6482 = vpow2.f32 %v4652_v38  ;;  %v5851_v60 = vpack.c.bf16 %v6214_v30, %v6213_v56  ;;  %v6477_v3 = vpop.eup %6476  ;;  %v4659_v56 = vmul.f32 -1.442695, %v7280_v18 }
 0x2e4   : > { %5227 = vmatmul.mubr.msk.f32.gmra.mrb[34].mxu1 %vm1082_vm1, %v7370_v32  ;;  %3644 = vrot.lane.b32.xlu1 %v7357_v14, %s6807_s20  ;;  %6484 = vrcp.f32 %v886_v62  ;;  %v4660_v62 = vmul.f32 -1.442695, %v7283_v22 }
 0x2e5   : > { %3642 = vrot.lane.b32.xlu0 %v7370_v32, %s6807_s20  ;;  %5229 = vmatprep.mubr.msk.f32.mxu1 %vm1082_vm1, %v7357_v14  ;;  %v4654_v32 = vmul.f32 -1.442695, %v7211_v28  ;;  %6486 = vpow2.f32 %v4657_v63  ;;  %v4656_v28 = vmul.f32 -1.442695, %v7235_v44  ;;  %v889_v44 = vadd.f32 1.0, %v6477_v3 }
 0x2e6   : > { %v7582_v17 = vpop.permute.xlu1 %1679  ;;  %v7584_v59 = vpop.permute.xlu0 %1685 }
 0x2e7   : > { %6488 = vpow2.f32 %v4654_v32  ;;  %v4662_v32 = vmul.f32 -1.442695, %v7303_v29  ;;  %v4663_v29 = vmul.f32 -1.442695, %v7320_v6 }
 0x2e8   : > { %5230 = vmatmul.mubr.msk.f32.gmra.mrb[36].mxu1 %vm1082_vm1, %v7380_v49  ;;  %3648 = vrot.lane.b32.xlu1 %v7367_v33, %s6807_s20  ;;  %v6479_v41 = vpop.eup %6478  ;;  %6490 = vrcp.f32 %v887_v26  ;;  %v6228_v26 = vunpack.i.l.bf16 %v7550_v1 }
 0x2e9   : > { %3646 = vrot.lane.b32.xlu0 %v7380_v49, %s6807_s20  ;;  %5232 = vmatprep.mubr.msk.f32.mxu1 %vm1082_vm1, %v7367_v33  ;;  %v6219_v33 = vunpack.i.h.bf16 %v7541_v16  ;;  %v6218_v49 = vunpack.i.l.bf16 %v7541_v16  ;;  %6492 = vpow2.f32 %v4656_v28 }
 0x2ea   : > { %5850 = vmatpush3.bf16.xpose.msk.msra.mxu1 %vm7440_vm2, %v5845_v39  ;;  %v7598_v45 = vpop.permute.xlu1 %1683  ;;  %v7600_v14 = vpop.permute.xlu0 %1689  ;;  %6494 = vrcp.f32 %v889_v44  ;;  %v6223_v39 = vunpack.i.l.bf16 %v7529_v36 }
 0x2eb   : > { %5853 = vmatprep.subr.msk.bf16.mxu1 %vm7440_vm2, %v5851_v60  ;;  %v5857_v16 = vpack.c.bf16 %v6219_v33, %v6218_v49 }
 0x2ec   : > { %5233 = vmatmul.mubr.msk.f32.gmra.mrb[38].mxu1 %vm1082_vm1, %v7390_v57  ;;  %3652 = vrot.lane.b32.xlu1 %v7377_v19, %s6807_s20 }
 0x2ed   : > { %3650 = vrot.lane.b32.xlu0 %v7390_v57, %s6807_s20  ;;  %5235 = vmatprep.mubr.msk.f32.mxu1 %vm1082_vm1, %v7377_v19  ;;  %v6481_v19 = vpop.eup %6480  ;;  %v885_v57 = vadd.f32 1.0, %v6479_v41 }
 0x2ee   : > { %v7615_v42 = vpop.permute.xlu1 %1687  ;;  %v7617_v4 = vpop.permute.xlu0 %1693 }
 0x2ef   : > { %v6483_v52 = vpop.eup %6482  ;;  %6496 = vrcp.f32 %v885_v57  ;;  %v6233_v57 = vunpack.i.l.bf16 %v7543_v37 }
 0x2f0   : > { %5236 = vmatmul.mubr.msk.f32.gmra.mrb[40].mxu1 %vm1082_vm1, %v7399_v35  ;;  %3656 = vrot.lane.b32.xlu1 %v7387_v34, %s6807_s20  ;;  %v888_v11 = vadd.f32 1.0, %v6483_v52  ;;  %6498 = vpow2.f32 %v4658_v48 }
 0x2f1   : > { %3654 = vrot.lane.b32.xlu0 %v7399_v35, %s6807_s20  ;;  %5238 = vmatprep.mubr.msk.f32.mxu1 %vm1082_vm1, %v7387_v34  ;;  %v7640_v34 = vpop.eup %6484  ;;  %v891_v35 = vadd.f32 1.0, %v6481_v19  ;;  %v6234_v19 = vunpack.i.h.bf16 %v7543_v37 }
 0x2f2   : > { %5856 = vmatpush3.bf16.xpose.msk.msra.mxu1 %vm7440_vm2, %v5851_v60  ;;  %v7629_v5 = vpop.permute.xlu1 %1691  ;;  %v7631_v27 = vpop.permute.xlu0 %1697  ;;  %9441 = vst [vmem:[#allocation10_spill] sm:$0xff] %v7640_v34  ;;  %v6229_v60 = vunpack.i.h.bf16 %v7550_v1 }
 0x2f3   : > { %5859 = vmatprep.subr.msk.bf16.mxu1 %vm7440_vm2, %v5857_v16  ;;  %v6487_v21 = vpop.eup %6486  ;;  %6500 = vrcp.f32 %v891_v35 }
 0x2f4   : > { %5239 = vmatmul.mubr.msk.f32.gmra.mrb[42].mxu1 %vm1082_vm1, %v7406_v58  ;;  %3660 = vrot.lane.b32.xlu1 %v7396_v50, %s6807_s20  ;;  %v6489_v30 = vpop.eup %6488  ;;  %6502 = vrcp.f32 %v888_v11  ;;  %v5869_v1 = vpack.c.bf16 %v6229_v60, %v6228_v26 }
 0x2f5   : > { %3658 = vrot.lane.b32.xlu0 %v7406_v58, %s6807_s20  ;;  %5241 = vmatprep.mubr.msk.f32.mxu1 %vm1082_vm1, %v7396_v50  ;;  %v893_v50 = vadd.f32 1.0, %v6487_v21  ;;  %v5863_v58 = vpack.c.bf16 %v6224_v15, %v6223_v39  ;;  %v7662_v36 = vpop.eup %6490  ;;  %v890_v18 = vadd.f32 1.0, %v6489_v30  ;;  %6504 = vpow2.f32 %v4659_v56 }
 0x2f6   : > { %v7648_v55 = vpop.permute.xlu1 %1695  ;;  %v7650_v38 = vpop.permute.xlu0 %1701  ;;  %9442 = vst [vmem:[#allocation11_spill] sm:$0xff] %v7662_v36  ;;  %6506 = vpow2.f32 %v4660_v62  ;;  %v5875_v30 = vpack.c.bf16 %v6234_v19, %v6233_v57 }
 0x2f7   : > { %v6493_v40 = vpop.eup %6492  ;;  %6508 = vrcp.f32 %v893_v50 }
 0x2f8   : > { %5242 = vmatmul.mubr.msk.f32.gmra.mrb[44].mxu1 %vm1082_vm1, %v7414_v20  ;;  %2305 = vrot.lane.b32.xlu1 %v7640_v34, %s6802_s15  ;;  %6510 = vrcp.f32 %v890_v18  ;;  %v7688_v49 = vpop.eup %6494 }
 0x2f9   : > { %3662 = vrot.lane.b32.xlu0 %v7414_v20, %s6807_s20  ;;  %5244 = vmatprep.mubr.msk.f32.mxu1 %vm1082_vm1, %v7408_v54  ;;  %v4661_v20 = vmul.f32 -1.442695, %v7300_v10  ;;  %v892_v10 = vadd.f32 1.0, %v6493_v40  ;;  %9443 = vst [vmem:[#allocation12_spill] sm:$0xff] %v7688_v49  ;;  %v7690_v3 = vpop.eup %6496 }
 0x2fa   : > { %5862 = vmatpush3.bf16.xpose.msk.msra.mxu1 %vm7440_vm2, %v5857_v16  ;;  %v7666_v22 = vpop.permute.xlu1 %1699  ;;  %v7668_v63 = vpop.permute.xlu0 %1705  ;;  %9444 = vst [vmem:[#allocation13_spill] sm:$0xff] %v7690_v3 }
 0x2fb   : > { %5865 = vmatprep.subr.msk.bf16.mxu1 %vm7440_vm2, %v5863_v58  ;;  %6512 = vpow2.f32 %v4661_v20  ;;  %v6239_v20 = vunpack.i.h.bf16 %v7566_v12 }
 0x2fc   : > { %5245 = vmatmul.mubr.msk.f32.gmra.mrb[46].mxu1 %vm1082_vm1, %v7420_v2  ;;  %2307 = vrot.lane.b32.xlu1 %v7662_v36, %s6802_s15  ;;  %6514 = vpow2.f32 %v4662_v32  ;;  %v6238_v32 = vunpack.i.l.bf16 %v7566_v12 }
 0x2fd   : > { %3664 = vrot.lane.b32.xlu0 %v7408_v54, %s6807_s20  ;;  %5335 = vmatprep.mubr.msk.f32.mxu1 %vm1082_vm1, %v7552_v43  ;;  %v4664_v54 = vmul.f32 -1.442695, %v7323_v7  ;;  %v6499_v43 = vpop.eup %6498  ;;  %6516 = vrcp.f32 %v892_v10 }
 0x2fe   : > { %v7684_v28 = vpop.permute.xlu1 %1703  ;;  %v7686_v33 = vpop.permute.xlu0 %6241  ;;  %6518 = vpow2.f32 %v4663_v29  ;;  %v894_v48 = vadd.f32 1.0, %v6499_v43  ;;  %v5881_v43 = vpack.c.bf16 %v6239_v20, %v6238_v32 }
 0x2ff   : > { %v7704_v6 = vpop.eup %6500  ;;  %6520 = vpow2.f32 %v4664_v54 }
 0x300   : > { %2311 = vrot.lane.b32.xlu1 %v7688_v49, %s6802_s15  ;;  %9445 = vst [vmem:[#allocation14_spill] sm:$0xff] %v7704_v6  ;;  %v7708_v16 = vpop.eup %6502  ;;  %6522 = vrcp.f32 %v894_v48  ;;  %v6243_v48 = vunpack.i.l.bf16 %v7686_v33 }
 0x301   : > { %2303 = vrot.lane.b32.xlu0 %v7690_v3, %s6802_s15  ;;  %9446 = vst [vmem:[#allocation15_spill] sm:$0xff] %v7708_v16  ;;  %v6505_v7 = vpop.eup %6504 }
 0x302   : > { %5868 = vmatpush3.bf16.xpose.msk.msra.mxu1 %vm7440_vm2, %v5863_v58  ;;  %v7700_v41 = vpop.permute.xlu1 %1707  ;;  %v7702_v44 = vpop.permute.xlu0 %6251  ;;  %v895_v11 = vadd.f32 1.0, %v6505_v7 }
 0x303   : > { %5871 = vmatprep.subr.msk.bf16.mxu1 %vm7440_vm2, %v5869_v1  ;;  %v6507_v52 = vpop.eup %6506 }
 0x304   : > { %2315 = vrot.lane.b32.xlu1 %v7704_v6, %s6802_s15  ;;  %v7720_v39 = vpop.eup %6508  ;;  %v896_v56 = vadd.f32 1.0, %v6507_v52  ;;  %6524 = vrcp.f32 %v895_v11  ;;  %v6244_v52 = vunpack.i.h.bf16 %v7686_v33 }
 0x305   : > { %2309 = vrot.lane.b32.xlu0 %v7708_v16, %s6802_s15  ;;  %9447 = vst [vmem:[#allocation16_spill] sm:$0xff] %v7720_v39  ;;  %v7722_v21 = vpop.eup %6510 }
 0x306   : > { %v7716_v35 = vpop.permute.xlu1 %6246  ;;  %v7718_v15 = vpop.permute.xlu0 %6261  ;;  %9448 = vst [vmem:[#allocation17_spill] sm:$0xff] %v7722_v21  ;;  %6526 = vrcp.f32 %v896_v56 }
 0x307   : > { %v6513_v37 = vpop.eup %6512  ;;  %v6249_v32 = vunpack.i.h.bf16 %v7716_v35 }
 0x308   : > { %2319 = vrot.lane.b32.xlu1 %v7720_v39, %s6802_s15  ;;  %v6515_v58 = vpop.eup %6514  ;;  %v897_v40 = vadd.f32 1.0, %v6513_v37 }
 0x309   : > { %2313 = vrot.lane.b32.xlu0 %v7722_v21, %s6802_s15  ;;  %v7736_v18 = vpop.eup %6516  ;;  %v898_v26 = vadd.f32 1.0, %v6515_v58 }
 0x30a   : > { %5874 = vmatpush3.bf16.xpose.msk.msra.mxu1 %vm7440_vm2, %v5869_v1  ;;  %v7730_v62 = vpop.permute.xlu1 %6256  ;;  %v7732_v50 = vpop.permute.xlu0 %6271  ;;  %9449 = vst [vmem:[#allocation18_spill] sm:$0xff] %v7736_v18  ;;  %6528 = vrcp.f32 %v897_v40 }
 0x30b   : > { %5877 = vmatprep.subr.msk.bf16.mxu1 %vm7440_vm2, %v5875_v30  ;;  %v6519_v60 = vpop.eup %6518  ;;  %6530 = vrcp.f32 %v898_v26 }
 0x30c   : > { %1613 = vrot.lane.b32.xlu1 %v7690_v3, %s6801_s14  ;;  %v6521_v54 = vpop.eup %6520  ;;  %v899_v1 = vadd.f32 1.0, %v6519_v60  ;;  %v6248_v60 = vunpack.i.l.bf16 %v7716_v35 }
 0x30d   : > { %2317 = vrot.lane.b32.xlu0 %v7736_v18, %s6802_s15  ;;  %v900_v12 = vadd.f32 1.0, %v6521_v54  ;;  %v7760_v57 = vpop.eup %6522 }
 0x30e   : > { %v7744_v10 = vpop.permute.xlu1 %6266  ;;  %v7746_v29 = vpop.permute.xlu0 %6276  ;;  %9450 = vst [vmem:[#allocation19_spill] sm:$0xff] %v7760_v57  ;;  %6532 = vrcp.f32 %v899_v1 }
 0x30f   : > { %6534 = vrcp.f32 %v900_v12  ;;  %v7772_v37 = vpop.eup %6524  ;;  %v5933_v12 = vpack.c.bf16 %v6249_v32, %v6248_v60  ;;  %v6258_v60 = vunpack.i.l.bf16 %v7730_v62 }
 0x310   : > { %2783 = vrot.lane.b32.xlu1 %v7420_v2, %s6805_s18  ;;  %9451 = vst [vmem:[#allocation20_spill] sm:$0xff] %v7772_v37  ;;  %v7774_v56 = vpop.eup %6526 }
 0x311   : > { %1615 = vrot.lane.b32.xlu0 %v7640_v34, %s6801_s14  ;;  %9452 = vst [vmem:[#allocation21_spill] sm:$0xff] %v7774_v56 }
 0x312   : > { %5880 = vmatpush3.bf16.xpose.msk.msra.mxu1 %vm7440_vm2, %v5875_v30  ;;  %v7754_v7 = vpop.permute.xlu1 %2753  ;;  %v7756_v19 = vpop.permute.xlu0 %2757 }
 0x313   : > { %5883 = vmatprep.subr.msk.bf16.mxu1 %vm7440_vm2, %v5881_v43 }
 0x314   : > { %3666 = vrot.lane.b32.xlu1 %v7420_v2, %s6807_s20  ;;  %v5927_v2 = vpack.c.bf16 %v6244_v52, %v6243_v48  ;;  %v7786_v40 = vpop.eup %6528  ;;  %v6254_v48 = vunpack.i.h.bf16 %v7702_v44 }
 0x315   : > { %2321 = vrot.lane.b32.xlu0 %v7760_v57, %s6802_s15  ;;  %9453 = vst [vmem:[#allocation22_spill] sm:$0xff] %v7786_v40  ;;  %v7790_v20 = vpop.eup %6530 }
 0x316   : > { %v7768_v11 = vpop.permute.xlu1 %2755  ;;  %v7770_v30 = vpop.permute.xlu0 %2759  ;;  %9454 = vst [vmem:[#allocation23_spill] sm:$0xff] %v7790_v20 }
 0x318   : > { %2323 = vrot.lane.b32.xlu1 %v7772_v37, %s6802_s15  ;;  %v7802_v1 = vpop.eup %6532 }
 0x319   : > { %2325 = vrot.lane.b32.xlu0 %v7774_v56, %s6802_s15  ;;  %9455 = vst [vmem:[#allocation24_spill] sm:$0xff] %v7802_v1 }
 0x31a   : > { %5886 = vmatpush3.bf16.xpose.msk.msra.mxu1 %vm7440_vm2, %v5881_v43  ;;  %v7782_v33 = vpop.permute.xlu1 %2761  ;;  %v7784_v58 = vpop.permute.xlu0 %2765 }
 0x31b   : > { %5929 = vmatprep.subr.msk.bf16.mxu1 %vm7440_vm2, %v5927_v2  ;;  %v7804_v43 = vpop.eup %6534 }
 0x31c   : > { %2327 = vrot.lane.b32.xlu1 %v7786_v40, %s6802_s15  ;;  %9456 = vst [vmem:[#allocation25_spill] sm:$0xff] %v7804_v43 }
 0x31d   : > { %2329 = vrot.lane.b32.xlu0 %v7790_v20, %s6802_s15 }
 0x31e   : > { %v7798_v26 = vpop.permute.xlu1 %2763  ;;  %v7800_v54 = vpop.permute.xlu0 %2767 }
 0x320   : > { %2331 = vrot.lane.b32.xlu1 %v7802_v1, %s6802_s15 }
 0x321   : > { %5336 = vmatmul.mubr.msk.f32.vlgmr.msra.gmra.mrb[48].mxu1 %vm1082_vm1, %v7582_v17  ;;  %2333 = vrot.lane.b32.xlu0 %v7804_v43, %s6802_s15  ;;  %v6253_v17 = vunpack.i.l.bf16 %v7702_v44 }
 0x322   : > { %5338 = vmatprep.mubr.msk.f32.mxu1 %vm1082_vm1, %v7568_v51  ;;  %5932 = vmatpush3.bf16.xpose.msk.msra.mxu1 %vm7440_vm2, %v5927_v2  ;;  %v7816_v35 = vpop.permute.xlu1 %2769  ;;  %v7818_v52 = vpop.permute.xlu0 %2773 }
 0x323   : > { %5935 = vmatprep.subr.msk.bf16.mxu1 %vm7440_vm2, %v5933_v12  ;;  %v5939_v32 = vpack.c.bf16 %v6254_v48, %v6253_v17 }
 0x325   : > { %5339 = vmatmul.mubr.msk.f32.gmra.mrb[50].mxu1 %vm1082_vm1, %v7598_v45 }
 0x326   : > { %5341 = vmatprep.mubr.msk.f32.mxu1 %vm1082_vm1, %v7584_v59  ;;  %v7828_v51 = vpop.permute.xlu1 %2771  ;;  %v7830_v2 = vpop.permute.xlu0 %2775  ;;  %v6259_v59 = vunpack.i.h.bf16 %v7730_v62  ;;  %v6263_v62 = vunpack.i.l.bf16 %v7718_v15 }
 0x328   : > { %v5945_v17 = vpack.c.bf16 %v6259_v59, %v6258_v60  ;;  %v6273_v60 = vunpack.i.l.bf16 %v7732_v50 }
 0x329   : > { %5342 = vmatmul.mubr.msk.f32.gmra.mrb[52].mxu1 %vm1082_vm1, %v7615_v42 }
 0x32a   : > { %5344 = vmatprep.mubr.msk.f32.mxu1 %vm1082_vm1, %v7600_v14  ;;  %5938 = vmatpush3.bf16.xpose.msk.msra.mxu1 %vm7440_vm2, %v5933_v12  ;;  %v7838_v44 = vpop.permute.xlu1 %2777  ;;  %v7840_v45 = vpop.permute.xlu0 %2781 }
 0x32b   : > { %5941 = vmatprep.subr.msk.bf16.mxu1 %vm7440_vm2, %v5939_v32 }
 0x32d   : > { %5345 = vmatmul.mubr.msk.f32.gmra.mrb[54].mxu1 %vm1082_vm1, %v7629_v5 }
 0x32e   : > { %5347 = vmatprep.mubr.msk.f32.mxu1 %vm1082_vm1, %v7617_v4  ;;  %v7850_v14 = vpop.permute.xlu1 %2779  ;;  %v6282_v42 = vpop.permute.xlu0 %6281  ;;  %v6264_v4 = vunpack.i.h.bf16 %v7718_v15 }
 0x32f   : > { %v6284_v12 = vunpack.i.h.bf16 %v6282_v42  ;;  %v6283_v48 = vunpack.i.l.bf16 %v6282_v42 }
 0x331   : > { %5348 = vmatmul.mubr.msk.f32.gmra.mrb[56].mxu1 %vm1082_vm1, %v7648_v55  ;;  %v7854_v25 = vpack.c.bf16 %v6284_v12, %v6283_v48  ;;  %v5951_v55 = vpack.c.bf16 %v6264_v4, %v6263_v62  ;;  %v6278_v4 = vunpack.i.l.bf16 %v7746_v29 }
 0x332   : > { %5350 = vmatprep.mubr.msk.f32.mxu1 %vm1082_vm1, %v7631_v27  ;;  %5944 = vmatpush3.bf16.xpose.msk.msra.mxu1 %vm7440_vm2, %v5939_v32  ;;  %v7860_v5 = vpop.permute.xlu1 %6286 }
 0x333   : > { %9457 = vst [vmem:[#allocation26_spill] sm:$0xff] %v7854_v25  ;;  %9458 = vst [vmem:[#allocation27_spill] sm:$0xff] %v7860_v5  ;;  %5947 = vmatprep.subr.msk.bf16.mxu1 %vm7440_vm2, %v5945_v17  ;;  %5888 = vmatprep.subr.bf16.mxu0 %v7854_v25 }
 0x335   : > { %5351 = vmatmul.mubr.msk.f32.gmra.mrb[58].mxu1 %vm1082_vm1, %v7666_v22  ;;  %v6269_v22 = vunpack.i.h.bf16 %v7744_v10 }
 0x336   : > { %5353 = vmatprep.mubr.msk.f32.mxu1 %vm1082_vm1, %v7650_v38  ;;  %v7871_v27 = vpop.permute.xlu1 %6296  ;;  %v6268_v38 = vunpack.i.l.bf16 %v7744_v10  ;;  %v6274_v10 = vunpack.i.h.bf16 %v7732_v50 }
 0x337   : > { %9459 = vst [vmem:[#allocation28_spill] sm:$0xff] %v7871_v27 }
 0x338   : > { %v5957_v15 = vpack.c.bf16 %v6269_v22, %v6268_v38 }
 0x339   : > { %5354 = vmatmul.mubr.msk.f32.gmra.mrb[60].mxu1 %vm1082_vm1, %v7684_v28 }
 0x33a   : > { %5356 = vmatprep.mubr.msk.f32.mxu1 %vm1082_vm1, %v7668_v63  ;;  %5950 = vmatpush3.bf16.xpose.msk.msra.mxu1 %vm7440_vm2, %v5945_v17  ;;  %v7879_v32 = vpop.permute.xlu1 %6306  ;;  %v7891_v63 = vpop.permute.xlu0 %6291  ;;  %v6279_v17 = vunpack.i.h.bf16 %v7746_v29 }
 0x33b   : > { %9460 = vst [vmem:[#allocation29_spill] sm:$0xff] %v7879_v32  ;;  %5953 = vmatprep.subr.msk.bf16.mxu1 %vm7440_vm2, %v5951_v55  ;;  %9462 = vst [vmem:[#allocation31_spill] sm:$0xff] %v7891_v63 }
 0x33c   : > { %v5969_v50 = vpack.c.bf16 %v6279_v17, %v6278_v4 }
 0x33d   : > { %5357 = vmatmul.mubr.msk.f32.gmra.mrb[62].mxu1 %vm1082_vm1, %v7700_v41 }
 0x33e   : > { %5503 = vmatprep.mubr.msk.f32.mxu1 %vm1082_vm1, %v7754_v7  ;;  %v7889_v28 = vpop.permute.xlu1 %6316  ;;  %v7899_v41 = vpop.permute.xlu0 %6301  ;;  %v5963_v7 = vpack.c.bf16 %v6274_v10, %v6273_v60 }
 0x33f   : > { %9461 = vst [vmem:[#allocation30_spill] sm:$0xff] %v7889_v28  ;;  %9463 = vst [vmem:[#allocation32_spill] sm:$0xff] %v7899_v41 }
 0x342   : > { %5956 = vmatpush3.bf16.xpose.msk.msra.mxu1 %vm7440_vm2, %v5951_v55  ;;  %v6327_v59 = vpop.permute.xlu1 %6326  ;;  %v7907_v48 = vpop.permute.xlu0 %6311 }
 0x343   : > { %5959 = vmatprep.subr.msk.bf16.mxu1 %vm7440_vm2, %v5957_v15  ;;  %9464 = vst [vmem:[#allocation33_spill] sm:$0xff] %v7907_v48  ;;  %v6329_v17 = vunpack.i.h.bf16 %v6327_v59 }
 0x346   : > { %v6342_v42 = vpop.permute.xlu1 %6341  ;;  %v6322_v55 = vpop.permute.xlu0 %6321 }
 0x347   : > { %v6324_v38 = vunpack.i.h.bf16 %v6322_v55 }
 0x34a   : > { %5962 = vmatpush3.bf16.xpose.msk.msra.mxu1 %vm7440_vm2, %v5957_v15  ;;  %v7903_v12 = vpop.permute.xlu1 %6351  ;;  %v6323_v15 = vunpack.i.l.bf16 %v6322_v55  ;;  %v6332_v55 = vpop.permute.xlu0 %6331 }
 0x34b   : > { %5965 = vmatprep.subr.msk.bf16.mxu1 %vm7440_vm2, %v5963_v7 }
 0x34c   : > { %v6011_v60 = vpack.c.bf16 %v6324_v38, %v6323_v15  ;;  %v6334_v38 = vunpack.i.h.bf16 %v6332_v55 }
 0x34e   : > { %v7911_v62 = vpop.permute.xlu1 %3636 }
 0x352   : > { %5968 = vmatpush3.bf16.xpose.msk.msra.mxu1 %vm7440_vm2, %v5963_v7  ;;  %v7915_v22 = vpop.permute.xlu1 %3640  ;;  %v6328_v7 = vunpack.i.l.bf16 %v6327_v59  ;;  %v6333_v59 = vunpack.i.l.bf16 %v6332_v55 }
 0x353   : > { %5971 = vmatprep.subr.msk.bf16.mxu1 %vm7440_vm2, %v5969_v50 }
 0x354   : > { %v6017_v8 = vpack.c.bf16 %v6329_v17, %v6328_v7  ;;  %v6023_v15 = vpack.c.bf16 %v6334_v38, %v6333_v59  ;;  %v6353_v38 = vunpack.i.l.bf16 %v7903_v12 }
 0x356   : > { %v7919_v10 = vpop.permute.xlu1 %3644 }
 0x35a   : > { %5974 = vmatpush3.bf16.xpose.msk.msra.mxu1 %vm7440_vm2, %v5969_v50  ;;  %v7923_v29 = vpop.permute.xlu1 %3648 }
 0x35b   : > { %6013 = vmatprep.subr.msk.bf16.mxu1 %vm7440_vm2, %v6011_v60 }
 0x35e   : > { %v7927_v4 = vpop.permute.xlu1 %3652 }
 0x361   : > { %5504 = vmatmul.mubr.msk.f32.vlgmr.msra.gmra.mrb[64].mxu1 %vm1082_vm1, %v7768_v11 }
 0x362   : > { %5506 = vmatprep.mubr.msk.f32.mxu1 %vm1082_vm1, %v7756_v19  ;;  %6016 = vmatpush3.bf16.xpose.msk.msra.mxu1 %vm7440_vm2, %v6011_v60  ;;  %v7935_v50 = vpop.permute.xlu1 %3656  ;;  %v6337_v19 = vpop.permute.xlu0 %6336 }
 0x363   : > { %6019 = vmatprep.subr.msk.bf16.mxu1 %vm7440_vm2, %v6017_v8 }
 0x365   : > { %5507 = vmatmul.mubr.msk.f32.gmra.mrb[66].mxu1 %vm1082_vm1, %v7770_v30  ;;  %v6339_v30 = vunpack.i.h.bf16 %v6337_v19 }
 0x366   : > { %5509 = vmatprep.mubr.msk.f32.mxu1 %vm1082_vm1, %v7782_v33  ;;  %v7943_v11 = vpop.permute.xlu1 %3660  ;;  %v6338_v33 = vunpack.i.l.bf16 %v6337_v19 }
 0x368   : > { %v6029_v17 = vpack.c.bf16 %v6339_v30, %v6338_v33 }
 0x369   : > { %5510 = vmatmul.mubr.msk.f32.gmra.mrb[68].mxu1 %vm1082_vm1, %v7798_v26 }
 0x36a   : > { %5512 = vmatprep.mubr.msk.f32.mxu1 %vm1082_vm1, %v7784_v58  ;;  %6022 = vmatpush3.bf16.xpose.msk.msra.mxu1 %vm7440_vm2, %v6017_v8  ;;  %v7951_v60 = vpop.permute.xlu1 %2305  ;;  %v6344_v58 = vunpack.i.h.bf16 %v6342_v42 }
 0x36b   : > { %9465 = vst [vmem:[#allocation34_spill] sm:$0xff] %v7951_v60  ;;  %6025 = vmatprep.subr.msk.bf16.mxu1 %vm7440_vm2, %v6023_v15 }
 0x36d   : > { %5513 = vmatmul.mubr.msk.f32.gmra.mrb[70].mxu1 %vm1082_vm1, %v7800_v54  ;;  %v6343_v54 = vunpack.i.l.bf16 %v6342_v42 }
 0x36e   : > { %5515 = vmatprep.mubr.msk.f32.mxu1 %vm1082_vm1, %v7816_v35  ;;  %v7959_v26 = vpop.permute.xlu1 %2307 }
 0x36f   : > { %9466 = vst [vmem:[#allocation35_spill] sm:$0xff] %v7959_v26 }
 0x371   : > { %5516 = vmatmul.mubr.msk.f32.gmra.mrb[72].mxu1 %vm1082_vm1, %v7828_v51  ;;  %v6035_v51 = vpack.c.bf16 %v6344_v58, %v6343_v54  ;;  %v985_v58 = vld [vmem:[%s314_s23] sm:$0x1] }
 0x372   : > { %5518 = vmatprep.mubr.msk.f32.mxu1 %vm1082_vm1, %v7818_v52  ;;  %6028 = vmatpush3.bf16.xpose.msk.msra.mxu1 %vm7440_vm2, %v6023_v15  ;;  %v7967_v8 = vpop.permute.xlu1 %2311  ;;  %v6347_v52 = vpop.permute.xlu0 %6346 }
 0x373   : > { %9467 = vst [vmem:[#allocation36_spill] sm:$0xff] %v7967_v8  ;;  %6031 = vmatprep.subr.msk.bf16.mxu1 %vm7440_vm2, %v6029_v17 }
 0x375   : > { %5519 = vmatmul.mubr.msk.f32.gmra.mrb[74].mxu1 %vm1082_vm1, %v7830_v2  ;;  %v6349_v2 = vunpack.i.h.bf16 %v6347_v52 }
 0x376   : > { %5521 = vmatprep.mubr.msk.f32.mxu1 %vm1082_vm1, %v7838_v44  ;;  %v7975_v35 = vpop.permute.xlu1 %2315  ;;  %v6348_v44 = vunpack.i.l.bf16 %v6347_v52  ;;  %v6357_v15 = vpop.permute.xlu0 %6356  ;;  %v9471_v52 = vlaneseq }
 0x377   : > { %9468 = vst [vmem:[#allocation37_spill] sm:$0xff] %v7975_v35  ;;  %v6359_v19 = vunpack.i.h.bf16 %v6357_v15  ;;  %v6358_v30 = vunpack.i.l.bf16 %v6357_v15  ;;  %v939_v15 = vadd.s32 40, %v7139_v9 }
 0x378   : > { %v6041_v55 = vpack.c.bf16 %v6349_v2, %v6348_v44  ;;  %v951_v2 = vand.u32 127, %v9471_v52  ;;  %v4665_v44 = vadd.f32 -1.0, %v985_v58  ;;  %v938_v58 = vadd.s32 32, %v7139_v9 }
 0x379   : > { %5522 = vmatmul.mubr.msk.f32.gmra.mrb[76].mxu1 %vm1082_vm1, %v7850_v14 }
 0x37a   : > { %5524 = vmatprep.mubr.msk.f32.mxu1 %vm1082_vm1, %v7840_v45  ;;  %6034 = vmatpush3.bf16.xpose.msk.msra.mxu1 %vm7440_vm2, %v6029_v17  ;;  %v7983_v42 = vpop.permute.xlu1 %2319  ;;  %v6354_v45 = vunpack.i.h.bf16 %v7903_v12  ;;  %v3639_v33 = vpop.permute.xlu0 %3638  ;;  %v6053_v17 = vpack.c.bf16 %v6359_v19, %v6358_v30  ;;  %v9472_v19 = vsub.s32 0, %v7139_v9 }
 0x37b   : > { %9469 = vst [vmem:[#allocation38_spill] sm:$0xff] %v7983_v42  ;;  %6037 = vmatprep.subr.msk.bf16.mxu1 %vm7440_vm2, %v6035_v51 }
 0x37c   : > { %v6047_v59 = vpack.c.bf16 %v6354_v45, %v6353_v38  ;;  %v952_v38 = vand.u32 15, %v7139_v9 }
 0x37e   : > { %v7987_v7 = vpop.permute.xlu1 %1613 }
 0x37f   : > { %9470 = vst [vmem:[#allocation39_spill] sm:$0xff] %v7987_v7 }
 0x382   : > { %6040 = vmatpush3.bf16.xpose.msk.msra.mxu1 %vm7440_vm2, %v6035_v51  ;;  %v2784_v14 = vpop.permute.xlu1 %2783  ;;  %v935_v51 = vadd.s32 8, %v7139_v9 }
 0x383   : > { %6043 = vmatprep.subr.msk.bf16.mxu1 %vm7440_vm2, %v6041_v55  ;;  %5525 = vmatmul.mubr.msk.f32.gmra.mrb[78].mxu1 %vm1082_vm1, %v2784_v14  ;;  %v937_v14 = vadd.s32 24, %v7139_v9 }
 0x384   : > { %5643 = vmatprep.mubr.msk.f32.mxu1 %vm1082_vm1, %v7911_v62  ;;  %v3643_v62 = vpop.permute.xlu0 %3642  ;;  %v953_v24 = vand.u32 15, %v935_v51 }
 0x388   : > { %v3647_v12 = vpop.permute.xlu0 %3646 }
 0x38a   : > { %6046 = vmatpush3.bf16.xpose.msk.msra.mxu1 %vm7440_vm2, %v6041_v55  ;;  %v8020_v55 = vand.u32 15, %v951_v2 }
 0x38b   : > { %6049 = vmatprep.subr.msk.bf16.mxu1 %vm7440_vm2, %v6047_v59 }
 0x38c   : > { %v3651_v54 = vpop.permute.xlu0 %3650  ;;  %vm970_vm3 = vcmp.eq.s32.totalorder %v953_v24, %v8020_v55  ;;  %vm969_vm4 = vcmp.eq.s32.totalorder %v952_v38, %v8020_v55  ;;  %v942_v38 = vadd.s32 64, %v7139_v9 }
 0x390   : > { %v3655_v45 = vpop.permute.xlu0 %3654 }
 0x392   : > { %6052 = vmatpush3.bf16.xpose.msk.msra.mxu1 %vm7440_vm2, %v6047_v59  ;;  %v987_v59 = vmul.f32 1e+09, %v4665_v44  ;;  %v941_v44 = vadd.s32 56, %v7139_v9 }
 0x393   : > { %6055 = vmatprep.subr.msk.bf16.mxu1 %vm7440_vm2, %v6053_v17 }
 0x394   : > { %v8033_v30 = vrot.slane %v987_v59, %v9472_v19 }
 0x39a   : > { %6058 = vmatpush3.bf16.xpose.msk.msra.mxu1 %vm7440_vm2, %v6053_v17  ;;  %v9329_v17 = vmov -1e+30  }
 0x3a1   : > { %5644 = vmatmul.mubr.msk.f32.vlgmr.msra.gmra.mrb[80].mxu1 %vm1082_vm1, %v3639_v33  ;;  %v3659_v33 = vpop.permute.xlu0 %3658 }
 0x3a2   : > { %5646 = vmatprep.mubr.msk.f32.mxu1 %vm1082_vm1, %v7915_v22  ;;  %v955_v22 = vand.u32 15, %v937_v14 }
 0x3a4   : > { %vm972_vm5 = vcmp.eq.s32.totalorder %v955_v22, %v8020_v55 }
 0x3a5   : > { %5647 = vmatmul.mubr.msk.f32.gmra.mrb[82].mxu1 %vm1082_vm1, %v3643_v62  ;;  %v989_v62 = vsel %vm970_vm3, 0.0, %v9329_v17  ;;  %v991_v2 = vsel %vm972_vm5, 0.0, %v9329_v17  ;;  %v3663_v24 = vpop.permute.xlu0 %3662 }
 0x3a6   : > { %5649 = vmatprep.mubr.msk.f32.mxu1 %vm1082_vm1, %v7919_v10  ;;  %v936_v10 = vadd.s32 16, %v7139_v9  ;;  %v8043_v52 = vadd.f32 %v8033_v30, %v989_v62  ;;  %v8060_v22 = vadd.f32 %v8033_v30, %v991_v2  ;;  %v959_v62 = vand.u32 15, %v941_v44 }
 0x3a8   : > { %v954_v51 = vand.u32 15, %v936_v10  ;;  %9473 = vst [vmem:[#allocation40_spill] sm:$0xff] %v8043_v52  ;;  %9475 = vst [vmem:[#allocation42_spill] sm:$0xff] %v8060_v22  ;;  %v940_v10 = vadd.s32 48, %v7139_v9  ;;  %vm976_vm9 = vcmp.eq.s32.totalorder %v959_v62, %v8020_v55 }
 0x3a9   : > { %5650 = vmatmul.mubr.msk.f32.gmra.mrb[84].mxu1 %vm1082_vm1, %v3647_v12  ;;  %v957_v12 = vand.u32 15, %v939_v15 }
 0x3aa   : > { %5652 = vmatprep.mubr.msk.f32.mxu1 %vm1082_vm1, %v7923_v29  ;;  %v988_v29 = vsel %vm969_vm4, 0.0, %v9329_v17  ;;  %vm971_vm7 = vcmp.eq.s32.totalorder %v954_v51, %v8020_v55  ;;  %v958_v44 = vand.u32 15, %v940_v10 }
 0x3ab   : > { %vm974_vm6 = vcmp.eq.s32.totalorder %v957_v12, %v8020_v55  ;;  %v990_v19 = vsel %vm971_vm7, 0.0, %v9329_v17 }
 0x3ac   : > { %v993_v15 = vsel %vm974_vm6, 0.0, %v9329_v17  ;;  %vm975_vm11 = vcmp.eq.s32.totalorder %v958_v44, %v8020_v55 }
 0x3ad   : > { %5653 = vmatmul.mubr.msk.f32.gmra.mrb[86].mxu1 %vm1082_vm1, %v3651_v54  ;;  %v8047_v54 = vadd.f32 %v8033_v30, %v988_v29  ;;  %v945_v29 = vadd.s32 88, %v7139_v9  ;;  %v8079_v2 = vadd.f32 %v8033_v30, %v993_v15  ;;  %v944_v15 = vadd.s32 80, %v7139_v9 }
 0x3ae   : > { %5655 = vmatprep.mubr.msk.f32.mxu1 %vm1082_vm1, %v7927_v4  ;;  %v956_v4 = vand.u32 15, %v938_v58  ;;  %v994_v35 = vsel %vm975_vm11, 0.0, %v9329_v17 }
 0x3af   : > { %9474 = vst [vmem:[#allocation41_spill] sm:$0xff] %v8047_v54  ;;  %9476 = vst [vmem:[#allocation43_spill] sm:$0xff] %v8079_v2  ;;  %v8128_v26 = vadd.f32 %v8033_v30, %v994_v35 }
 0x3b0   : > { %vm973_vm8 = vcmp.eq.s32.totalorder %v956_v4, %v8020_v55 }
 0x3b1   : > { %5656 = vmatmul.mubr.msk.f32.gmra.mrb[88].mxu1 %vm1082_vm1, %v3655_v45  ;;  %v992_v4 = vsel %vm973_vm8, 0.0, %v9329_v17  ;;  %9481 = vst [vmem:[#allocation48_spill] sm:$0xff] %v8128_v26 }
 0x3b2   : > { %5658 = vmatprep.mubr.msk.f32.mxu1 %vm1082_vm1, %v7935_v50  ;;  %v8096_v10 = vadd.f32 %v8033_v30, %v992_v4  ;;  %v947_v4 = vadd.s32 104, %v7139_v9 }
 0x3b3   : > { %v5225_v14 = vpop.f32.mrb[32].mxu1 }
 0x3b4   : > { %v8057_v45 = vadd.f32 %v5225_v14, %v8043_v52  ;;  %v1229_v59 = vpop.f32.mrb[33].mxu1  ;;  %v8082_v14 = vadd.f32 %v8033_v30, %v990_v19  ;;  %v3667_v19 = vpop.permute.xlu1 %3666  ;;  %9478 = vst [vmem:[#allocation45_spill] sm:$0xff] %v8096_v10  ;;  %v965_v8 = vand.u32 15, %v947_v4 }
 0x3b5   : > { %v8063_v50 = vadd.f32 %v1229_v59, %v8047_v54  ;;  %5659 = vmatmul.mubr.msk.f32.gmra.mrb[90].mxu1 %vm1082_vm1, %v3659_v33  ;;  %v960_v33 = vand.u32 15, %v942_v38  ;;  %v943_v38 = vadd.s32 72, %v7139_v9  ;;  %v963_v59 = vand.u32 15, %v945_v29 }
 0x3b6   : > { %5661 = vmatprep.mubr.msk.f32.mxu1 %vm1082_vm1, %v7943_v11  ;;  %1310 = vmax.xlane.f32.xlu1 %v8057_v45  ;;  %v3665_v11 = vpop.permute.xlu0 %3664  ;;  %9477 = vst [vmem:[#allocation44_spill] sm:$0xff] %v8082_v14  ;;  %v995_v29 = vsel %vm976_vm9, 0.0, %v9329_v17  ;;  %vm982_vm15 = vcmp.eq.s32.totalorder %v965_v8, %v8020_v55  ;;  %v9485_v8 = vmov -1e+30  }
 0x3b7   : > { %v5228_v12 = vpop.f32.mrb[34].mxu1  ;;  %1308 = vmax.xlane.f32.xlu0 %v8063_v50  ;;  %vm977_vm10 = vcmp.eq.s32.totalorder %v960_v33, %v8020_v55  ;;  %v961_v33 = vand.u32 15, %v943_v38  ;;  %vm980_vm12 = vcmp.eq.s32.totalorder %v963_v59, %v8020_v55 }
 0x3b8   : > { %v8076_v58 = vadd.f32 %v5228_v12, %v8060_v22  ;;  %v1239_v51 = vpop.f32.mrb[35].mxu1  ;;  %v996_v7 = vsel %vm977_vm10, 0.0, %v9329_v17  ;;  %v999_v59 = vsel %vm980_vm12, 0.0, %v9329_v17 }
 0x3b9   : > { %5662 = vmatmul.mubr.msk.f32.gmra.mrb[92].mxu1 %vm1082_vm1, %v3663_v24  ;;  %v8099_v62 = vadd.f32 %v1239_v51, %v8082_v14  ;;  %v962_v51 = vand.u32 15, %v944_v15  ;;  %v8117_v38 = vadd.f32 %v8033_v30, %v996_v7  ;;  %vm978_vm13 = vcmp.eq.s32.totalorder %v961_v33, %v8020_v55 }
 0x3ba   : > { %5664 = vmatprep.mubr.msk.f32.mxu1 %vm1082_vm1, %v3665_v11  ;;  %v946_v15 = vadd.s32 96, %v7139_v9  ;;  %v8131_v3 = vadd.f32 %v8033_v30, %v999_v59  ;;  %v997_v60 = vsel %vm978_vm13, 0.0, %v9329_v17  ;;  %v8250_v47 = vpop.permute.xlu0 %2303 }
 0x3bb   : > { %v5231_v12 = vpop.f32.mrb[36].mxu1  ;;  %1314 = vmax.xlane.f32.xlu0 %v8076_v58  ;;  %9480 = vst [vmem:[#allocation47_spill] sm:$0xff] %v8117_v38  ;;  %vm979_vm14 = vcmp.eq.s32.totalorder %v962_v51, %v8020_v55  ;;  %v949_v51 = vadd.s32 120, %v7139_v9  ;;  %v8146_v34 = vadd.f32 %v8033_v30, %v997_v60  ;;  %9490 = vst [vmem:[#allocation56_spill] sm:$0xff] %v8250_v47 }
 0x3bc   : > { %v8093_v24 = vadd.f32 %v5231_v12, %v8079_v2  ;;  %v1249_v11 = vpop.f32.mrb[37].mxu1  ;;  %9482 = vst [vmem:[#allocation49_spill] sm:$0xff] %v8131_v3  ;;  %v998_v4 = vsel %vm979_vm14, 0.0, %v9329_v17 }
 0x3bd   : > { %5665 = vmatmul.mubr.msk.f32.gmra.mrb[94].mxu1 %vm1082_vm1, %v3667_v19  ;;  %v8110_v42 = vadd.f32 %v1249_v11, %v8096_v10  ;;  %v8113_v19 = vadd.f32 %v8033_v30, %v995_v29  ;;  %9483 = vst [vmem:[#allocation50_spill] sm:$0xff] %v8146_v34  ;;  %v8152_v17 = vadd.f32 %v8033_v30, %v998_v4  ;;  %v967_v23 = vand.u32 15, %v949_v51 }
 0x3be   : > { %1318 = vmax.xlane.f32.xlu1 %v8093_v24 }
 0x3bf   : > { %v5234_v12 = vpop.f32.mrb[38].mxu1  ;;  %1312 = vmax.xlane.f32.xlu0 %v8099_v62  ;;  %9479 = vst [vmem:[#allocation46_spill] sm:$0xff] %v8113_v19  ;;  %9484 = vst [vmem:[#allocation51_spill] sm:$0xff] %v8152_v17  ;;  %vm984_vm3 = vcmp.eq.s32.totalorder %v967_v23, %v8020_v55 }
 0x3c0   : > { %v1259_v44 = vpop.f32.mrb[39].mxu1  ;;  %v8125_v29 = vadd.f32 %v5234_v12, %v8113_v19  ;;  %v964_v12 = vand.u32 15, %v946_v15  ;;  %v1001_v15 = vsel %vm982_vm15, 0.0, %v9485_v8 }
 0x3c1   : > { %v8143_v59 = vadd.f32 %v1259_v44, %v8128_v26  ;;  %v948_v44 = vadd.s32 112, %v7139_v9 }
 0x3c2   : > { %1316 = vmax.xlane.f32.xlu1 %v8110_v42  ;;  %vm981_vm2 = vcmp.eq.s32.totalorder %v964_v12, %v8020_v55 }
 0x3c3   : > { %v5237_v11 = vpop.f32.mrb[40].mxu1  ;;  %v1000_v13 = vsel %vm981_vm2, 0.0, %v9485_v8  ;;  %v966_v9 = vand.u32 15, %v948_v44 }
 0x3c4   : > { %v1269_v7 = vpop.f32.mrb[41].mxu1  ;;  %v8160_v60 = vadd.f32 %v5237_v11, %v8146_v34  ;;  %v8176_v51 = vadd.f32 %v8033_v30, %v1000_v13 }
 0x3c5   : > { %v8135_v33 = vadd.f32 %v1269_v7, %v8117_v38  ;;  %vm983_vm4 = vcmp.eq.s32.totalorder %v966_v9, %v8020_v55 }
 0x3c6   : > { %1322 = vmax.xlane.f32.xlu1 %v8125_v29  ;;  %9487 = vst [vmem:[#allocation53_spill] sm:$0xff] %v8176_v51  ;;  %v1002_v44 = vsel %vm983_vm4, 0.0, %v9485_v8 }
 0x3c7   : > { %v5240_v35 = vpop.f32.mrb[42].mxu1  ;;  %1324 = vmax.xlane.f32.xlu0 %v8135_v33 }
 0x3c8   : > { %v8149_v7 = vadd.f32 %v5240_v35, %v8131_v3  ;;  %v1279_v1 = vpop.f32.mrb[43].mxu1  ;;  %v8163_v35 = vadd.f32 %v8033_v30, %v1001_v15 }
 0x3c9   : > { %v8166_v0 = vadd.f32 %v1279_v1, %v8152_v17  ;;  %v1003_v1 = vsel %vm984_vm3, 0.0, %v9485_v8 }
 0x3ca   : > { %1320 = vmax.xlane.f32.xlu1 %v8143_v59  ;;  %9486 = vst [vmem:[#allocation52_spill] sm:$0xff] %v8163_v35  ;;  %v8185_v23 = vadd.f32 %v8033_v30, %v1003_v1 }
 0x3cb   : > { %v5243_v40 = vpop.f32.mrb[44].mxu1  ;;  %1330 = vmax.xlane.f32.xlu0 %v8149_v7 }
 0x3cc   : > { %v1289_v4 = vpop.f32.mrb[45].mxu1  ;;  %v8173_v11 = vadd.f32 %v5243_v40, %v8163_v35  ;;  %9488 = vst [vmem:[#allocation54_spill] sm:$0xff] %v8185_v23  ;;  %v8193_v40 = vadd.f32 %v8033_v30, %v1002_v44 }
 0x3cd   : > { %v8182_v43 = vadd.f32 %v1289_v4, %v8176_v51 }
 0x3ce   : > { %1326 = vmax.xlane.f32.xlu1 %v8160_v60  ;;  %9489 = vst [vmem:[#allocation55_spill] sm:$0xff] %v8193_v40 }
 0x3cf   : > { %v5246_v12 = vpop.f32.mrb[46].mxu1  ;;  %1328 = vmax.xlane.f32.xlu0 %v8166_v0 }
 0x3d0   : > { %v1299_v15 = vpop.f32.mrb[47].mxu1  ;;  %v8190_v13 = vadd.f32 %v5246_v12, %v8185_v23 }
 0x3d1   : > { %v8197_v55 = vadd.f32 %v1299_v15, %v8193_v40 }
 0x3d2   : > { %1334 = vmax.xlane.f32.xlu1 %v8173_v11 }
 0x3d6   : > { %1332 = vmax.xlane.f32.xlu1 %v8182_v43 }
 0x3da   : > { %1338 = vmax.xlane.f32.xlu1 %v8190_v13 }
 0x3de   : > { %1336 = vmax.xlane.f32.xlu1 %v8197_v55 }
 0x3f4   : > { %v5337_v4 = vpop.f32.mrb[48].mxu1 }
 0x3f5   : > { %v8201_v9 = vadd.f32 %v5337_v4, %v8043_v52  ;;  %v1871_v8 = vpop.f32.mrb[49].mxu1 }
 0x3f6   : > { %v8204_v1 = vadd.f32 %v1871_v8, %v8047_v54 }
 0x3f7   : > { %1952 = vmax.xlane.f32.xlu0 %v8201_v9 }
 0x3f8   : > { %v5340_v12 = vpop.f32.mrb[50].mxu1  ;;  %1950 = vmax.xlane.f32.xlu1 %v8204_v1 }
 0x3f9   : > { %v8209_v30 = vadd.f32 %v5340_v12, %v8060_v22  ;;  %v1881_v15 = vpop.f32.mrb[51].mxu1 }
 0x3fa   : > { %v8213_v4 = vadd.f32 %v1881_v15, %v8082_v14 }
 0x3fc   : > { %v5343_v44 = vpop.f32.mrb[52].mxu1  ;;  %1956 = vmax.xlane.f32.xlu1 %v8209_v30 }
 0x3fd   : > { %v1891_v37 = vpop.f32.mrb[53].mxu1  ;;  %v8221_v12 = vadd.f32 %v5343_v44, %v8079_v2 }
 0x3fe   : > { %v8216_v20 = vadd.f32 %v1891_v37, %v8096_v10 }
 0x400   : > { %v5346_v8 = vpop.f32.mrb[54].mxu1  ;;  %1954 = vmax.xlane.f32.xlu1 %v8213_v4  ;;  %1958 = vmax.xlane.f32.xlu0 %v8216_v20 }
 0x401   : > { %v1901_v28 = vpop.f32.mrb[55].mxu1  ;;  %v8229_v37 = vadd.f32 %v5346_v8, %v8113_v19 }
 0x402   : > { %v8224_v48 = vadd.f32 %v1901_v28, %v8128_v26 }
 0x404   : > { %v5349_v32 = vpop.f32.mrb[56].mxu1  ;;  %1960 = vmax.xlane.f32.xlu1 %v8221_v12  ;;  %1962 = vmax.xlane.f32.xlu0 %v8224_v48 }
 0x405   : > { %v1911_v15 = vpop.f32.mrb[57].mxu1  ;;  %v8237_v28 = vadd.f32 %v5349_v32, %v8146_v34 }
 0x406   : > { %v8232_v41 = vadd.f32 %v1911_v15, %v8117_v38 }
 0x408   : > { %v5352_v27 = vpop.f32.mrb[58].mxu1  ;;  %1964 = vmax.xlane.f32.xlu1 %v8229_v37  ;;  %1966 = vmax.xlane.f32.xlu0 %v8232_v41 }
 0x409   : > { %v1921_v44 = vpop.f32.mrb[59].mxu1  ;;  %v8245_v15 = vadd.f32 %v5352_v27, %v8131_v3  ;;  %v8262_v27 = vpop.permute.xlu0 %2309 }
 0x40a   : > { %v8240_v25 = vadd.f32 %v1921_v44, %v8152_v17  ;;  %9492 = vst [vmem:[#allocation58_spill] sm:$0xff] %v8262_v27 }
 0x40c   : > { %v5355_v63 = vpop.f32.mrb[60].mxu1  ;;  %1968 = vmax.xlane.f32.xlu1 %v8237_v28  ;;  %1970 = vmax.xlane.f32.xlu0 %v8240_v25 }
 0x40d   : > { %v1931_v8 = vpop.f32.mrb[61].mxu1  ;;  %v8255_v44 = vadd.f32 %v5355_v63, %v8163_v35  ;;  %v8268_v47 = vpop.permute.xlu0 %2313 }
 0x40e   : > { %v8248_v5 = vadd.f32 %v1931_v8, %v8176_v51  ;;  %9493 = vst [vmem:[#allocation59_spill] sm:$0xff] %v8268_v47 }
 0x410   : > { %v5358_v39 = vpop.f32.mrb[62].mxu1  ;;  %1972 = vmax.xlane.f32.xlu1 %v8245_v15  ;;  %1974 = vmax.xlane.f32.xlu0 %v8248_v5 }
 0x411   : > { %v1941_v32 = vpop.f32.mrb[63].mxu1  ;;  %v8265_v8 = vadd.f32 %v5358_v39, %v8185_v23  ;;  %v8270_v6 = vpop.permute.xlu0 %2317 }
 0x412   : > { %v8258_v61 = vadd.f32 %v1941_v32, %v8193_v40  ;;  %9494 = vst [vmem:[#allocation60_spill] sm:$0xff] %v8270_v6  ;;  %v8276_v32 = vpop.permute.xlu1 %2323 }
 0x413   : > { %9497 = vst [vmem:[#allocation63_spill] sm:$0xff] %v8276_v32 }
 0x414   : > { %9491 = vst [vmem:[#allocation57_spill] sm:$0xff] %v8258_v61  ;;  %1976 = vmax.xlane.f32.xlu1 %v8255_v44  ;;  %1978 = vmax.xlane.f32.xlu0 %v8258_v61 }
 0x415   : > { %v8272_v63 = vpop.permute.xlu0 %1615 }
 0x416   : > { %9495 = vst [vmem:[#allocation61_spill] sm:$0xff] %v8272_v63  ;;  %v8288_v63 = vpop.permute.xlu1 %2327 }
 0x417   : > { %9499 = vst [vmem:[#allocation65_spill] sm:$0xff] %v8288_v63 }
 0x418   : > { %1980 = vmax.xlane.f32.xlu1 %v8265_v8 }
 0x419   : > { %v8274_v56 = vpop.permute.xlu0 %2321 }
 0x41a   : > { %9496 = vst [vmem:[#allocation62_spill] sm:$0xff] %v8274_v56 }
 0x41d   : > { %v8278_v53 = vpop.permute.xlu0 %2325 }
 0x41e   : > { %9498 = vst [vmem:[#allocation64_spill] sm:$0xff] %v8278_v53 }
 0x421   : > { %v8293_v53 = vpop.permute.xlu0 %2329 }
 0x422   : > { %9500 = vst [vmem:[#allocation66_spill] sm:$0xff] %v8293_v53 }
 0x434   : > { %v5505_v61 = vpop.f32.mrb[64].mxu1 }
 0x435   : > { %v8281_v27 = vadd.f32 %v5505_v61, %v8043_v52  ;;  %v2947_v39 = vpop.f32.mrb[65].mxu1 }
 0x436   : > { %v8284_v57 = vadd.f32 %v2947_v39, %v8047_v54 }
 0x437   : > { %3028 = vmax.xlane.f32.xlu0 %v8281_v27 }
 0x438   : > { %v5508_v47 = vpop.f32.mrb[66].mxu1  ;;  %3026 = vmax.xlane.f32.xlu1 %v8284_v57 }
 0x439   : > { %v8291_v56 = vadd.f32 %v5508_v47, %v8060_v22  ;;  %v2957_v32 = vpop.f32.mrb[67].mxu1  ;;  %v8306_v47 = vpop.permute.xlu1 %2331 }
 0x43a   : > { %v8296_v61 = vadd.f32 %v2957_v32, %v8082_v14  ;;  %9502 = vst [vmem:[#allocation68_spill] sm:$0xff] %v8306_v47  ;;  %v8308_v22 = vpop.permute.xlu0 %2333 }
 0x43b   : > { %3032 = vmax.xlane.f32.xlu0 %v8291_v56  ;;  %9503 = vst [vmem:[#allocation69_spill] sm:$0xff] %v8308_v22 }
 0x43c   : > { %v5511_v39 = vpop.f32.mrb[68].mxu1  ;;  %3030 = vmax.xlane.f32.xlu1 %v8296_v61 }
 0x43d   : > { %v8301_v6 = vadd.f32 %v5511_v39, %v8079_v2  ;;  %v2967_v52 = vpop.f32.mrb[69].mxu1 }
 0x43e   : > { %v8304_v63 = vadd.f32 %v2967_v52, %v8096_v10 }
 0x43f   : > { %9501 = vst [vmem:[#allocation67_spill] sm:$0xff] %v8301_v6 }
 0x440   : > { %v5514_v53 = vpop.f32.mrb[70].mxu1  ;;  %3036 = vmax.xlane.f32.xlu1 %v8301_v6  ;;  %3034 = vmax.xlane.f32.xlu0 %v8304_v63 }
 0x441   : > { %v8313_v32 = vadd.f32 %v5514_v53, %v8113_v19  ;;  %v2977_v14 = vpop.f32.mrb[71].mxu1 }
 0x442   : > { %v8316_v39 = vadd.f32 %v2977_v14, %v8128_v26 }
 0x443   : > { %v1311_v2 = vpop.xlane.xlu1 %1310 }
 0x444   : > { %v1341_v52 = vsub.f32 %v8057_v45, %v1311_v2  ;;  %v5517_v10 = vpop.f32.mrb[72].mxu1  ;;  %3040 = vmax.xlane.f32.xlu1 %v8313_v32  ;;  %3038 = vmax.xlane.f32.xlu0 %v8316_v39  ;;  %v1309_v22 = vpop.xlane.xlu0 %1308 }
 0x445   : > { %v8322_v47 = vadd.f32 %v5517_v10, %v8146_v34  ;;  %v2987_v54 = vpop.f32.mrb[73].mxu1  ;;  %v1340_v19 = vsub.f32 %v8063_v50, %v1309_v22 }
 0x446   : > { %v1358_v6 = vmul.f32 1.442695, %v1341_v52  ;;  %v8325_v53 = vadd.f32 %v2987_v54, %v8117_v38 }
 0x447   : > { %9504 = vst [vmem:[#allocation70_spill] sm:$0xff] %v8322_v47  ;;  %v1356_v38 = vmul.f32 1.442695, %v1340_v19 }
 0x448   : > { %6536 = vpow2.f32 %v1358_v6  ;;  %v5520_v14 = vpop.f32.mrb[74].mxu1  ;;  %3044 = vmax.xlane.f32.xlu1 %v8322_v47  ;;  %3042 = vmax.xlane.f32.xlu0 %v8325_v53  ;;  %v1315_v26 = vpop.xlane.xlu0 %1314 }
 0x449   : > { %v8330_v45 = vadd.f32 %v5520_v14, %v8131_v3  ;;  %v2997_v2 = vpop.f32.mrb[75].mxu1  ;;  %v1343_v14 = vsub.f32 %v8076_v58, %v1315_v26  ;;  %6538 = vpow2.f32 %v1356_v38 }
 0x44a   : > { %v8334_v10 = vadd.f32 %v2997_v2, %v8152_v17 }
 0x44b   : > { %9505 = vst [vmem:[#allocation71_spill] sm:$0xff] %v8330_v45  ;;  %v1319_v52 = vpop.xlane.xlu1 %1318  ;;  %v1362_v17 = vmul.f32 1.442695, %v1343_v14 }
 0x44c   : > { %v5523_v34 = vpop.f32.mrb[76].mxu1  ;;  %3048 = vmax.xlane.f32.xlu1 %v8330_v45  ;;  %3046 = vmax.xlane.f32.xlu0 %v8334_v10  ;;  %v1313_v22 = vpop.xlane.xlu0 %1312  ;;  %v1345_v26 = vsub.f32 %v8093_v24, %v1319_v52 }
 0x44d   : > { %v8339_v6 = vadd.f32 %v5523_v34, %v8163_v35  ;;  %v3007_v54 = vpop.f32.mrb[77].mxu1  ;;  %v1342_v34 = vsub.f32 %v8099_v62, %v1313_v22  ;;  %6540 = vpow2.f32 %v1362_v17 }
 0x44e   : > { %v8343_v3 = vadd.f32 %v3007_v54, %v8176_v51  ;;  %v1366_v17 = vmul.f32 1.442695, %v1345_v26 }
 0x44f   : > { %9506 = vst [vmem:[#allocation72_spill] sm:$0xff] %v8339_v6  ;;  %v1317_v50 = vpop.xlane.xlu1 %1316  ;;  %v1360_v58 = vmul.f32 1.442695, %v1342_v34 }
 0x450   : > { %9507 = vst [vmem:[#allocation73_spill] sm:$0xff] %v8343_v3  ;;  %3052 = vmax.xlane.f32.xlu1 %v8339_v6  ;;  %3050 = vmax.xlane.f32.xlu0 %v8343_v3  ;;  %v1344_v24 = vsub.f32 %v8110_v42, %v1317_v50 }
 0x451   : > { %6542 = vpow2.f32 %v1360_v58 }
 0x452   : > { %v8347_v2 = vpop.eup %6536 }
 0x453   : > { %v1323_v45 = vpop.xlane.xlu1 %1322  ;;  %v8363_v34 = vpop.eup %6538 }
 0x454   : > { %1390 = vadd.xlane.f32.xlu0 %v8347_v2  ;;  %v1325_v19 = vpop.xlane.xlu0 %1324 }
 0x455   : > { %v1348_v47 = vsub.f32 %v8135_v33, %v1325_v19 }
 0x456   : > { %v5526_v54 = vpop.f32.mrb[78].mxu1 }
 0x457   : > { %v8353_v51 = vadd.f32 %v5526_v54, %v8185_v23  ;;  %v1321_v35 = vpop.xlane.xlu1 %1320  ;;  %v3017_v3 = vpop.f32.mrb[79].mxu1  ;;  %v1372_v54 = vmul.f32 1.442695, %v1348_v47 }
 0x458   : > { %v1346_v38 = vsub.f32 %v8143_v59, %v1321_v35  ;;  %v8358_v62 = vadd.f32 %v3017_v3, %v8193_v40  ;;  %v1331_v14 = vpop.xlane.xlu0 %1330  ;;  %v1364_v3 = vmul.f32 1.442695, %v1344_v24  ;;  %v1347_v35 = vsub.f32 %v8125_v29, %v1323_v45  ;;  %v8368_v26 = vpop.eup %6540 }
 0x459   : > { %9508 = vst [vmem:[#allocation74_spill] sm:$0xff] %v8353_v51  ;;  %3056 = vmax.xlane.f32.xlu1 %v8353_v51  ;;  %v1351_v45 = vsub.f32 %v8149_v7, %v1331_v14 }
 0x45a   : > { %9509 = vst [vmem:[#allocation75_spill] sm:$0xff] %v8358_v62  ;;  %v1368_v52 = vmul.f32 1.442695, %v1346_v38  ;;  %3054 = vmax.xlane.f32.xlu0 %v8358_v62  ;;  %v1370_v50 = vmul.f32 1.442695, %v1347_v35 }
 0x45b   : > { %v1327_v22 = vpop.xlane.xlu1 %1326  ;;  %v8372_v38 = vpop.eup %6542 }
 0x45c   : > { %6544 = vpow2.f32 %v1368_v52  ;;  %v1329_v33 = vpop.xlane.xlu0 %1328  ;;  %v1349_v47 = vsub.f32 %v8160_v60, %v1327_v22 }
 0x45d   : > { %v1350_v59 = vsub.f32 %v8166_v0, %v1329_v33  ;;  %1388 = vadd.xlane.f32.xlu1 %v8363_v34  ;;  %6546 = vpow2.f32 %v1366_v17 }
 0x45e   : > { %6548 = vpow2.f32 %v1372_v54  ;;  %v1374_v17 = vmul.f32 1.442695, %v1349_v47 }
 0x45f   : > { %v1335_v19 = vpop.xlane.xlu1 %1334  ;;  %v1376_v42 = vmul.f32 1.442695, %v1350_v59  ;;  %6550 = vpow2.f32 %v1364_v3 }
 0x460   : > { %v1353_v54 = vsub.f32 %v8173_v11, %v1335_v19 }
 0x461   : > { %1394 = vadd.xlane.f32.xlu1 %v8368_v26  ;;  %6552 = vpow2.f32 %v1376_v42 }
 0x462   : > { %6554 = vpow2.f32 %v1370_v50  ;;  %v1382_v14 = vmul.f32 1.442695, %v1353_v54 }
 0x463   : > { %v1333_v58 = vpop.xlane.xlu1 %1332 }
 0x464   : > { %v1352_v0 = vsub.f32 %v8182_v43, %v1333_v58  ;;  %v1378_v43 = vmul.f32 1.442695, %v1351_v45 }
 0x465   : > { %1392 = vadd.xlane.f32.xlu1 %v8372_v38 }
 0x466   : > { %v8376_v29 = vpop.eup %6544  ;;  %v1380_v24 = vmul.f32 1.442695, %v1352_v0 }
 0x467   : > { %1400 = vadd.xlane.f32.xlu0 %v8376_v29  ;;  %v8380_v52 = vpop.eup %6546  ;;  %v1339_v60 = vpop.xlane.xlu1 %1338 }
 0x468   : > { %6556 = vpow2.f32 %v1380_v24  ;;  %v8383_v22 = vpop.eup %6548  ;;  %v1355_v59 = vsub.f32 %v8190_v13, %v1339_v60 }
 0x469   : > { %1398 = vadd.xlane.f32.xlu1 %v8380_v52  ;;  %6558 = vpow2.f32 %v1374_v17  ;;  %v8387_v33 = vpop.eup %6550 }
 0x46a   : > { %6560 = vpow2.f32 %v1378_v43  ;;  %v1386_v19 = vmul.f32 1.442695, %v1355_v59 }
 0x46b   : > { %1404 = vadd.xlane.f32.xlu0 %v8383_v22  ;;  %v8390_v7 = vpop.eup %6552  ;;  %v1337_v3 = vpop.xlane.xlu1 %1336  ;;  %6562 = vpow2.f32 %v1382_v14 }
 0x46c   : > { %v8394_v35 = vpop.eup %6554  ;;  %v1354_v42 = vsub.f32 %v8197_v55, %v1337_v3  ;;  %6564 = vpow2.f32 %v1386_v19 }
 0x46d   : > { %1396 = vadd.xlane.f32.xlu1 %v8387_v33 }
 0x46e   : > { %v1384_v58 = vmul.f32 1.442695, %v1354_v42 }
 0x46f   : > { %1408 = vadd.xlane.f32.xlu0 %v8390_v7 }
 0x470   : > { %6566 = vpow2.f32 %v1384_v58 }
 0x471   : > { %1402 = vadd.xlane.f32.xlu1 %v8394_v35 }
 0x472   : > { %v8397_v11 = vpop.eup %6556 }
 0x473   : > { %1412 = vadd.xlane.f32.xlu0 %v8397_v11  ;;  %v8401_v50 = vpop.eup %6558 }
 0x474   : > { %v8403_v47 = vpop.f32.mrb[80].mxu1  ;;  %v8408_v0 = vpop.eup %6560 }
 0x475   : > { %9510 = vst [vmem:[#allocation76_spill] sm:$0xff] %v8403_v47  ;;  %v8405_v13 = vpop.f32.mrb[81].mxu1  ;;  %1406 = vadd.xlane.f32.xlu1 %v8401_v50  ;;  %v8415_v55 = vpop.eup %6562 }
 0x476   : > { %9511 = vst [vmem:[#allocation77_spill] sm:$0xff] %v8405_v13  ;;  %v8422_v43 = vpop.eup %6564 }
 0x478   : > { %v8410_v45 = vpop.f32.mrb[82].mxu1 }
 0x479   : > { %9512 = vst [vmem:[#allocation78_spill] sm:$0xff] %v8410_v45  ;;  %v8412_v17 = vpop.f32.mrb[83].mxu1  ;;  %1410 = vadd.xlane.f32.xlu1 %v8408_v0 }
 0x47a   : > { %9513 = vst [vmem:[#allocation79_spill] sm:$0xff] %v8412_v17  ;;  %v8429_v59 = vpop.eup %6566 }
 0x47c   : > { %v8417_v24 = vpop.f32.mrb[84].mxu1 }
 0x47d   : > { %9514 = vst [vmem:[#allocation80_spill] sm:$0xff] %v8417_v24  ;;  %v8419_v60 = vpop.f32.mrb[85].mxu1  ;;  %1414 = vadd.xlane.f32.xlu1 %v8415_v55 }
 0x47e   : > { %9515 = vst [vmem:[#allocation81_spill] sm:$0xff] %v8419_v60 }
 0x480   : > { %v8424_v54 = vpop.f32.mrb[86].mxu1 }
 0x481   : > { %9516 = vst [vmem:[#allocation82_spill] sm:$0xff] %v8424_v54  ;;  %v8426_v14 = vpop.f32.mrb[87].mxu1  ;;  %1418 = vadd.xlane.f32.xlu1 %v8422_v43 }
 0x482   : > { %9517 = vst [vmem:[#allocation83_spill] sm:$0xff] %v8426_v14 }
 0x484   : > { %v8431_v3 = vpop.f32.mrb[88].mxu1  ;;  %v1953_v19 = vpop.xlane.xlu0 %1952 }
 0x485   : > { %9518 = vst [vmem:[#allocation84_spill] sm:$0xff] %v8431_v3  ;;  %v1983_v42 = vsub.f32 %v8201_v9, %v1953_v19  ;;  %v8434_v58 = vpop.f32.mrb[89].mxu1  ;;  %v1951_v40 = vpop.xlane.xlu1 %1950  ;;  %1416 = vadd.xlane.f32.xlu1 %v8429_v59 }
 0x486   : > { %9519 = vst [vmem:[#allocation85_spill] sm:$0xff] %v8434_v58  ;;  %v1982_v24 = vsub.f32 %v8204_v1, %v1951_v40 }
 0x487   : > { %v2000_v60 = vmul.f32 1.442695, %v1983_v42 }
 0x488   : > { %v1998_v45 = vmul.f32 1.442695, %v1982_v24  ;;  %v8438_v17 = vpop.f32.mrb[90].mxu1 }
 0x489   : > { %9520 = vst [vmem:[#allocation86_spill] sm:$0xff] %v8438_v17  ;;  %6568 = vpow2.f32 %v2000_v60  ;;  %v8440_v14 = vpop.f32.mrb[91].mxu1  ;;  %v1957_v47 = vpop.xlane.xlu1 %1956 }
 0x48a   : > { %9521 = vst [vmem:[#allocation87_spill] sm:$0xff] %v8440_v14  ;;  %6570 = vpow2.f32 %v1998_v45  ;;  %v1985_v13 = vsub.f32 %v8209_v30, %v1957_v47 }
 0x48c   : > { %v2004_v51 = vmul.f32 1.442695, %v1985_v13  ;;  %v8443_v9 = vpop.f32.mrb[92].mxu1 }
 0x48d   : > { %9522 = vst [vmem:[#allocation88_spill] sm:$0xff] %v8443_v9  ;;  %v8445_v19 = vpop.f32.mrb[93].mxu1  ;;  %v1955_v58 = vpop.xlane.xlu1 %1954 }
 0x48e   : > { %9523 = vst [vmem:[#allocation89_spill] sm:$0xff] %v8445_v19  ;;  %6572 = vpow2.f32 %v2004_v51  ;;  %v1984_v40 = vsub.f32 %v8213_v4, %v1955_v58  ;;  %v1959_v1 = vpop.xlane.xlu0 %1958  ;;  %v9527_v19 = vld [vmem:[#allocation19_spill] sm:$0xff] }
 0x48f   : > { %v1986_v24 = vsub.f32 %v8216_v20, %v1959_v1 }
 0x490   : > { %v2002_v42 = vmul.f32 1.442695, %v1984_v40  ;;  %v8449_v60 = vpop.f32.mrb[94].mxu1 }
 0x491   : > { %9524 = vst [vmem:[#allocation90_spill] sm:$0xff] %v8449_v60  ;;  %v2006_v14 = vmul.f32 1.442695, %v1986_v24  ;;  %v8451_v62 = vpop.f32.mrb[95].mxu1  ;;  %v1961_v45 = vpop.xlane.xlu1 %1960 }
 0x492   : > { %9525 = vst [vmem:[#allocation91_spill] sm:$0xff] %v8451_v62  ;;  %6574 = vpow2.f32 %v2002_v42  ;;  %v1987_v30 = vsub.f32 %v8221_v12, %v1961_v45  ;;  %v1963_v47 = vpop.xlane.xlu0 %1962 }
 0x493   : > { %v8454_v13 = vpop.eup %6568  ;;  %6576 = vpow2.f32 %v2006_v14  ;;  %v1988_v51 = vsub.f32 %v8224_v48, %v1963_v47 }
 0x494   : > { %v8457_v4 = vpop.eup %6570  ;;  %v2008_v58 = vmul.f32 1.442695, %v1987_v30  ;;  %2032 = vadd.xlane.f32.xlu1 %v8454_v13 }
 0x495   : > { %v2010_v20 = vmul.f32 1.442695, %v1988_v51  ;;  %v1965_v40 = vpop.xlane.xlu1 %1964  ;;  %2030 = vadd.xlane.f32.xlu0 %v8457_v4 }
 0x496   : > { %6578 = vpow2.f32 %v2008_v58  ;;  %v1989_v1 = vsub.f32 %v8229_v37, %v1965_v40  ;;  %v1967_v24 = vpop.xlane.xlu0 %1966 }
 0x497   : > { %v1990_v12 = vsub.f32 %v8232_v41, %v1967_v24  ;;  %6580 = vpow2.f32 %v2010_v20 }
 0x498   : > { %v8463_v42 = vpop.eup %6572  ;;  %v2012_v14 = vmul.f32 1.442695, %v1989_v1 }
 0x499   : > { %v2014_v48 = vmul.f32 1.442695, %v1990_v12  ;;  %v1969_v45 = vpop.xlane.xlu1 %1968  ;;  %2036 = vadd.xlane.f32.xlu1 %v8463_v42 }
 0x49a   : > { %6582 = vpow2.f32 %v2012_v14  ;;  %v1991_v30 = vsub.f32 %v8237_v28, %v1969_v45  ;;  %v1971_v47 = vpop.xlane.xlu0 %1970 }
 0x49b   : > { %v1992_v51 = vsub.f32 %v8240_v25, %v1971_v47  ;;  %6584 = vpow2.f32 %v2014_v48 }
 0x49c   : > { %v8468_v58 = vpop.eup %6574  ;;  %v2016_v37 = vmul.f32 1.442695, %v1991_v30 }
 0x49d   : > { %v8470_v40 = vpop.eup %6576  ;;  %v2018_v41 = vmul.f32 1.442695, %v1992_v51  ;;  %v1973_v24 = vpop.xlane.xlu1 %1972  ;;  %2034 = vadd.xlane.f32.xlu1 %v8468_v58 }
 0x49e   : > { %6586 = vpow2.f32 %v2016_v37  ;;  %v1993_v20 = vsub.f32 %v8245_v15, %v1973_v24  ;;  %2038 = vadd.xlane.f32.xlu0 %v8470_v40  ;;  %v1975_v1 = vpop.xlane.xlu0 %1974 }
 0x49f   : > { %v1994_v28 = vsub.f32 %v8248_v5, %v1975_v1  ;;  %6588 = vpow2.f32 %v2018_v41 }
 0x4a0   : > { %v8476_v12 = vpop.eup %6578  ;;  %v2020_v25 = vmul.f32 1.442695, %v1993_v20 }
 0x4a1   : > { %v2022_v14 = vmul.f32 1.442695, %v1994_v28  ;;  %v1977_v45 = vpop.xlane.xlu1 %1976  ;;  %2040 = vadd.xlane.f32.xlu1 %v8476_v12  ;;  %v8480_v30 = vpop.eup %6580 }
 0x4a2   : > { %6590 = vpow2.f32 %v2020_v25  ;;  %v1995_v48 = vsub.f32 %v8255_v44, %v1977_v45  ;;  %v1979_v20 = vpop.xlane.xlu0 %1978 }
 0x4a3   : > { %6592 = vpow2.f32 %v2022_v14 }
 0x4a4   : > { %v8482_v47 = vpop.eup %6582  ;;  %v2024_v15 = vmul.f32 1.442695, %v1995_v48 }
 0x4a5   : > { %2044 = vadd.xlane.f32.xlu0 %v8482_v47  ;;  %2042 = vadd.xlane.f32.xlu1 %v8480_v30  ;;  %v8486_v5 = vpop.eup %6584  ;;  %v1981_v1 = vpop.xlane.xlu1 %1980 }
 0x4a6   : > { %6594 = vpow2.f32 %v2024_v15 }
 0x4a8   : > { %v8488_v51 = vpop.eup %6586 }
 0x4a9   : > { %2048 = vadd.xlane.f32.xlu0 %v8488_v51  ;;  %2046 = vadd.xlane.f32.xlu1 %v8486_v5  ;;  %v8492_v44 = vpop.eup %6588 }
 0x4ac   : > { %v8494_v37 = vpop.eup %6590 }
 0x4ad   : > { %2052 = vadd.xlane.f32.xlu0 %v8494_v37  ;;  %2050 = vadd.xlane.f32.xlu1 %v8492_v44  ;;  %v8498_v41 = vpop.eup %6592 }
 0x4b0   : > { %v8500_v24 = vpop.eup %6594 }
 0x4b1   : > { %9526 = vst [vmem:[#allocation92_spill] sm:$0xff] %v8500_v24  ;;  %2056 = vadd.xlane.f32.xlu0 %v8500_v24  ;;  %2054 = vadd.xlane.f32.xlu1 %v8498_v41 }
 0x4c2   : > { %6361 = vrot.lane.b32.xlu1 %v7173_v31, %s6805_s18 }
 0x4c4   : > { %v8506_v28 = vpop.xlane.xlu0 %3028 }
 0x4c5   : > { %v3027_v25 = vpop.xlane.xlu1 %3026 }
 0x4c6   : > { %1619 = vrot.lane.b32.xlu1 %v7708_v16, %s6801_s14 }
 0x4c7   : > { %1617 = vrot.lane.b32.xlu0 %v7662_v36, %s6801_s14 }
 0x4c8   : > { %v8512_v14 = vpop.xlane.xlu0 %3032 }
 0x4c9   : > { %v3031_v45 = vpop.xlane.xlu1 %3030 }
 0x4ca   : > { %1623 = vrot.lane.b32.xlu1 %v7722_v21, %s6801_s14  ;;  %v9528_v21 = vld [vmem:[#allocation4_spill] sm:$0xff] }
 0x4cb   : > { %6366 = vrot.lane.b32.xlu0 %v7197_v46, %s6805_s18  ;;  %v9530_v46 = vld [vmem:[#allocation21_spill] sm:$0xff] }
 0x4cd   : > { %v8518_v48 = vpop.xlane.xlu1 %3036  ;;  %v3035_v15 = vpop.xlane.xlu0 %3034 }
 0x4ce   : > { %1627 = vrot.lane.b32.xlu1 %v7736_v18, %s6801_s14  ;;  %v9531_v18 = vld [vmem:[#allocation14_spill] sm:$0xff] }
 0x4cf   : > { %1621 = vrot.lane.b32.xlu0 %v7688_v49, %s6801_s14  ;;  %v9532_v49 = vld [vmem:[#allocation5_spill] sm:$0xff] }
 0x4d1   : > { %v8524_v16 = vpop.xlane.xlu1 %3040  ;;  %v3039_v62 = vpop.xlane.xlu0 %3038 }
 0x4d2   : > { %1631 = vrot.lane.b32.xlu1 %v9527_v19, %s6801_s14  ;;  %v9534_v19 = vld [vmem:[#allocation16_spill] sm:$0xff] }
 0x4d3   : > { %6371 = vrot.lane.b32.xlu0 %v9528_v21, %s6805_s18 }
 0x4d5   : > { %v8530_v36 = vpop.xlane.xlu1 %3044  ;;  %v3043_v31 = vpop.xlane.xlu0 %3042 }
 0x4d6   : > { %9529 = vst [vmem:[#allocation93_spill] sm:$0xff] %v8530_v36  ;;  %1635 = vrot.lane.b32.xlu1 %v9530_v46, %s6801_s14  ;;  %v9537_v46 = vld [vmem:[#allocation6_spill] sm:$0xff]  ;;  %v9539_v36 = vld [vmem:[#allocation57_spill] sm:$0xff] }
 0x4d7   : > { %1625 = vrot.lane.b32.xlu0 %v9531_v18, %s6801_s14  ;;  %v3058_v18 = vsub.f32 %v8284_v57, %v3027_v25  ;;  %v1996_v6 = vsub.f32 %v9539_v36, %v1979_v20  ;;  %v9540_v20 = vld [vmem:[#allocation27_spill] sm:$0xff] }
 0x4d9   : > { %v8538_v60 = vpop.xlane.xlu1 %3048  ;;  %v8540_v23 = vpop.xlane.xlu0 %3046  ;;  %v3074_v54 = vmul.f32 1.442695, %v3058_v18  ;;  %v2026_v57 = vmul.f32 1.442695, %v1996_v6 }
 0x4da   : > { %9533 = vst [vmem:[#allocation94_spill] sm:$0xff] %v8538_v60 }
 0x4db   : > { %6376 = vrot.lane.b32.xlu0 %v9532_v49, %s6805_s18  ;;  %v3060_v49 = vsub.f32 %v8296_v61, %v3031_v45 }
 0x4dd   : > { %v8544_v21 = vpop.xlane.xlu1 %3052  ;;  %v8546_v9 = vpop.xlane.xlu0 %3050 }
 0x4de   : > { %9535 = vst [vmem:[#allocation95_spill] sm:$0xff] %v8544_v21  ;;  %9536 = vst [vmem:[#allocation96_spill] sm:$0xff] %v8546_v9  ;;  %v1997_v21 = vsub.f32 %v8265_v8, %v1981_v1  ;;  %v3066_v8 = vsub.f32 %v8325_v53, %v3043_v31  ;;  %v9541_v31 = vld [vmem:[#allocation31_spill] sm:$0xff] }
 0x4df   : > { %1629 = vrot.lane.b32.xlu0 %v9534_v19, %s6801_s14  ;;  %v3078_v19 = vmul.f32 1.442695, %v3060_v49  ;;  %v6294_v53 = vunpack.i.h.bf16 %v9541_v31 }
 0x4e0   : > { %v2028_v61 = vmul.f32 1.442695, %v1997_v21 }
 0x4e1   : > { %v1391_v3 = vpop.xlane.xlu0 %1390 }
 0x4e2   : > { %6596 = vrcp.f32 %v1391_v3 }
 0x4e3   : > { %6381 = vrot.lane.b32.xlu0 %v9537_v46, %s6805_s18  ;;  %v3062_v46 = vsub.f32 %v8304_v63, %v3035_v15  ;;  %v9542_v15 = vld [vmem:[#allocation26_spill] sm:$0xff] }
 0x4e5   : > { %v3082_v3 = vmul.f32 1.442695, %v3062_v46 }
 0x4e6   : > { %v8550_v17 = vpop.xlane.xlu1 %3056 }
 0x4e7   : > { %9538 = vst [vmem:[#allocation97_spill] sm:$0xff] %v8550_v17  ;;  %v3064_v17 = vsub.f32 %v8316_v39, %v3039_v62  ;;  %v8558_v24 = vpop.xlane.xlu0 %3054  ;;  %v6289_v39 = vunpack.i.h.bf16 %v9540_v20  ;;  %v6288_v62 = vunpack.i.l.bf16 %v9540_v20 }
 0x4e9   : > { %v3086_v36 = vmul.f32 1.442695, %v3064_v17  ;;  %v3090_v17 = vmul.f32 1.442695, %v3066_v8 }
 0x4ea   : > { %v1389_v60 = vpop.xlane.xlu1 %1388 }
 0x4eb   : > { %6598 = vrcp.f32 %v1389_v60 }
 0x4ec   : > { %6600 = vpow2.f32 %v3074_v54  ;;  %v6597_v60 = vpop.eup %6596 }
 0x4ed   : > { %6602 = vpow2.f32 %v3078_v19  ;;  %v6293_v19 = vunpack.i.l.bf16 %v9541_v31 }
 0x4ee   : > { %v1395_v9 = vpop.xlane.xlu1 %1394 }
 0x4ef   : > { %6604 = vrcp.f32 %v1395_v9  ;;  %v1437_v9 = vmul.f32 %v6597_v60, %v8347_v2 }
 0x4f2   : > { %v1393_v18 = vpop.xlane.xlu1 %1392 }
 0x4f3   : > { %6606 = vrcp.f32 %v1393_v18  ;;  %v5895_v18 = vpack.c.bf16 %v6294_v53, %v6293_v19 }
 0x4f4   : > { %v1401_v49 = vpop.xlane.xlu0 %1400  ;;  %6608 = vpow2.f32 %v2026_v57 }
 0x4f5   : > { %6610 = vpow2.f32 %v2028_v61  ;;  %v6599_v63 = vpop.eup %6598 }
 0x4f6   : > { %v1399_v54 = vpop.xlane.xlu1 %1398  ;;  %6612 = vpow2.f32 %v3082_v3  ;;  %v1436_v6 = vmul.f32 %v6599_v63, %v8363_v34  ;;  %v8564_v46 = vpop.eup %6600  ;;  %v5891_v34 = vpack.c.bf16 %v6289_v39, %v6288_v62 }
 0x4f7   : > { %6614 = vpow2.f32 %v3086_v36  ;;  %v8570_v25 = vpop.eup %6602 }
 0x4f8   : > { %v1405_v21 = vpop.xlane.xlu0 %1404  ;;  %6616 = vrcp.f32 %v1401_v49  ;;  %5279 = vmatprep.mubr.f32.mxu0 %v1436_v6  ;;  %v9543_v49 = vld [vmem:[#allocation28_spill] sm:$0xff] }
 0x4f9   : > { %6618 = vrcp.f32 %v1399_v54  ;;  %5280 = vmatmul.mubr.f32.vlgmr.msra.gmra.mrb[0].mxu0 %v1437_v9  ;;  %v6605_v45 = vpop.eup %6604  ;;  %v6299_v8 = vunpack.i.h.bf16 %v9543_v49  ;;  %v6298_v60 = vunpack.i.l.bf16 %v9543_v49 }
 0x4fa   : > { %3106 = vadd.xlane.f32.xlu1 %v8564_v46  ;;  %v1397_v1 = vpop.xlane.xlu1 %1396  ;;  %5890 = vmatpush3.bf16.msra.mxu0 %v9542_v15  ;;  %v1439_v54 = vmul.f32 %v6605_v45, %v8368_v26  ;;  %v9548_v15 = vld [vmem:[#allocation29_spill] sm:$0xff] }
 0x4fb   : > { %6620 = vrcp.f32 %v1397_v1  ;;  %5892 = vmatprep.subr.bf16.mxu0 %v5891_v34  ;;  %v5899_v9 = vpack.c.bf16 %v6299_v8, %v6298_v60  ;;  %v9549_v60 = vld [vmem:[#allocation33_spill] sm:$0xff] }
 0x4fc   : > { %6622 = vpow2.f32 %v3090_v17  ;;  %v1409_v2 = vpop.xlane.xlu0 %1408 }
 0x4fd   : > { %v6607_v57 = vpop.eup %6606  ;;  %6624 = vrcp.f32 %v1405_v21 }
 0x4fe   : > { %3110 = vadd.xlane.f32.xlu1 %v8570_v25  ;;  %v1403_v61 = vpop.xlane.xlu1 %1402  ;;  %v1438_v3 = vmul.f32 %v6607_v57, %v8372_v38  ;;  %v8575_v36 = vpop.eup %6608  ;;  %5894 = vmatpush3.bf16.msra.mxu0 %v5891_v34  ;;  %v9546_v38 = vld [vmem:[#allocation32_spill] sm:$0xff]  ;;  %v6309_v57 = vunpack.i.h.bf16 %v9548_v15 }
 0x4ff   : > { %6626 = vrcp.f32 %v1403_v61  ;;  %v8580_v63 = vpop.eup %6610  ;;  %5896 = vmatprep.subr.bf16.mxu0 %v5895_v18  ;;  %v6304_v62 = vunpack.i.h.bf16 %v9546_v38  ;;  %v6303_v21 = vunpack.i.l.bf16 %v9546_v38  ;;  %v6313_v38 = vunpack.i.l.bf16 %v9549_v60 }
 0x500   : > { %5282 = vmatprep.mubr.f32.mxu0 %v1438_v3  ;;  %v8582_v20 = vpop.eup %6612  ;;  %6628 = vrcp.f32 %v1409_v2  ;;  %v1413_v17 = vpop.xlane.xlu0 %1412  ;;  %v6308_v2 = vunpack.i.l.bf16 %v9548_v15 }
 0x501   : > { %9544 = vst [vmem:[#allocation57_spill] sm:$0xff] %v8582_v20  ;;  %5283 = vmatmul.mubr.f32.gmra.mrb[2].mxu0 %v1439_v54  ;;  %v8584_v39 = vpop.eup %6614  ;;  %v5903_v1 = vpack.c.bf16 %v6304_v62, %v6303_v21  ;;  %v6314_v54 = vunpack.i.h.bf16 %v9549_v60  ;;  %v3061_v60 = vsub.f32 %v8291_v56, %v8512_v14 }
 0x502   : > { %9545 = vst [vmem:[#allocation27_spill] sm:$0xff] %v8584_v39  ;;  %2060 = vadd.xlane.f32.xlu0 %v8580_v63  ;;  %3114 = vadd.xlane.f32.xlu1 %v8582_v20  ;;  %v1407_v26 = vpop.xlane.xlu1 %1406  ;;  %v6617_v6 = vpop.eup %6616 }
 0x503   : > { %6630 = vrcp.f32 %v1407_v26  ;;  %v6619_v31 = vpop.eup %6618  ;;  %5898 = vmatpush3.bf16.msra.mxu0 %v5895_v18  ;;  %v1442_v3 = vmul.f32 %v6617_v6, %v8376_v29 }
 0x504   : > { %5900 = vmatprep.subr.bf16.mxu0 %v5899_v9  ;;  %6632 = vrcp.f32 %v1413_v17  ;;  %v1441_v61 = vmul.f32 %v6619_v31, %v8380_v52  ;;  %v5907_v52 = vpack.c.bf16 %v6309_v57, %v6308_v2  ;;  %v9550_v17 = vld [vmem:[#allocation30_spill] sm:$0xff]  ;;  %v5911_v31 = vpack.c.bf16 %v6314_v54, %v6313_v38 }
 0x505   : > { %v6621_v53 = vpop.eup %6620  ;;  %v3068_v54 = vsub.f32 %v8334_v10, %v8540_v23  ;;  %v3065_v10 = vsub.f32 %v8313_v32, %v8524_v16 }
 0x506   : > { %2058 = vadd.xlane.f32.xlu0 %v8575_v36  ;;  %3118 = vadd.xlane.f32.xlu1 %v8584_v39  ;;  %v1411_v19 = vpop.xlane.xlu1 %1410  ;;  %v1440_v34 = vmul.f32 %v6621_v53, %v8387_v33  ;;  %v8593_v45 = vpop.eup %6622 }
 0x507   : > { %9547 = vst [vmem:[#allocation31_spill] sm:$0xff] %v8593_v45  ;;  %6634 = vrcp.f32 %v1411_v19  ;;  %v6625_v18 = vpop.eup %6624  ;;  %5902 = vmatpush3.bf16.msra.mxu0 %v5899_v9  ;;  %v6319_v9 = vunpack.i.h.bf16 %v9550_v17 }
 0x508   : > { %5285 = vmatprep.mubr.f32.mxu0 %v1440_v34  ;;  %5904 = vmatprep.subr.bf16.mxu0 %v5903_v1  ;;  %v1444_v21 = vmul.f32 %v6625_v18, %v8383_v22  ;;  %v9552_v18 = vld [vmem:[#allocation20_spill] sm:$0xff] }
 0x509   : > { %v6627_v49 = vpop.eup %6626  ;;  %5286 = vmatmul.mubr.f32.gmra.mrb[4].mxu0 %v1441_v61 }
 0x50a   : > { %3122 = vadd.xlane.f32.xlu1 %v8593_v45  ;;  %v1415_v33 = vpop.xlane.xlu1 %1414  ;;  %5288 = vmatprep.mubr.f32.mxu0 %v1442_v3  ;;  %v1443_v8 = vmul.f32 %v6627_v49, %v8394_v35  ;;  %v6629_v62 = vpop.eup %6628  ;;  %v6318_v35 = vunpack.i.l.bf16 %v9550_v17 }
 0x50b   : > { %6636 = vrcp.f32 %v1415_v33  ;;  %5906 = vmatpush3.bf16.msra.mxu0 %v5903_v1  ;;  %v1446_v19 = vmul.f32 %v6629_v62, %v8390_v7  ;;  %v9551_v7 = vld [vmem:[#allocation23_spill] sm:$0xff] }
 0x50c   : > { %5908 = vmatprep.subr.bf16.mxu0 %v5907_v52  ;;  %v5915_v15 = vpack.c.bf16 %v6319_v9, %v6318_v35 }
 0x50d   : > { %v6631_v29 = vpop.eup %6630  ;;  %5289 = vmatmul.mubr.f32.gmra.mrb[6].mxu0 %v1443_v8  ;;  %v3059_v8 = vsub.f32 %v8281_v27, %v8506_v28 }
 0x50e   : > { %v1419_v26 = vpop.xlane.xlu1 %1418  ;;  %5291 = vmatprep.mubr.f32.mxu0 %v1444_v21  ;;  %v1445_v6 = vmul.f32 %v6631_v29, %v8401_v50  ;;  %v6633_v53 = vpop.eup %6632  ;;  %v3080_v21 = vmul.f32 1.442695, %v3061_v60  ;;  %v9553_v29 = vld [vmem:[#allocation67_spill] sm:$0xff] }
 0x50f   : > { %5910 = vmatpush3.bf16.msra.mxu0 %v5907_v52  ;;  %6638 = vrcp.f32 %v1419_v26  ;;  %v1448_v50 = vmul.f32 %v6633_v53, %v8397_v11  ;;  %v3076_v52 = vmul.f32 1.442695, %v3059_v8  ;;  %v3063_v26 = vsub.f32 %v9553_v29, %v8518_v48 }
 0x510   : > { %5912 = vmatprep.subr.bf16.mxu0 %v5911_v31 }
 0x511   : > { %v6635_v34 = vpop.eup %6634  ;;  %5292 = vmatmul.mubr.f32.gmra.mrb[8].mxu0 %v1445_v6  ;;  %v3094_v6 = vmul.f32 1.442695, %v3068_v54  ;;  %v3084_v23 = vmul.f32 1.442695, %v3063_v26 }
 0x512   : > { %v1417_v22 = vpop.xlane.xlu1 %1416  ;;  %5294 = vmatprep.mubr.f32.mxu0 %v1446_v19  ;;  %v1447_v1 = vmul.f32 %v6635_v34, %v8408_v0 }
 0x513   : > { %6640 = vrcp.f32 %v1417_v22  ;;  %5914 = vmatpush3.bf16.msra.mxu0 %v5911_v31 }
 0x514   : > { %5916 = vmatprep.subr.bf16.mxu0 %v5915_v15 }
 0x515   : > { %v6637_v57 = vpop.eup %6636  ;;  %5295 = vmatmul.mubr.f32.gmra.mrb[10].mxu0 %v1447_v1 }
 0x516   : > { %5297 = vmatprep.mubr.f32.mxu0 %v1448_v50  ;;  %v1449_v2 = vmul.f32 %v6637_v57, %v8415_v55 }
 0x517   : > { %5918 = vmatpush3.bf16.msra.mxu0 %v5915_v15 }
 0x519   : > { %5298 = vmatmul.mubr.f32.gmra.mrb[12].mxu0 %v1449_v2  ;;  %v6639_v61 = vpop.eup %6638 }
 0x51a   : > { %v1451_v11 = vmul.f32 %v6639_v61, %v8422_v43 }
 0x51b   : > { %1639 = vrot.lane.b32.xlu1 %v9551_v7, %s6801_s14 }
 0x51c   : > { %1633 = vrot.lane.b32.xlu0 %v9552_v18, %s6801_s14  ;;  %v9631_v18 = vld [vmem:[#allocation56_spill] sm:$0xff] }
 0x51d   : > { %v6641_v0 = vpop.eup %6640 }
 0x51e   : > { %v1450_v3 = vmul.f32 %v6641_v0, %v8429_v59 }
 0x520   : > { %5300 = vmatprep.mubr.f32.mxu0 %v1450_v3 }
 0x521   : > { %v2033_v49 = vpop.xlane.xlu1 %2032  ;;  %5301 = vmatmul.mubr.f32.gmra.mrb[14].mxu0 %v1451_v11 }
 0x522   : > { %6642 = vrcp.f32 %v2033_v49  ;;  %v2031_v33 = vpop.xlane.xlu0 %2030 }
 0x523   : > { %6644 = vrcp.f32 %v2031_v33 }
 0x526   : > { %v2037_v55 = vpop.xlane.xlu1 %2036 }
 0x527   : > { %6646 = vrcp.f32 %v2037_v55 }
 0x52a   : > { %v2035_v59 = vpop.xlane.xlu1 %2034 }
 0x52b   : > { %6648 = vrcp.f32 %v2035_v59  ;;  %v2039_v43 = vpop.xlane.xlu0 %2038 }
 0x52c   : > { %v6643_v38 = vpop.eup %6642  ;;  %6650 = vrcp.f32 %v2039_v43  ;;  %v9558_v43 = vld [vmem:[#allocation92_spill] sm:$0xff] }
 0x52d   : > { %v6645_v62 = vpop.eup %6644  ;;  %v2079_v56 = vmul.f32 %v6643_v38, %v8454_v13  ;;  %v9559_v38 = vld [vmem:[#allocation25_spill] sm:$0xff] }
 0x52e   : > { %v2041_v27 = vpop.xlane.xlu1 %2040  ;;  %v2078_v28 = vmul.f32 %v6645_v62, %v8457_v4  ;;  %v3088_v4 = vmul.f32 1.442695, %v3065_v10  ;;  %v9562_v62 = vld [vmem:[#allocation22_spill] sm:$0xff] }
 0x52f   : > { %6652 = vrcp.f32 %v2041_v27  ;;  %v9565_v27 = vld [vmem:[#allocation93_spill] sm:$0xff] }
 0x530   : > { %6654 = vpow2.f32 %v3076_v52  ;;  %5391 = vmatprep.mubr.f32.mxu0 %v2078_v28  ;;  %v9560_v52 = vld [vmem:[#allocation9_spill] sm:$0xff]  ;;  %v9566_v28 = vld [vmem:[#allocation70_spill] sm:$0xff] }
 0x531   : > { %6656 = vpow2.f32 %v3080_v21  ;;  %5392 = vmatmul.mubr.f32.vlgmr.msra.gmra.mrb[16].mxu0 %v2079_v56  ;;  %v6647_v48 = vpop.eup %6646  ;;  %v9563_v21 = vld [vmem:[#allocation95_spill] sm:$0xff]  ;;  %v3067_v56 = vsub.f32 %v9566_v28, %v9565_v27  ;;  %v9589_v28 = vld [vmem:[#allocation94_spill] sm:$0xff] }
 0x532   : > { %6658 = vpow2.f32 %v3094_v6  ;;  %v2043_v14 = vpop.xlane.xlu1 %2042  ;;  %v2045_v17 = vpop.xlane.xlu0 %2044  ;;  %v2081_v19 = vmul.f32 %v6647_v48, %v8463_v42  ;;  %v9588_v27 = vld [vmem:[#allocation11_spill] sm:$0xff] }
 0x533   : > { %6660 = vrcp.f32 %v2043_v14  ;;  %v3092_v10 = vmul.f32 1.442695, %v3067_v56  ;;  %v9590_v56 = vld [vmem:[#allocation71_spill] sm:$0xff] }
 0x534   : > { %6662 = vrcp.f32 %v2045_v17 }
 0x535   : > { %v6649_v9 = vpop.eup %6648  ;;  %6664 = vpow2.f32 %v3084_v23 }
 0x536   : > { %v6651_v35 = vpop.eup %6650  ;;  %v2047_v31 = vpop.xlane.xlu1 %2046  ;;  %v2080_v53 = vmul.f32 %v6649_v9, %v8468_v58  ;;  %v9568_v9 = vld [vmem:[#allocation46_spill] sm:$0xff] }
 0x537   : > { %v2049_v13 = vpop.xlane.xlu0 %2048  ;;  %6666 = vrcp.f32 %v2047_v31  ;;  %v2082_v16 = vmul.f32 %v6651_v35, %v8470_v40  ;;  %v9569_v35 = vld [vmem:[#allocation82_spill] sm:$0xff] }
 0x538   : > { %6668 = vrcp.f32 %v2049_v13  ;;  %5394 = vmatprep.mubr.f32.mxu0 %v2080_v53  ;;  %v9571_v31 = vld [vmem:[#allocation50_spill] sm:$0xff]  ;;  %v9572_v13 = vld [vmem:[#allocation84_spill] sm:$0xff] }
 0x539   : > { %v6653_v32 = vpop.eup %6652  ;;  %5395 = vmatmul.mubr.f32.gmra.mrb[18].mxu0 %v2081_v19  ;;  %6670 = vpow2.f32 %v3088_v4  ;;  %v8683_v4 = vadd.f32 %v9569_v35, %v9568_v9  ;;  %v8688_v53 = vadd.f32 %v9572_v13, %v9571_v31  ;;  %v9591_v9 = vld [vmem:[#allocation3_spill] sm:$0xff]  ;;  %v9592_v31 = vld [vmem:[#allocation96_spill] sm:$0xff]  ;;  %v9593_v13 = vld [vmem:[#allocation73_spill] sm:$0xff] }
 0x53a   : > { %v8632_v34 = vpop.eup %6654  ;;  %v2051_v22 = vpop.xlane.xlu1 %2050  ;;  %5397 = vmatprep.mubr.f32.mxu0 %v2082_v16  ;;  %v2083_v15 = vmul.f32 %v6653_v32, %v8476_v12  ;;  %v9575_v32 = vld [vmem:[#allocation49_spill] sm:$0xff] }
 0x53b   : > { %v2053_v1 = vpop.xlane.xlu0 %2052  ;;  %v8635_v50 = vpop.eup %6656  ;;  %6672 = vrcp.f32 %v2051_v22  ;;  %3108 = vadd.xlane.f32.xlu0 %v8632_v34  ;;  %9570 = vst [vmem:[#allocation30_spill] sm:$0xff] %v8683_v4  ;;  %9573 = vst [vmem:[#allocation67_spill] sm:$0xff] %v8688_v53  ;;  %v9576_v22 = vld [vmem:[#allocation86_spill] sm:$0xff] }
 0x53c   : > { %9554 = vst [vmem:[#allocation26_spill] sm:$0xff] %v8635_v50  ;;  %v8638_v42 = vpop.eup %6658  ;;  %6674 = vrcp.f32 %v2053_v1  ;;  %v8698_v1 = vadd.f32 %v9576_v22, %v9575_v32  ;;  %v9594_v32 = vld [vmem:[#allocation12_spill] sm:$0xff]  ;;  %v9595_v22 = vld [vmem:[#allocation75_spill] sm:$0xff] }
 0x53d   : > { %9555 = vst [vmem:[#allocation28_spill] sm:$0xff] %v8638_v42  ;;  %v6661_v58 = vpop.eup %6660  ;;  %5398 = vmatmul.mubr.f32.gmra.mrb[20].mxu0 %v2083_v15  ;;  %v1028_v15 = vld [vmem:[%s9318_s6 + $0x10] sm:$0xff] }
 0x53e   : > { %v6663_v40 = vpop.eup %6662  ;;  %v2055_v57 = vpop.xlane.xlu1 %2054  ;;  %v2084_v61 = vmul.f32 %v6661_v58, %v8480_v30  ;;  %9577 = vst [vmem:[#allocation95_spill] sm:$0xff] %v8698_v1  ;;  %v1029_v58 = vld [vmem:[%s9318_s6 + $0x18] sm:$0xff] }
 0x53f   : > { %v2057_v2 = vpop.xlane.xlu0 %2056  ;;  %6676 = vrcp.f32 %v2055_v57  ;;  %3112 = vadd.xlane.f32.xlu0 %v8635_v50  ;;  %3126 = vadd.xlane.f32.xlu1 %v8638_v42  ;;  %v2085_v12 = vmul.f32 %v6663_v40, %v8482_v47  ;;  %v8644_v0 = vpop.eup %6664  ;;  %v5919_v40 = vpack.c.bf16 %v1029_v58, %v1028_v15  ;;  %v3072_v15 = vsub.f32 %v9595_v22, %v8558_v24  ;;  %v9596_v58 = vld [vmem:[#allocation97_spill] sm:$0xff] }
 0x540   : > { %9556 = vst [vmem:[#allocation32_spill] sm:$0xff] %v8644_v0  ;;  %6678 = vrcp.f32 %v2057_v2  ;;  %5400 = vmatprep.mubr.f32.mxu0 %v2084_v61  ;;  %v9578_v2 = vld [vmem:[#allocation52_spill] sm:$0xff] }
 0x541   : > { %v6667_v3 = vpop.eup %6666  ;;  %5401 = vmatmul.mubr.f32.gmra.mrb[22].mxu0 %v2085_v12  ;;  %v9579_v61 = vld [vmem:[#allocation88_spill] sm:$0xff]  ;;  %5920 = vmatprep.subr.bf16.mxu0 %v5919_v40 }
 0x542   : > { %v6669_v11 = vpop.eup %6668  ;;  %v2086_v49 = vmul.f32 %v6667_v3, %v8486_v5  ;;  %v8711_v12 = vadd.f32 %v9579_v61, %v9578_v2  ;;  %5922 = vmatpush3.bf16.msra.mxu0 %v5919_v40  ;;  %v1026_v3 = vld [vmem:[%s9318_s6] sm:$0xff]  ;;  %v3102_v61 = vmul.f32 1.442695, %v3072_v15 }
 0x543   : > { %3116 = vadd.xlane.f32.xlu0 %v8644_v0  ;;  %v2087_v30 = vmul.f32 %v6669_v11, %v8488_v51  ;;  %v8649_v33 = vpop.eup %6670  ;;  %v1027_v11 = vld [vmem:[%s9318_s6 + $0x8] sm:$0xff]  ;;  %v9597_v40 = vld [vmem:[#allocation74_spill] sm:$0xff] }
 0x544   : > { %9557 = vst [vmem:[#allocation29_spill] sm:$0xff] %v8649_v33  ;;  %5403 = vmatprep.mubr.f32.mxu0 %v2086_v49  ;;  %v8720_v49 = vpack.c.bf16 %v1027_v11, %v1026_v3  ;;  %v3073_v2 = vsub.f32 %v9597_v40, %v9596_v58  ;;  %v9610_v40 = vld [vmem:[#allocation45_spill] sm:$0xff] }
 0x545   : > { %v6673_v55 = vpop.eup %6672  ;;  %5404 = vmatmul.mubr.f32.gmra.mrb[24].mxu0 %v2087_v30  ;;  %v9581_v30 = vld [vmem:[#allocation54_spill] sm:$0xff] }
 0x546   : > { %v6675_v8 = vpop.eup %6674  ;;  %v2088_v47 = vmul.f32 %v6673_v55, %v8492_v44  ;;  %v9561_v44 = vld [vmem:[#allocation7_spill] sm:$0xff]  ;;  %v9582_v55 = vld [vmem:[#allocation90_spill] sm:$0xff]  ;;  %5924 = vmatprep.subr.bf16.mxu0 %v8720_v49  ;;  %v3104_v3 = vmul.f32 1.442695, %v3073_v2  ;;  %v9611_v2 = vld [vmem:[#allocation81_spill] sm:$0xff] }
 0x547   : > { %3120 = vadd.xlane.f32.xlu0 %v8649_v33  ;;  %v2089_v60 = vmul.f32 %v6675_v8, %v8494_v37  ;;  %v8662_v37 = vpop.permute.xlu0 %1617  ;;  %v8724_v8 = vadd.f32 %v9582_v55, %v9581_v30 }
 0x548   : > { %5406 = vmatprep.mubr.f32.mxu0 %v2088_v47 }
 0x549   : > { %v6677_v54 = vpop.eup %6676  ;;  %5407 = vmatmul.mubr.f32.gmra.mrb[26].mxu0 %v2089_v60  ;;  %9583 = vst [vmem:[#allocation93_spill] sm:$0xff] %v8724_v8 }
 0x54a   : > { %v6679_v5 = vpop.eup %6678  ;;  %v2090_v59 = vmul.f32 %v6677_v54, %v8498_v41  ;;  %v9564_v41 = vld [vmem:[#allocation72_spill] sm:$0xff] }
 0x54b   : > { %v2091_v51 = vmul.f32 %v6679_v5, %v9558_v43  ;;  %v3071_v29 = vsub.f32 %v9564_v41, %v9563_v21  ;;  %v8668_v26 = vpop.permute.xlu0 %6366  ;;  %9580 = vst [vmem:[#allocation72_spill] sm:$0xff] %v8711_v12  ;;  %v9584_v5 = vld [vmem:[#allocation8_spill] sm:$0xff]  ;;  %v9586_v43 = vld [vmem:[#allocation10_spill] sm:$0xff] }
 0x54c   : > { %5409 = vmatprep.mubr.f32.mxu0 %v2090_v59  ;;  %v9585_v59 = vld [vmem:[#allocation24_spill] sm:$0xff]  ;;  %v6369_v50 = vunpack.i.h.bf16 %v8668_v26 }
 0x54d   : > { %5410 = vmatmul.mubr.f32.gmra.mrb[28].mxu0 %v2091_v51  ;;  %v3100_v6 = vmul.f32 1.442695, %v3071_v29  ;;  %v9587_v29 = vld [vmem:[#allocation2_spill] sm:$0xff] }
 0x54f   : > { %6680 = vpow2.f32 %v3100_v6  ;;  %v8672_v23 = vpop.permute.xlu0 %1621 }
 0x550   : > { %1643 = vrot.lane.b32.xlu1 %v9559_v38, %s6801_s14  ;;  %6682 = vpow2.f32 %v3092_v10  ;;  %v3069_v10 = vsub.f32 %v9590_v56, %v9589_v28  ;;  %v9606_v56 = vld [vmem:[#allocation44_spill] sm:$0xff] }
 0x552   : > { %v3096_v35 = vmul.f32 1.442695, %v3069_v10  ;;  %v9607_v10 = vld [vmem:[#allocation79_spill] sm:$0xff] }
 0x553   : > { %v8674_v14 = vpop.permute.xlu0 %6371 }
 0x554   : > { %6396 = vrot.lane.b32.xlu1 %v9560_v52, %s6805_s18 }
 0x557   : > { %v8679_v48 = vpop.permute.xlu0 %1625 }
 0x559   : > { %v8676_v17 = vpop.eup %6680 }
 0x55a   : > { %9567 = vst [vmem:[#allocation33_spill] sm:$0xff] %v8676_v17  ;;  %v8690_v19 = vpop.eup %6682 }
 0x55b   : > { %9574 = vst [vmem:[#allocation92_spill] sm:$0xff] %v8690_v19  ;;  %v8692_v16 = vpop.permute.xlu0 %6376 }
 0x55d   : > { %6386 = vrot.lane.b32.xlu0 %v9561_v44, %s6805_s18  ;;  %v9628_v44 = vld [vmem:[#allocation55_spill] sm:$0xff] }
 0x55f   : > { %v8707_v57 = vpop.permute.xlu0 %1629 }
 0x561   : > { %1637 = vrot.lane.b32.xlu0 %v9562_v62, %s6801_s14 }
 0x563   : > { %v8727_v47 = vpop.permute.xlu0 %6381 }
 0x578   : > { %3132 = vadd.xlane.f32.xlu1 %v8676_v17 }
 0x57c   : > { %3923 = vmax.xlane.f32.xlu1 %v8683_v4 }
 0x580   : > { %3124 = vadd.xlane.f32.xlu0 %v8690_v19  ;;  %3927 = vmax.xlane.f32.xlu1 %v8688_v53  ;;  %v9629_v53 = vld [vmem:[#allocation91_spill] sm:$0xff] }
 0x584   : > { %3931 = vmax.xlane.f32.xlu1 %v8698_v1 }
 0x588   : > { %3935 = vmax.xlane.f32.xlu1 %v8711_v12 }
 0x58c   : > { %3939 = vmax.xlane.f32.xlu1 %v8724_v8 }
 0x58f   : > { %v2061_v60 = vpop.xlane.xlu0 %2060 }
 0x590   : > { %6684 = vrcp.f32 %v2061_v60  ;;  %v9602_v60 = vld [vmem:[#allocation41_spill] sm:$0xff] }
 0x593   : > { %v2059_v54 = vpop.xlane.xlu0 %2058 }
 0x594   : > { %6686 = vrcp.f32 %v2059_v54  ;;  %v9603_v54 = vld [vmem:[#allocation77_spill] sm:$0xff] }
 0x595   : > { %6688 = vpow2.f32 %v3096_v35 }
 0x596   : > { %6391 = vrot.lane.b32.xlu0 %v9584_v5, %s6805_s18 }
 0x59a   : > { %1641 = vrot.lane.b32.xlu0 %v9585_v59, %s6801_s14  ;;  %v6685_v51 = vpop.eup %6684 }
 0x59b   : > { %v2093_v6 = vmul.f32 %v6685_v51, %v8580_v63  ;;  %v8768_v51 = vadd.f32 %v9603_v54, %v9602_v60  ;;  %v9614_v60 = vld [vmem:[#allocation80_spill] sm:$0xff] }
 0x59d   : > { %3365 = vrot.lane.b32.xlu1 %v9586_v43, %s6804_s17 }
 0x59e   : > { %v6687_v21 = vpop.eup %6686 }
 0x59f   : > { %v2092_v41 = vmul.f32 %v6687_v21, %v8575_v36  ;;  %v3070_v36 = vsub.f32 %v9593_v13, %v9592_v31  ;;  %v8754_v11 = vpop.eup %6688  ;;  %v9604_v21 = vld [vmem:[#allocation40_spill] sm:$0xff]  ;;  %v9608_v13 = vld [vmem:[#allocation42_spill] sm:$0xff] }
 0x5a0   : > { %9598 = vst [vmem:[#allocation70_spill] sm:$0xff] %v8754_v11 }
 0x5a1   : > { %6401 = vrot.lane.b32.xlu1 %v9587_v29, %s6807_s20  ;;  %5412 = vmatprep.mubr.f32.mxu0 %v2092_v41  ;;  %v3098_v63 = vmul.f32 1.442695, %v3070_v36  ;;  %v9605_v41 = vld [vmem:[#allocation76_spill] sm:$0xff]  ;;  %v9609_v36 = vld [vmem:[#allocation78_spill] sm:$0xff] }
 0x5a2   : > { %5413 = vmatmul.mubr.f32.gmra.mrb[30].mxu0 %v2093_v6  ;;  %v8773_v29 = vadd.f32 %v9605_v41, %v9604_v21  ;;  %v1634_v6 = vpop.permute.xlu0 %1633 }
 0x5a3   : > { %6690 = vpow2.f32 %v3098_v63  ;;  %v8789_v63 = vadd.f32 %v9609_v36, %v9608_v13  ;;  %v9617_v13 = vld [vmem:[#allocation83_spill] sm:$0xff] }
 0x5a4   : > { %6692 = vpow2.f32 %v3102_v61  ;;  %v8800_v61 = vadd.f32 %v9611_v2, %v9610_v40 }
 0x5a5   : > { %3367 = vrot.lane.b32.xlu1 %v9588_v27, %s6804_s17  ;;  %6694 = vpow2.f32 %v3104_v3  ;;  %v9613_v3 = vld [vmem:[#allocation43_spill] sm:$0xff]  ;;  %v9620_v27 = vld [vmem:[#allocation85_spill] sm:$0xff] }
 0x5a6   : > { %9612 = vst [vmem:[#allocation84_spill] sm:$0xff] %v8800_v61  ;;  %v8805_v54 = vadd.f32 %v9614_v60, %v9613_v3  ;;  %v9619_v60 = vld [vmem:[#allocation47_spill] sm:$0xff] }
 0x5a8   : > { %9615 = vst [vmem:[#allocation49_spill] sm:$0xff] %v8805_v54 }
 0x5a9   : > { %6406 = vrot.lane.b32.xlu1 %v9591_v9, %s6807_s20  ;;  %v8780_v9 = vadd.f32 %v9607_v10, %v9606_v56  ;;  %v9616_v10 = vld [vmem:[#allocation48_spill] sm:$0xff] }
 0x5aa   : > { %v8816_v36 = vadd.f32 %v9617_v13, %v9616_v10  ;;  %v9622_v10 = vld [vmem:[#allocation51_spill] sm:$0xff] }
 0x5ab   : > { %v9623_v13 = vld [vmem:[#allocation87_spill] sm:$0xff] }
 0x5ac   : > { %9618 = vst [vmem:[#allocation86_spill] sm:$0xff] %v8816_v36  ;;  %v8836_v52 = vadd.f32 %v9623_v13, %v9622_v10 }
 0x5ad   : > { %3371 = vrot.lane.b32.xlu1 %v9594_v32, %s6804_s17  ;;  %v8757_v30 = vpop.eup %6690  ;;  %v8827_v32 = vadd.f32 %v9620_v27, %v9619_v60  ;;  %v9625_v27 = vld [vmem:[#allocation53_spill] sm:$0xff] }
 0x5ae   : > { %9599 = vst [vmem:[#allocation46_spill] sm:$0xff] %v8757_v30  ;;  %v8760_v55 = vpop.eup %6692  ;;  %9624 = vst [vmem:[#allocation88_spill] sm:$0xff] %v8836_v52  ;;  %v9626_v60 = vld [vmem:[#allocation89_spill] sm:$0xff] }
 0x5af   : > { %9600 = vst [vmem:[#allocation82_spill] sm:$0xff] %v8760_v55  ;;  %v8763_v24 = vpop.eup %6694  ;;  %9621 = vst [vmem:[#allocation52_spill] sm:$0xff] %v8827_v32  ;;  %v8847_v5 = vadd.f32 %v9626_v60, %v9625_v27 }
 0x5b0   : > { %9601 = vst [vmem:[#allocation50_spill] sm:$0xff] %v8763_v24 }
 0x5b1   : > { %9627 = vst [vmem:[#allocation54_spill] sm:$0xff] %v8847_v5 }
 0x5b9   : > { %3128 = vadd.xlane.f32.xlu0 %v8754_v11 }
 0x5bd   : > { %3130 = vadd.xlane.f32.xlu0 %v8757_v30 }
 0x5c1   : > { %3134 = vadd.xlane.f32.xlu0 %v8760_v55  ;;  %v9640_v55 = vld [vmem:[#allocation60_spill] sm:$0xff] }
 0x5c5   : > { %3136 = vadd.xlane.f32.xlu0 %v8763_v24 }
 0x5c8   : > { %v8782_v35 = vpop.xlane.xlu0 %3108 }
 0x5c9   : > { %3909 = vmax.xlane.f32.xlu0 %v8768_v51 }
 0x5cc   : > { %v8776_v28 = vpop.f32.mrb[0].mxu0  ;;  %v8791_v22 = vpop.xlane.xlu0 %3112 }
 0x5cd   : > { %3911 = vmax.xlane.f32.xlu0 %v8773_v29  ;;  %v8784_v31 = vpop.f32.mrb[1].mxu0 }
 0x5d0   : > { %v8807_v21 = vpop.xlane.xlu0 %3116 }
 0x5d1   : > { %3913 = vmax.xlane.f32.xlu0 %v8780_v9 }
 0x5d4   : > { %v8794_v15 = vpop.f32.mrb[2].mxu0  ;;  %v8820_v2 = vpop.xlane.xlu0 %3120 }
 0x5d5   : > { %3915 = vmax.xlane.f32.xlu0 %v8789_v63  ;;  %v8796_v58 = vpop.f32.mrb[3].mxu0 }
 0x5d8   : > { %v8838_v38 = vpop.permute.xlu0 %6386 }
 0x5d9   : > { %3917 = vmax.xlane.f32.xlu0 %v8800_v61 }
 0x5dc   : > { %v8809_v41 = vpop.f32.mrb[4].mxu0  ;;  %v1638_v62 = vpop.permute.xlu0 %1637 }
 0x5dd   : > { %3919 = vmax.xlane.f32.xlu0 %v8805_v54  ;;  %v8812_v56 = vpop.f32.mrb[5].mxu0 }
 0x5e0   : > { %v8818_v40 = vpop.f32.mrb[6].mxu0 }
 0x5e1   : > { %3921 = vmax.xlane.f32.xlu0 %v8816_v36  ;;  %v8823_v3 = vpop.f32.mrb[7].mxu0 }
 0x5e4   : > { %v8829_v43 = vpop.f32.mrb[8].mxu0 }
 0x5e5   : > { %3925 = vmax.xlane.f32.xlu0 %v8827_v32  ;;  %v8832_v12 = vpop.f32.mrb[9].mxu0  ;;  %v8856_v32 = vadd.f32 %v9629_v53, %v9628_v44 }
 0x5e7   : > { %9630 = vst [vmem:[#allocation90_spill] sm:$0xff] %v8856_v32 }
 0x5e8   : > { %v8840_v8 = vpop.f32.mrb[10].mxu0 }
 0x5e9   : > { %3929 = vmax.xlane.f32.xlu0 %v8836_v52  ;;  %v1568_v1 = vpop.f32.mrb[11].mxu0  ;;  %v6362_v52 = vpop.permute.xlu1 %6361 }
 0x5ea   : > { %v8843_v59 = vmul.f32 %v1634_v6, %v1568_v1  ;;  %v6364_v60 = vunpack.i.h.bf16 %v6362_v52  ;;  %v6363_v4 = vunpack.i.l.bf16 %v6362_v52  ;;  %v9634_v52 = vld [vmem:[#allocation15_spill] sm:$0xff] }
 0x5ec   : > { %v8849_v7 = vpop.f32.mrb[12].mxu0  ;;  %v8867_v44 = vpack.c.bf16 %v6364_v60, %v6363_v4 }
 0x5ed   : > { %3933 = vmax.xlane.f32.xlu0 %v8847_v5  ;;  %v1578_v10 = vpop.f32.mrb[13].mxu0  ;;  %v9632_v5 = vld [vmem:[#allocation34_spill] sm:$0xff] }
 0x5ee   : > { %v8852_v13 = vmul.f32 %v1638_v62, %v1578_v10  ;;  %v9633_v62 = vld [vmem:[#allocation13_spill] sm:$0xff] }
 0x5f1   : > { %3937 = vmax.xlane.f32.xlu0 %v8856_v32  ;;  %v9638_v32 = vld [vmem:[#allocation59_spill] sm:$0xff] }
 0x5f4   : > { %v8859_v1 = vpop.f32.mrb[14].mxu0 }
 0x5f5   : > { %v1588_v6 = vpop.f32.mrb[15].mxu0 }
 0x604   : > { %v5393_v27 = vpop.f32.mrb[16].mxu0 }
 0x605   : > { %v2224_v36 = vpop.f32.mrb[17].mxu0  ;;  %v2352_v61 = vmul.f32 %v5393_v27, %v9632_v5  ;;  %v9636_v27 = vld [vmem:[#allocation58_spill] sm:$0xff] }
 0x606   : > { %v2351_v54 = vmul.f32 %v9631_v18, %v2224_v36  ;;  %v9635_v36 = vld [vmem:[#allocation35_spill] sm:$0xff] }
 0x607   : > { %3363 = vrot.lane.b32.xlu0 %v9633_v62, %s6804_s17 }
 0x608   : > { %5419 = vmatprep.mubr.msk.f32.mxu0 %vm1082_vm1, %v2351_v54 }
 0x609   : > { %5420 = vmatmul.mubr.msk.f32.vlgmr.msra.gmra.mrb[32].mxu0 %vm1082_vm1, %v2352_v61 }
 0x60a   : > { %5926 = vmatpush3.bf16.msra.mxu0 %v8720_v49  ;;  %v9637_v49 = vld [vmem:[#allocation36_spill] sm:$0xff] }
 0x60b   : > { %5976 = vmatprep.subr.bf16.mxu0 %v8867_v44  ;;  %3369 = vrot.lane.b32.xlu0 %v9634_v52, %s6804_s17 }
 0x60c   : > { %v5396_v53 = vpop.f32.mrb[18].mxu0 }
 0x60d   : > { %v2234_v18 = vpop.f32.mrb[19].mxu0  ;;  %v8874_v10 = vpop.xlane.xlu0 %3124  ;;  %v2354_v62 = vmul.f32 %v5396_v53, %v9636_v27 }
 0x60e   : > { %v2353_v5 = vmul.f32 %v9635_v36, %v2234_v18  ;;  %v9639_v36 = vld [vmem:[#allocation37_spill] sm:$0xff] }
 0x610   : > { %v5399_v54 = vpop.f32.mrb[20].mxu0  ;;  %5422 = vmatprep.mubr.msk.f32.mxu0 %vm1082_vm1, %v2353_v5 }
 0x611   : > { %v2244_v4 = vpop.f32.mrb[21].mxu0  ;;  %5423 = vmatmul.mubr.msk.f32.gmra.mrb[34].mxu0 %vm1082_vm1, %v2354_v62  ;;  %v8880_v60 = vpop.permute.xlu0 %6391  ;;  %v2356_v52 = vmul.f32 %v5399_v54, %v9638_v32  ;;  %v9641_v32 = vld [vmem:[#allocation38_spill] sm:$0xff] }
 0x612   : > { %v2355_v61 = vmul.f32 %v9637_v49, %v2244_v4  ;;  %v9642_v49 = vld [vmem:[#allocation62_spill] sm:$0xff] }
 0x614   : > { %v5402_v24 = vpop.f32.mrb[22].mxu0  ;;  %5425 = vmatprep.mubr.msk.f32.mxu0 %vm1082_vm1, %v2355_v61 }
 0x615   : > { %v2254_v18 = vpop.f32.mrb[23].mxu0  ;;  %5426 = vmatmul.mubr.msk.f32.gmra.mrb[36].mxu0 %vm1082_vm1, %v2356_v52  ;;  %v1642_v27 = vpop.permute.xlu0 %1641  ;;  %v2358_v5 = vmul.f32 %v5402_v24, %v9640_v55  ;;  %v9644_v24 = vld [vmem:[#allocation64_spill] sm:$0xff] }
 0x616   : > { %v2357_v53 = vmul.f32 %v9639_v36, %v2254_v18  ;;  %v8887_v17 = vmul.f32 %v1642_v27, %v1588_v6  ;;  %v9643_v18 = vld [vmem:[#allocation63_spill] sm:$0xff]  ;;  %v8897_v36 = vpop.permute.xlu1 %1619 }
 0x618   : > { %v5405_v62 = vpop.f32.mrb[24].mxu0  ;;  %5428 = vmatprep.mubr.msk.f32.mxu0 %vm1082_vm1, %v2357_v53 }
 0x619   : > { %v2264_v4 = vpop.f32.mrb[25].mxu0  ;;  %5429 = vmatmul.mubr.msk.f32.gmra.mrb[38].mxu0 %vm1082_vm1, %v2358_v5  ;;  %v2360_v61 = vmul.f32 %v5405_v62, %v9642_v49  ;;  %v9645_v5 = vld [vmem:[#allocation65_spill] sm:$0xff] }
 0x61a   : > { %v2359_v54 = vmul.f32 %v9641_v32, %v2264_v4  ;;  %v9646_v4 = vld [vmem:[#allocation66_spill] sm:$0xff] }
 0x61c   : > { %v5408_v30 = vpop.f32.mrb[26].mxu0  ;;  %5431 = vmatprep.mubr.msk.f32.mxu0 %vm1082_vm1, %v2359_v54  ;;  %v8905_v54 = vpop.permute.xlu1 %1623 }
 0x61d   : > { %v2274_v52 = vpop.f32.mrb[27].mxu0  ;;  %5432 = vmatmul.mubr.msk.f32.gmra.mrb[40].mxu0 %vm1082_vm1, %v2360_v61  ;;  %v2362_v6 = vmul.f32 %v5408_v30, %v9644_v24 }
 0x61e   : > { %v2361_v55 = vmul.f32 %v9643_v18, %v2274_v52 }
 0x620   : > { %v5411_v53 = vpop.f32.mrb[28].mxu0  ;;  %5434 = vmatprep.mubr.msk.f32.mxu0 %vm1082_vm1, %v2361_v55  ;;  %v8907_v49 = vpop.permute.xlu1 %1627 }
 0x621   : > { %v2284_v27 = vpop.f32.mrb[29].mxu0  ;;  %5435 = vmatmul.mubr.msk.f32.gmra.mrb[42].mxu0 %vm1082_vm1, %v2362_v6  ;;  %v2364_v32 = vmul.f32 %v5411_v53, %v9646_v4 }
 0x622   : > { %v2363_v62 = vmul.f32 %v9645_v5, %v2284_v27 }
 0x624   : > { %5437 = vmatprep.mubr.msk.f32.mxu0 %vm1082_vm1, %v2363_v62  ;;  %v8909_v30 = vpop.permute.xlu1 %1631 }
 0x625   : > { %5438 = vmatmul.mubr.msk.f32.gmra.mrb[44].mxu0 %vm1082_vm1, %v2364_v32 }
 0x628   : > { %v8911_v61 = vpop.permute.xlu1 %1635 }
 0x62c   : > { %v8913_v52 = vpop.xlane.xlu1 %3106 }
 0x630   : > { %v8915_v18 = vpop.xlane.xlu1 %3110 }
 0x634   : > { %v8919_v24 = vpop.xlane.xlu1 %3114 }
 0x638   : > { %v8923_v53 = vpop.xlane.xlu1 %3118 }
 0x63c   : > { %v8929_v62 = vpop.xlane.xlu1 %3122 }
 0x640   : > { %v8932_v42 = vpop.permute.xlu1 %1639 }
 0x644   : > { %v8935_v39 = vpop.xlane.xlu1 %3126 }
 0x646   : > { %v8917_v55 = vpop.xlane.xlu0 %3128 }
 0x647   : > { %9647 = vst [vmem:[#allocation2_spill] sm:$0xff] %v8917_v55  ;;  %v9656_v55 = vld [vmem:[#allocation39_spill] sm:$0xff] }
 0x648   : > { %v8937_v0 = vpop.permute.xlu1 %1643  ;;  %v1661_v20 = vmul.f32 %v9656_v55, %v8784_v31  ;;  %v1663_v55 = vmul.f32 %v8662_v37, %v8796_v58  ;;  %v1665_v37 = vmul.f32 %v8672_v23, %v8812_v56  ;;  %v6378_v58 = vunpack.i.l.bf16 %v8692_v16 }
 0x649   : > { %v6384_v23 = vunpack.i.h.bf16 %v8727_v47 }
 0x64a   : > { %v8921_v6 = vpop.xlane.xlu0 %3130 }
 0x64b   : > { %9648 = vst [vmem:[#allocation94_spill] sm:$0xff] %v8921_v6 }
 0x64e   : > { %v8925_v27 = vpop.xlane.xlu0 %3134 }
 0x64f   : > { %9649 = vst [vmem:[#allocation71_spill] sm:$0xff] %v8925_v27 }
 0x652   : > { %v8927_v5 = vpop.xlane.xlu0 %3136 }
 0x653   : > { %9650 = vst [vmem:[#allocation3_spill] sm:$0xff] %v8927_v5 }
 0x656   : > { %v3910_v4 = vpop.xlane.xlu0 %3909 }
 0x657   : > { %v3941_v32 = vsub.f32 %v8768_v51, %v3910_v4  ;;  %v8944_v51 = vpop.permute.xlu1 %6396 }
 0x659   : > { %v3957_v11 = vmul.f32 1.442695, %v3941_v32  ;;  %v9655_v32 = vld [vmem:[#allocation69_spill] sm:$0xff] }
 0x65a   : > { %v3912_v19 = vpop.xlane.xlu0 %3911 }
 0x65b   : > { %6696 = vpow2.f32 %v3957_v11  ;;  %v3942_v45 = vsub.f32 %v8773_v29, %v3912_v19  ;;  %v8947_v4 = vpop.xlane.xlu1 %3132  ;;  %v9654_v29 = vld [vmem:[#allocation68_spill] sm:$0xff] }
 0x65d   : > { %v3959_v33 = vmul.f32 1.442695, %v3942_v45 }
 0x65f   : > { %6698 = vpow2.f32 %v3959_v33  ;;  %v8949_v11 = vpop.xlane.xlu1 %3923 }
 0x660   : > { %9653 = vst [vmem:[#allocation75_spill] sm:$0xff] %v8949_v11  ;;  %v9657_v11 = vld [vmem:[#allocation4_spill] sm:$0xff]  ;;  %6700 = vrcp.f32 %v8913_v52 }
 0x661   : > { %6702 = vrcp.f32 %v8782_v35 }
 0x665   : > { %v8939_v27 = vpop.eup %6696 }
 0x666   : > { %9651 = vst [vmem:[#allocation96_spill] sm:$0xff] %v8939_v27  ;;  %3989 = vadd.xlane.f32.xlu0 %v8939_v27  ;;  %v8955_v27 = vpop.xlane.xlu1 %3927 }
 0x669   : > { %v8942_v5 = vpop.eup %6698 }
 0x66a   : > { %9652 = vst [vmem:[#allocation73_spill] sm:$0xff] %v8942_v5  ;;  %3991 = vadd.xlane.f32.xlu1 %v8942_v5  ;;  %v6368_v5 = vunpack.i.l.bf16 %v8668_v26  ;;  %v6373_v26 = vunpack.i.l.bf16 %v8674_v14 }
 0x675   : > { %v5414_v45 = vpop.f32.mrb[30].mxu0 }
 0x676   : > { %v2294_v19 = vpop.f32.mrb[31].mxu0  ;;  %v2366_v6 = vmul.f32 %v5414_v45, %v9655_v32  ;;  %v9658_v45 = vld [vmem:[#allocation17_spill] sm:$0xff] }
 0x677   : > { %v2365_v33 = vmul.f32 %v9654_v29, %v2294_v19  ;;  %v9659_v19 = vld [vmem:[#allocation61_spill] sm:$0xff]  ;;  %v6374_v29 = vunpack.i.h.bf16 %v8674_v14  ;;  %v6379_v14 = vunpack.i.h.bf16 %v8692_v16  ;;  %v6383_v16 = vunpack.i.l.bf16 %v8727_v47 }
 0x678   : > { %v1662_v31 = vmul.f32 %v8776_v28, %v9659_v19  ;;  %v1664_v28 = vmul.f32 %v8794_v15, %v8897_v36  ;;  %v1667_v15 = vmul.f32 %v8679_v48, %v8823_v3  ;;  %v1669_v48 = vmul.f32 %v8707_v57, %v8832_v12 }
 0x679   : > { %5440 = vmatprep.mubr.msk.f32.mxu0 %vm1082_vm1, %v2365_v33  ;;  %v5987_v56 = vpack.c.bf16 %v6379_v14, %v6378_v58  ;;  %v6389_v3 = vunpack.i.h.bf16 %v8838_v38  ;;  %v5991_v47 = vpack.c.bf16 %v6384_v23, %v6383_v16  ;;  %v6393_v12 = vunpack.i.l.bf16 %v8880_v60  ;;  %v9665_v14 = vld [vmem:[#allocation32_spill] sm:$0xff]  ;;  %v9668_v23 = vld [vmem:[#allocation29_spill] sm:$0xff] }
 0x67a   : > { %5441 = vmatmul.mubr.msk.f32.gmra.mrb[46].mxu0 %vm1082_vm1, %v2366_v6  ;;  %v9660_v6 = vld [vmem:[#allocation14_spill] sm:$0xff] }
 0x67b   : > { %6411 = vrot.lane.b32.xlu1 %v9657_v11, %s6807_s20  ;;  %5447 = vmatprep.mubr.msk.f32.mxu0 %vm1082_vm1, %v1661_v20  ;;  %v5979_v11 = vpack.c.bf16 %v6369_v50, %v6368_v5  ;;  %v8975_v20 = vpop.xlane.xlu1 %3931  ;;  %v5983_v50 = vpack.c.bf16 %v6374_v29, %v6373_v26  ;;  %v3914_v5 = vpop.xlane.xlu0 %3913 }
 0x67c   : > { %3373 = vrot.lane.b32.xlu0 %v9658_v45, %s6804_s17  ;;  %v3943_v33 = vsub.f32 %v8780_v9, %v3914_v5 }
 0x67e   : > { %5448 = vmatmul.mubr.msk.f32.vlgmr.msra.gmra.mrb[32].mxu0 %vm1082_vm1, %v1662_v31  ;;  %v3961_v9 = vmul.f32 1.442695, %v3943_v33  ;;  %v9669_v33 = vld [vmem:[#allocation31_spill] sm:$0xff] }
 0x67f   : > { %3375 = vrot.lane.b32.xlu1 %v9660_v6, %s6804_s17  ;;  %5978 = vmatpush3.bf16.msra.mxu0 %v8867_v44  ;;  %v1666_v44 = vmul.f32 %v8809_v41, %v8905_v54  ;;  %v8991_v36 = vpop.xlane.xlu1 %3935  ;;  %v1668_v41 = vmul.f32 %v8818_v40, %v8907_v49  ;;  %v6388_v54 = vunpack.i.l.bf16 %v8838_v38  ;;  %v1670_v40 = vmul.f32 %v8829_v43, %v8909_v30  ;;  %v3916_v49 = vpop.xlane.xlu0 %3915 }
 0x680   : > { %5450 = vmatprep.mubr.msk.f32.mxu0 %vm1082_vm1, %v1663_v55  ;;  %5980 = vmatprep.subr.bf16.mxu0 %v5979_v11  ;;  %v6394_v38 = vunpack.i.h.bf16 %v8880_v60  ;;  %6704 = vpow2.f32 %v3961_v9  ;;  %v3944_v19 = vsub.f32 %v8789_v63, %v3916_v49  ;;  %v1672_v43 = vmul.f32 %v8840_v8, %v8911_v61  ;;  %v1031_v61 = vld [vmem:[%s9318_s6 + $0x28] sm:$0xff] }
 0x681   : > { %v5995_v57 = vpack.c.bf16 %v6389_v3, %v6388_v54  ;;  %6706 = vrcp.f32 %v8915_v18  ;;  %v6399_v30 = vunpack.i.h.bf16 %v8944_v51  ;;  %v6398_v60 = vunpack.i.l.bf16 %v8944_v51  ;;  %v9670_v3 = vld [vmem:[#allocation3_spill] sm:$0xff]  ;;  %v9671_v54 = vld [vmem:[#allocation92_spill] sm:$0xff] }
 0x682   : > { %5451 = vmatmul.mubr.msk.f32.gmra.mrb[34].mxu0 %vm1082_vm1, %v1664_v28  ;;  %v5999_v52 = vpack.c.bf16 %v6394_v38, %v6393_v12  ;;  %6708 = vrcp.f32 %v8791_v22  ;;  %v3963_v63 = vmul.f32 1.442695, %v3944_v19  ;;  %v1674_v8 = vmul.f32 %v8849_v7, %v8932_v42  ;;  %v6701_v22 = vpop.eup %6700  ;;  %v9674_v38 = vld [vmem:[#allocation70_spill] sm:$0xff] }
 0x683   : > { %5982 = vmatpush3.bf16.msra.mxu0 %v5979_v11  ;;  %5453 = vmatprep.mubr.msk.f32.mxu0 %vm1082_vm1, %v1665_v37  ;;  %v9005_v32 = vpop.xlane.xlu1 %3939  ;;  %6710 = vrcp.f32 %v8919_v24  ;;  %v6003_v18 = vpack.c.bf16 %v6399_v30, %v6398_v60  ;;  %v6703_v7 = vpop.eup %6702  ;;  %v1676_v42 = vmul.f32 %v8859_v1, %v8937_v0  ;;  %v9662_v11 = vld [vmem:[#allocation57_spill] sm:$0xff]  ;;  %v9663_v37 = vld [vmem:[#allocation2_spill] sm:$0xff] }
 0x684   : > { %5984 = vmatprep.subr.bf16.mxu0 %v5983_v50  ;;  %6712 = vrcp.f32 %v8807_v21  ;;  %v3154_v21 = vmul.f32 %v6701_v22, %v8564_v46  ;;  %v3155_v0 = vmul.f32 %v6703_v7, %v8632_v34 }
 0x685   : > { %6714 = vpow2.f32 %v3963_v63  ;;  %v9677_v63 = vld [vmem:[#allocation33_spill] sm:$0xff] }
 0x686   : > { %5454 = vmatmul.mubr.msk.f32.gmra.mrb[36].mxu0 %vm1082_vm1, %v1666_v44  ;;  %6716 = vrcp.f32 %v8923_v53 }
 0x687   : > { %5986 = vmatpush3.bf16.msra.mxu0 %v5983_v50  ;;  %5456 = vmatprep.mubr.msk.f32.mxu0 %vm1082_vm1, %v1667_v15  ;;  %v9021_v35 = vpop.permute.xlu1 %3365  ;;  %6718 = vrcp.f32 %v8820_v2  ;;  %v9661_v2 = vld [vmem:[#allocation26_spill] sm:$0xff]  ;;  %v9666_v50 = vld [vmem:[#allocation27_spill] sm:$0xff] }
 0x688   : > { %5988 = vmatprep.subr.bf16.mxu0 %v5987_v56  ;;  %6720 = vrcp.f32 %v8929_v62  ;;  %v9667_v15 = vld [vmem:[#allocation71_spill] sm:$0xff] }
 0x689   : > { %6722 = vrcp.f32 %v8874_v10  ;;  %v9664_v10 = vld [vmem:[#allocation94_spill] sm:$0xff] }
 0x68a   : > { %5457 = vmatmul.mubr.msk.f32.gmra.mrb[38].mxu0 %vm1082_vm1, %v1668_v41  ;;  %v9045_v51 = vpop.eup %6704  ;;  %6724 = vrcp.f32 %v8935_v39 }
 0x68b   : > { %5990 = vmatpush3.bf16.msra.mxu0 %v5987_v56  ;;  %5459 = vmatprep.mubr.msk.f32.mxu0 %vm1082_vm1, %v1669_v48  ;;  %v6707_v31 = vpop.eup %6706  ;;  %6726 = vrcp.f32 %v9663_v37 }
 0x68c   : > { %5992 = vmatprep.subr.bf16.mxu0 %v5991_v47  ;;  %v3156_v1 = vmul.f32 %v6707_v31, %v8570_v25  ;;  %6728 = vrcp.f32 %v9664_v10  ;;  %v9687_v10 = vld [vmem:[#allocation75_spill] sm:$0xff] }
 0x68d   : > { %6730 = vrcp.f32 %v8947_v4  ;;  %v9673_v4 = vld [vmem:[#allocation18_spill] sm:$0xff] }
 0x68e   : > { %5460 = vmatmul.mubr.msk.f32.gmra.mrb[40].mxu0 %vm1082_vm1, %v1670_v40  ;;  %6732 = vrcp.f32 %v9667_v15  ;;  %v9672_v40 = vld [vmem:[#allocation28_spill] sm:$0xff] }
 0x68f   : > { %5994 = vmatpush3.bf16.msra.mxu0 %v5991_v47  ;;  %5462 = vmatprep.mubr.msk.f32.mxu0 %vm1082_vm1, %v8843_v59  ;;  %v1030_v59 = vld [vmem:[%s9318_s6 + $0x20] sm:$0xff]  ;;  %6734 = vrcp.f32 %v9670_v3  ;;  %v9691_v3 = vld [vmem:[#allocation21_spill] sm:$0xff] }
 0x690   : > { %5996 = vmatprep.subr.bf16.mxu0 %v5995_v57  ;;  %v6007_v24 = vpack.c.bf16 %v1031_v61, %v1030_v59  ;;  %v9678_v61 = vld [vmem:[#allocation82_spill] sm:$0xff] }
 0x692   : > { %5463 = vmatmul.mubr.msk.f32.gmra.mrb[42].mxu0 %vm1082_vm1, %v1672_v43  ;;  %v9675_v43 = vld [vmem:[#allocation46_spill] sm:$0xff] }
 0x693   : > { %5998 = vmatpush3.bf16.msra.mxu0 %v5995_v57  ;;  %5465 = vmatprep.mubr.msk.f32.mxu0 %vm1082_vm1, %v8852_v13  ;;  %v6402_v13 = vpop.permute.xlu1 %6401 }
 0x694   : > { %6000 = vmatprep.subr.bf16.mxu0 %v5999_v52  ;;  %v6404_v55 = vunpack.i.h.bf16 %v6402_v13  ;;  %v6403_v29 = vunpack.i.l.bf16 %v6402_v13  ;;  %v9680_v13 = vld [vmem:[#allocation50_spill] sm:$0xff] }
 0x696   : > { %5466 = vmatmul.mubr.msk.f32.gmra.mrb[44].mxu0 %vm1082_vm1, %v1674_v8  ;;  %v9054_v53 = vpack.c.bf16 %v6404_v55, %v6403_v29  ;;  %v9682_v29 = vld [vmem:[#allocation49_spill] sm:$0xff] }
 0x697   : > { %6002 = vmatpush3.bf16.msra.mxu0 %v5999_v52  ;;  %5468 = vmatprep.mubr.msk.f32.mxu0 %vm1082_vm1, %v8887_v17  ;;  %v6709_v17 = vpop.eup %6708  ;;  %v9676_v52 = vld [vmem:[#allocation5_spill] sm:$0xff] }
 0x698   : > { %6004 = vmatprep.subr.bf16.mxu0 %v6003_v18  ;;  %v6711_v46 = vpop.eup %6710  ;;  %v3157_v62 = vmul.f32 %v6709_v17, %v9661_v2  ;;  %v9684_v2 = vld [vmem:[#allocation6_spill] sm:$0xff] }
 0x699   : > { %v6713_v26 = vpop.eup %6712  ;;  %v3158_v28 = vmul.f32 %v6711_v46, %v9662_v11  ;;  %v9685_v11 = vld [vmem:[#allocation20_spill] sm:$0xff] }
 0x69a   : > { %5469 = vmatmul.mubr.msk.f32.gmra.mrb[46].mxu0 %vm1082_vm1, %v1676_v42  ;;  %v9060_v34 = vpop.eup %6714  ;;  %v3159_v58 = vmul.f32 %v6713_v26, %v9665_v14  ;;  %v3918_v42 = vpop.xlane.xlu0 %3917  ;;  %v9683_v26 = vld [vmem:[#allocation19_spill] sm:$0xff]  ;;  %v9688_v14 = vld [vmem:[#allocation30_spill] sm:$0xff] }
 0x69b   : > { %3993 = vadd.xlane.f32.xlu0 %v9045_v51  ;;  %6006 = vmatpush3.bf16.msra.mxu0 %v6003_v18  ;;  %v6717_v25 = vpop.eup %6716  ;;  %v9679_v18 = vld [vmem:[#allocation16_spill] sm:$0xff] }
 0x69c   : > { %5559 = vmatprep.mubr.f32.mxu0 %v3154_v21  ;;  %6008 = vmatprep.subr.bf16.mxu0 %v6007_v24  ;;  %v6719_v39 = vpop.eup %6718  ;;  %v3160_v44 = vmul.f32 %v6717_v25, %v9666_v50 }
 0x69d   : > { %v6721_v5 = vpop.eup %6720  ;;  %v3161_v16 = vmul.f32 %v6719_v39, %v9668_v23  ;;  %v9690_v23 = vld [vmem:[#allocation67_spill] sm:$0xff] }
 0x69e   : > { %5560 = vmatmul.mubr.f32.vlgmr.msra.gmra.mrb[48].mxu0 %v3155_v0  ;;  %v6723_v56 = vpop.eup %6722  ;;  %v3162_v41 = vmul.f32 %v6721_v5, %v9669_v33  ;;  %v3920_v55 = vpop.xlane.xlu0 %3919  ;;  %v9689_v5 = vld [vmem:[#allocation52_spill] sm:$0xff] }
 0x69f   : > { %6010 = vmatpush3.bf16.msra.mxu0 %v6007_v24  ;;  %5562 = vmatprep.mubr.f32.mxu0 %v3156_v1  ;;  %v6725_v48 = vpop.eup %6724  ;;  %v3163_v47 = vmul.f32 %v6723_v56, %v9671_v54  ;;  %v9681_v24 = vld [vmem:[#allocation84_spill] sm:$0xff]  ;;  %v3946_v0 = vsub.f32 %v9682_v29, %v3920_v55 }
 0x6a0   : > { %6060 = vmatprep.subr.bf16.mxu0 %v9054_v53  ;;  %v6727_v9 = vpop.eup %6726  ;;  %v3164_v49 = vmul.f32 %v6725_v48, %v9672_v40  ;;  %v3945_v21 = vsub.f32 %v9681_v24, %v3918_v42  ;;  %v9695_v40 = vld [vmem:[#allocation8_spill] sm:$0xff] }
 0x6a1   : > { %v6729_v57 = vpop.eup %6728  ;;  %v3165_v12 = vmul.f32 %v6727_v9, %v9674_v38  ;;  %v3967_v17 = vmul.f32 1.442695, %v3946_v0  ;;  %v9694_v9 = vld [vmem:[#allocation23_spill] sm:$0xff]  ;;  %v9697_v38 = vld [vmem:[#allocation88_spill] sm:$0xff] }
 0x6a2   : > { %5563 = vmatmul.mubr.f32.gmra.mrb[50].mxu0 %v3157_v62  ;;  %v6731_v19 = vpop.eup %6730  ;;  %v3166_v30 = vmul.f32 %v6729_v57, %v9675_v43  ;;  %v3965_v31 = vmul.f32 1.442695, %v3945_v21  ;;  %v3922_v62 = vpop.xlane.xlu0 %3921  ;;  %v9696_v57 = vld [vmem:[#allocation24_spill] sm:$0xff]  ;;  %v9701_v21 = vld [vmem:[#allocation93_spill] sm:$0xff] }
 0x6a3   : > { %3995 = vadd.xlane.f32.xlu1 %v9060_v34  ;;  %5565 = vmatprep.mubr.f32.mxu0 %v3158_v28  ;;  %v6733_v60 = vpop.eup %6732  ;;  %v3167_v8 = vmul.f32 %v6731_v19, %v9677_v63  ;;  %v9686_v28 = vld [vmem:[#allocation86_spill] sm:$0xff]  ;;  %v3368_v63 = vpop.permute.xlu1 %3367 }
 0x6a4   : > { %v6735_v59 = vpop.eup %6734  ;;  %v3168_v22 = vmul.f32 %v6733_v60, %v9678_v61  ;;  %6736 = vpow2.f32 %v3965_v31  ;;  %v3947_v25 = vsub.f32 %v9686_v28, %v3922_v62  ;;  %v3956_v31 = vsub.f32 %v9701_v21, %v9005_v32  ;;  %v9702_v28 = vld [vmem:[#allocation25_spill] sm:$0xff] }
 0x6a5   : > { %v3169_v7 = vmul.f32 %v6735_v59, %v9680_v13  ;;  %6738 = vpow2.f32 %v3967_v17  ;;  %v9699_v59 = vld [vmem:[#allocation54_spill] sm:$0xff] }
 0x6a6   : > { %5566 = vmatmul.mubr.f32.gmra.mrb[52].mxu0 %v3159_v58  ;;  %v3969_v37 = vmul.f32 1.442695, %v3947_v25  ;;  %v3948_v58 = vsub.f32 %v9688_v14, %v9687_v10  ;;  %v3926_v39 = vpop.xlane.xlu0 %3925  ;;  %v3987_v29 = vmul.f32 1.442695, %v3956_v31 }
 0x6a7   : > { %5568 = vmatprep.mubr.f32.mxu0 %v3160_v44  ;;  %v3949_v15 = vsub.f32 %v9689_v5, %v3926_v39  ;;  %v6407_v24 = vpop.permute.xlu1 %6406  ;;  %v9704_v5 = vld [vmem:[#allocation72_spill] sm:$0xff] }
 0x6a8   : > { %6740 = vpow2.f32 %v3969_v37  ;;  %v3971_v44 = vmul.f32 1.442695, %v3948_v58  ;;  %v9703_v37 = vld [vmem:[#allocation9_spill] sm:$0xff] }
 0x6a9   : > { %v3973_v56 = vmul.f32 1.442695, %v3949_v15  ;;  %v3954_v15 = vsub.f32 %v9704_v5, %v8991_v36 }
 0x6aa   : > { %5569 = vmatmul.mubr.f32.gmra.mrb[54].mxu0 %v3161_v16  ;;  %6742 = vpow2.f32 %v3971_v44  ;;  %v3950_v16 = vsub.f32 %v9690_v23, %v8955_v27  ;;  %v9692_v27 = vld [vmem:[#allocation7_spill] sm:$0xff] }
 0x6ab   : > { %5571 = vmatprep.mubr.f32.mxu0 %v3162_v41  ;;  %6744 = vpow2.f32 %v3973_v56 }
 0x6ac   : > { %v3975_v33 = vmul.f32 1.442695, %v3950_v16  ;;  %v3983_v16 = vmul.f32 1.442695, %v3954_v15 }
 0x6ae   : > { %5572 = vmatmul.mubr.f32.gmra.mrb[56].mxu0 %v3163_v47  ;;  %v9088_v1 = vpop.eup %6736  ;;  %6746 = vpow2.f32 %v3975_v33  ;;  %v9693_v47 = vld [vmem:[#allocation22_spill] sm:$0xff] }
 0x6af   : > { %5574 = vmatprep.mubr.f32.mxu0 %v3164_v49  ;;  %v9091_v46 = vpop.eup %6738  ;;  %v3930_v49 = vpop.xlane.xlu0 %3929 }
 0x6b1   : > { %3377 = vrot.lane.b32.xlu0 %v9673_v4, %s6804_s17 }
 0x6b2   : > { %5575 = vmatmul.mubr.f32.gmra.mrb[58].mxu0 %v3165_v12  ;;  %v9103_v50 = vpop.eup %6740  ;;  %v3951_v12 = vsub.f32 %v9697_v38, %v3930_v49  ;;  %v6408_v49 = vunpack.i.l.bf16 %v6407_v24 }
 0x6b3   : > { %5577 = vmatprep.mubr.f32.mxu0 %v3166_v30  ;;  %v3934_v43 = vpop.xlane.xlu0 %3933  ;;  %v9698_v30 = vld [vmem:[#allocation95_spill] sm:$0xff] }
 0x6b4   : > { %6416 = vrot.lane.b32.xlu1 %v9676_v52, %s6807_s20  ;;  %v9109_v41 = vpop.eup %6742  ;;  %v3977_v19 = vmul.f32 1.442695, %v3951_v12  ;;  %v3952_v60 = vsub.f32 %v9698_v30, %v8975_v20  ;;  %v3953_v61 = vsub.f32 %v9699_v59, %v3934_v43  ;;  %v3372_v20 = vpop.permute.xlu1 %3371  ;;  %v9705_v12 = vld [vmem:[#allocation13_spill] sm:$0xff] }
 0x6b5   : > { %v9112_v48 = vpop.eup %6744 }
 0x6b6   : > { %5578 = vmatmul.mubr.f32.gmra.mrb[60].mxu0 %v3167_v8  ;;  %6748 = vpow2.f32 %v3977_v19  ;;  %v3979_v8 = vmul.f32 1.442695, %v3952_v60  ;;  %v3981_v13 = vmul.f32 1.442695, %v3953_v61 }
 0x6b7   : > { %5580 = vmatprep.mubr.f32.mxu0 %v3168_v22  ;;  %v3938_v22 = vpop.xlane.xlu0 %3937 }
 0x6b8   : > { %3379 = vrot.lane.b32.xlu1 %v9679_v18, %s6804_s17  ;;  %v9117_v54 = vpop.eup %6746  ;;  %6750 = vpow2.f32 %v3979_v8 }
 0x6b9   : > { %6752 = vpow2.f32 %v3981_v13  ;;  %v9706_v13 = vld [vmem:[#allocation10_spill] sm:$0xff] }
 0x6ba   : > { %5581 = vmatmul.mubr.f32.gmra.mrb[62].mxu0 %v3169_v7  ;;  %v9700_v7 = vld [vmem:[#allocation90_spill] sm:$0xff] }
 0x6bb   : > { %v3955_v42 = vsub.f32 %v9700_v7, %v3938_v22  ;;  %v3364_v25 = vpop.permute.xlu0 %3363 }
 0x6bd   : > { %v3985_v55 = vmul.f32 1.442695, %v3955_v42 }
 0x6bf   : > { %6754 = vpow2.f32 %v3985_v55  ;;  %v3370_v58 = vpop.permute.xlu0 %3369 }
 0x6c0   : > { %v9133_v52 = vpop.eup %6748  ;;  %6756 = vpow2.f32 %v3987_v29 }
 0x6c1   : > { %6758 = vpow2.f32 %v3983_v16 }
 0x6c2   : > { %v9140_v0 = vpop.eup %6750 }
 0x6d0   : > { %3997 = vadd.xlane.f32.xlu0 %v9088_v1 }
 0x6dc   : > { %3999 = vadd.xlane.f32.xlu1 %v9091_v46 }
 0x6e6   : > { %3381 = vrot.lane.b32.xlu0 %v9683_v26, %s6804_s17 }
 0x6ed   : > { %6421 = vrot.lane.b32.xlu1 %v9684_v2, %s6807_s20  ;;  %v9145_v2 = vpop.eup %6752 }
 0x6ee   : > { %v9150_v32 = vpop.eup %6754 }
 0x6ef   : > { %v9155_v10 = vpop.eup %6756 }
 0x6f1   : > { %3383 = vrot.lane.b32.xlu1 %v9685_v11, %s6804_s17 }
 0x6f3   : > { %v9160_v44 = vpop.xlane.xlu0 %3989 }
 0x6f4   : > { %6760 = vrcp.f32 %v9160_v44 }
 0x6f7   : > { %v9142_v17 = vpop.xlane.xlu1 %3991  ;;  %v3374_v56 = vpop.permute.xlu0 %3373 }
 0x6f8   : > { %6762 = vrcp.f32 %v9142_v17 }
 0x6fb   : > { %v6412_v62 = vpop.permute.xlu1 %6411 }
 0x6fc   : > { %v6414_v59 = vunpack.i.h.bf16 %v6412_v62  ;;  %v6413_v61 = vunpack.i.l.bf16 %v6412_v62  ;;  %v9707_v62 = vld [vmem:[#allocation15_spill] sm:$0xff] }
 0x6fe   : > { %v6067_v21 = vpack.c.bf16 %v6414_v59, %v6413_v61 }
 0x6ff   : > { %v3376_v14 = vpop.permute.xlu1 %3375 }
 0x705   : > { %4001 = vadd.xlane.f32.xlu0 %v9103_v50 }
 0x715   : > { %4003 = vadd.xlane.f32.xlu1 %v9109_v41 }
 0x719   : > { %4005 = vadd.xlane.f32.xlu1 %v9112_v48 }
 0x71b   : > { %3385 = vrot.lane.b32.xlu0 %v9691_v3, %s6804_s17 }
 0x71d   : > { %4007 = vadd.xlane.f32.xlu1 %v9117_v54 }
 0x71f   : > { %6426 = vrot.lane.b32.xlu0 %v9692_v27, %s6807_s20 }
 0x723   : > { %3387 = vrot.lane.b32.xlu0 %v9693_v47, %s6804_s17 }
 0x727   : > { %3389 = vrot.lane.b32.xlu0 %v9694_v9, %s6804_s17 }
 0x728   : > { %v9166_v19 = vpop.xlane.xlu0 %3993 }
 0x729   : > { %6764 = vrcp.f32 %v9166_v19 }
 0x72e   : > { %6431 = vrot.lane.b32.xlu1 %v9695_v40, %s6807_s20  ;;  %v6409_v40 = vunpack.i.h.bf16 %v6407_v24 }
 0x730   : > { %v9158_v39 = vpop.xlane.xlu1 %3995  ;;  %v6063_v8 = vpack.c.bf16 %v6409_v40, %v6408_v49 }
 0x731   : > { %6766 = vrcp.f32 %v9158_v39  ;;  %v9711_v39 = vld [vmem:[#allocation73_spill] sm:$0xff] }
 0x732   : > { %3391 = vrot.lane.b32.xlu1 %v9696_v57, %s6804_s17 }
 0x734   : > { %v6417_v23 = vpop.permute.xlu1 %6416 }
 0x735   : > { %v6419_v31 = vunpack.i.h.bf16 %v6417_v23  ;;  %v6418_v55 = vunpack.i.l.bf16 %v6417_v23 }
 0x737   : > { %v6071_v15 = vpack.c.bf16 %v6419_v31, %v6418_v55 }
 0x738   : > { %v3380_v33 = vpop.permute.xlu1 %3379 }
 0x746   : > { %4009 = vadd.xlane.f32.xlu0 %v9133_v52 }
 0x756   : > { %4011 = vadd.xlane.f32.xlu1 %v9140_v0 }
 0x75a   : > { %4013 = vadd.xlane.f32.xlu1 %v9145_v2 }
 0x75c   : > { %3393 = vrot.lane.b32.xlu0 %v9702_v28, %s6804_s17 }
 0x75e   : > { %4017 = vadd.xlane.f32.xlu1 %v9150_v32 }
 0x760   : > { %6436 = vrot.lane.b32.xlu0 %v9703_v37, %s6807_s20 }
 0x762   : > { %4019 = vadd.xlane.f32.xlu1 %v9155_v10 }
 0x769   : > { %v9169_v60 = vpop.xlane.xlu1 %3999 }
 0x771   : > { %v5561_v27 = vpop.f32.mrb[48].mxu0 }
 0x772   : > { %v3284_v38 = vpop.f32.mrb[49].mxu0  ;;  %v3412_v30 = vmul.f32 %v5561_v27, %v9021_v35  ;;  %v3378_v35 = vpop.permute.xlu0 %3377 }
 0x773   : > { %4246 = vrot.lane.b32.xlu1 %v9705_v12, %s6806_s19  ;;  %v3411_v43 = vmul.f32 %v3364_v25, %v3284_v38  ;;  %v6422_v25 = vpop.permute.xlu1 %6421 }
 0x774   : > { %v6424_v23 = vunpack.i.h.bf16 %v6422_v25  ;;  %v6423_v16 = vunpack.i.l.bf16 %v6422_v25 }
 0x775   : > { %v5564_v36 = vpop.f32.mrb[50].mxu0  ;;  %5587 = vmatprep.mubr.msk.f32.mxu0 %vm1082_vm1, %v3411_v43 }
 0x776   : > { %v3294_v22 = vpop.f32.mrb[51].mxu0  ;;  %5588 = vmatmul.mubr.msk.f32.vlgmr.msra.gmra.mrb[32].mxu0 %vm1082_vm1, %v3412_v30  ;;  %v3414_v42 = vmul.f32 %v5564_v36, %v3370_v58  ;;  %v9182_v58 = vpop.xlane.xlu0 %3997  ;;  %v6075_v38 = vpack.c.bf16 %v6424_v23, %v6423_v16  ;;  %v9710_v16 = vld [vmem:[#allocation96_spill] sm:$0xff] }
 0x777   : > { %4248 = vrot.lane.b32.xlu1 %v9706_v13, %s6806_s19  ;;  %v3413_v7 = vmul.f32 %v3368_v63, %v3294_v22  ;;  %6062 = vmatpush3.bf16.msra.mxu0 %v9054_v53  ;;  %v9180_v53 = vpop.eup %6758  ;;  %6768 = vrcp.f32 %v9182_v58 }
 0x778   : > { %6064 = vmatprep.subr.bf16.mxu0 %v6063_v8  ;;  %6770 = vrcp.f32 %v9169_v60 }
 0x779   : > { %v5567_v24 = vpop.f32.mrb[52].mxu0  ;;  %5590 = vmatprep.mubr.msk.f32.mxu0 %vm1082_vm1, %v3413_v7 }
 0x77a   : > { %v3304_v29 = vpop.f32.mrb[53].mxu0  ;;  %5591 = vmatmul.mubr.msk.f32.gmra.mrb[34].mxu0 %vm1082_vm1, %v3414_v42  ;;  %v3416_v63 = vmul.f32 %v5567_v24, %v3374_v56  ;;  %v3382_v43 = vpop.permute.xlu0 %3381  ;;  %v9709_v42 = vld [vmem:[#allocation11_spill] sm:$0xff] }
 0x77b   : > { %4252 = vrot.lane.b32.xlu1 %v9707_v62, %s6806_s19  ;;  %v3415_v37 = vmul.f32 %v3372_v20, %v3304_v29  ;;  %6066 = vmatpush3.bf16.msra.mxu0 %v6063_v8  ;;  %v9708_v20 = vld [vmem:[#allocation12_spill] sm:$0xff]  ;;  %v3384_v8 = vpop.permute.xlu1 %3383 }
 0x77c   : > { %6068 = vmatprep.subr.bf16.mxu0 %v6067_v21 }
 0x77d   : > { %v5570_v5 = vpop.f32.mrb[54].mxu0  ;;  %5593 = vmatprep.mubr.msk.f32.mxu0 %vm1082_vm1, %v3415_v37 }
 0x77e   : > { %v3314_v27 = vpop.f32.mrb[55].mxu0  ;;  %5594 = vmatmul.mubr.msk.f32.gmra.mrb[36].mxu0 %vm1082_vm1, %v3416_v63  ;;  %v3418_v56 = vmul.f32 %v5570_v5, %v3378_v35 }
 0x77f   : > { %4015 = vadd.xlane.f32.xlu0 %v9180_v53  ;;  %v3417_v40 = vmul.f32 %v3376_v14, %v3314_v27  ;;  %6070 = vmatpush3.bf16.msra.mxu0 %v6067_v21 }
 0x780   : > { %4254 = vrot.lane.b32.xlu1 %v9708_v20, %s6806_s19  ;;  %6072 = vmatprep.subr.bf16.mxu0 %v6071_v15 }
 0x781   : > { %v5573_v49 = vpop.f32.mrb[56].mxu0  ;;  %5596 = vmatprep.mubr.msk.f32.mxu0 %vm1082_vm1, %v3417_v40 }
 0x782   : > { %v3324_v12 = vpop.f32.mrb[57].mxu0  ;;  %5597 = vmatmul.mubr.msk.f32.gmra.mrb[38].mxu0 %vm1082_vm1, %v3418_v56  ;;  %v3420_v14 = vmul.f32 %v5573_v49, %v3382_v43 }
 0x783   : > { %v3419_v30 = vmul.f32 %v3380_v33, %v3324_v12  ;;  %6074 = vmatpush3.bf16.msra.mxu0 %v6071_v15 }
 0x784   : > { %4256 = vrot.lane.b32.xlu1 %v9658_v45, %s6806_s19  ;;  %6076 = vmatprep.subr.bf16.mxu0 %v6075_v38 }
 0x785   : > { %v5576_v36 = vpop.f32.mrb[58].mxu0  ;;  %5599 = vmatprep.mubr.msk.f32.mxu0 %vm1082_vm1, %v3419_v30 }
 0x786   : > { %v3334_v59 = vpop.f32.mrb[59].mxu0  ;;  %5600 = vmatmul.mubr.msk.f32.gmra.mrb[40].mxu0 %vm1082_vm1, %v3420_v14 }
 0x787   : > { %v3421_v61 = vmul.f32 %v3384_v8, %v3334_v59  ;;  %6078 = vmatpush3.bf16.msra.mxu0 %v6075_v38 }
 0x788   : > { %4258 = vrot.lane.b32.xlu1 %v9660_v6, %s6806_s19 }
 0x789   : > { %v5579_v22 = vpop.f32.mrb[60].mxu0  ;;  %5602 = vmatprep.mubr.msk.f32.mxu0 %vm1082_vm1, %v3421_v61 }
 0x78a   : > { %v3344_v33 = vpop.f32.mrb[61].mxu0 }
 0x78c   : > { %4260 = vrot.lane.b32.xlu1 %v9673_v4, %s6806_s19 }
 0x78d   : > { %v5582_v45 = vpop.f32.mrb[62].mxu0 }
 0x78e   : > { %v3354_v13 = vpop.f32.mrb[63].mxu0 }
 0x790   : > { %4262 = vrot.lane.b32.xlu1 %v9679_v18, %s6806_s19 }
 0x792   : > { %v4002_v7 = vpop.xlane.xlu0 %4001 }
 0x793   : > { %6772 = vrcp.f32 %v4002_v7 }
 0x794   : > { %4266 = vrot.lane.b32.xlu1 %v9685_v11, %s6806_s19 }
 0x795   : > { %4250 = vrot.lane.b32.xlu0 %v9709_v42, %s6806_s19 }
 0x796   : > { %v3386_v6 = vpop.permute.xlu0 %3385 }
 0x797   : > { %v3422_v35 = vmul.f32 %v5576_v36, %v3386_v6 }
 0x798   : > { %4270 = vrot.lane.b32.xlu1 %v9693_v47, %s6806_s19 }
 0x799   : > { %4264 = vrot.lane.b32.xlu0 %v9683_v26, %s6806_s19  ;;  %5603 = vmatmul.mubr.msk.f32.gmra.mrb[42].mxu0 %vm1082_vm1, %v3422_v35 }
 0x79a   : > { %v6427_v4 = vpop.permute.xlu0 %6426 }
 0x79b   : > { %v6429_v24 = vunpack.i.h.bf16 %v6427_v4  ;;  %v6428_v18 = vunpack.i.l.bf16 %v6427_v4 }
 0x79c   : > { %4274 = vrot.lane.b32.xlu1 %v9696_v57, %s6806_s19 }
 0x79d   : > { %v6079_v11 = vpack.c.bf16 %v6429_v24, %v6428_v18  ;;  %4268 = vrot.lane.b32.xlu0 %v9691_v3, %s6806_s19 }
 0x79e   : > { %v3388_v21 = vpop.permute.xlu0 %3387 }
 0x79f   : > { %v3423_v31 = vmul.f32 %v3388_v21, %v3344_v33  ;;  %6080 = vmatprep.subr.bf16.mxu0 %v6079_v11 }
 0x7a0   : > { %6082 = vmatpush3.bf16.msra.mxu0 %v6079_v11  ;;  %v1033_v11 = vld [vmem:[%s9318_s6 + $0x38] sm:$0xff] }
 0x7a1   : > { %4272 = vrot.lane.b32.xlu0 %v9694_v9, %s6806_s19  ;;  %5605 = vmatprep.mubr.msk.f32.mxu0 %vm1082_vm1, %v3423_v31 }
 0x7a2   : > { %v4004_v26 = vpop.xlane.xlu1 %4003  ;;  %v3390_v47 = vpop.permute.xlu0 %3389 }
 0x7a3   : > { %v3424_v55 = vmul.f32 %v5579_v22, %v3390_v47  ;;  %6774 = vrcp.f32 %v4004_v26 }
 0x7a5   : > { %4276 = vrot.lane.b32.xlu0 %v9702_v28, %s6806_s19  ;;  %5606 = vmatmul.mubr.msk.f32.gmra.mrb[44].mxu0 %vm1082_vm1, %v3424_v55  ;;  %v6761_v28 = vpop.eup %6760 }
 0x7a6   : > { %v4006_v57 = vpop.xlane.xlu1 %4005  ;;  %v4037_v27 = vmul.f32 %v6761_v28, %v9710_v16  ;;  %v6763_v56 = vpop.eup %6762 }
 0x7a7   : > { %v6765_v19 = vpop.eup %6764  ;;  %v4038_v49 = vmul.f32 %v6763_v56, %v9711_v39  ;;  %6776 = vrcp.f32 %v4006_v57 }
 0x7a8   : > { %v6767_v38 = vpop.eup %6766  ;;  %v4039_v12 = vmul.f32 %v6765_v19, %v9045_v51 }
 0x7a9   : > { %v6769_v43 = vpop.eup %6768  ;;  %v4040_v60 = vmul.f32 %v6767_v38, %v9060_v34 }
 0x7aa   : > { %v4008_v29 = vpop.xlane.xlu1 %4007  ;;  %v6771_v30 = vpop.eup %6770  ;;  %v4041_v36 = vmul.f32 %v6769_v43, %v9088_v1 }
 0x7ab   : > { %6778 = vrcp.f32 %v4008_v29  ;;  %v6773_v8 = vpop.eup %6772  ;;  %v4042_v59 = vmul.f32 %v6771_v30, %v9091_v46 }
 0x7ac   : > { %v4043_v51 = vmul.f32 %v6773_v8, %v9103_v50 }
 0x7ad   : > { %v6775_v61 = vpop.eup %6774 }
 0x7ae   : > { %v6432_v3 = vpop.permute.xlu1 %6431  ;;  %v4044_v33 = vmul.f32 %v6775_v61, %v9109_v41 }
 0x7af   : > { %v6434_v62 = vunpack.i.h.bf16 %v6432_v3  ;;  %v6433_v25 = vunpack.i.l.bf16 %v6432_v3 }
 0x7b1   : > { %v6083_v37 = vpack.c.bf16 %v6434_v62, %v6433_v25  ;;  %v6777_v22 = vpop.eup %6776 }
 0x7b2   : > { %v3392_v63 = vpop.permute.xlu1 %3391 }
 0x7b3   : > { %v3425_v5 = vmul.f32 %v3392_v63, %v3354_v13  ;;  %6084 = vmatprep.subr.bf16.mxu0 %v6083_v37 }
 0x7b4   : > { %6086 = vmatpush3.bf16.msra.mxu0 %v6083_v37 }
 0x7b5   : > { %5608 = vmatprep.mubr.msk.f32.mxu0 %vm1082_vm1, %v3425_v5  ;;  %v6779_v34 = vpop.eup %6778 }
 0x7b6   : > { %v4046_v1 = vmul.f32 %v6779_v34, %v9117_v54 }
 0x7d3   : > { %v4010_v9 = vpop.xlane.xlu0 %4009 }
 0x7d4   : > { %6780 = vrcp.f32 %v4010_v9 }
 0x7d7   : > { %v3394_v15 = vpop.permute.xlu0 %3393 }
 0x7d8   : > { %v3426_v23 = vmul.f32 %v5582_v45, %v3394_v15  ;;  %v4045_v45 = vmul.f32 %v6777_v22, %v9112_v48 }
 0x7da   : > { %5609 = vmatmul.mubr.msk.f32.gmra.mrb[46].mxu0 %vm1082_vm1, %v3426_v23 }
 0x7db   : > { %v6437_v40 = vpop.permute.xlu0 %6436  ;;  %5699 = vmatprep.mubr.f32.mxu0 %v4037_v27 }
 0x7dc   : > { %v6439_v20 = vunpack.i.h.bf16 %v6437_v40  ;;  %v6438_v44 = vunpack.i.l.bf16 %v6437_v40 }
 0x7de   : > { %v6087_v17 = vpack.c.bf16 %v6439_v20, %v6438_v44  ;;  %v6781_v13 = vpop.eup %6780 }
 0x7df   : > { %v4047_v42 = vmul.f32 %v6781_v13, %v9133_v52 }
 0x7e0   : > { %6088 = vmatprep.subr.bf16.mxu0 %v6087_v17 }
 0x7e1   : > { %6090 = vmatpush3.bf16.msra.mxu0 %v6087_v17 }
 0x7e3   : > { %v4012_v58 = vpop.xlane.xlu1 %4011 }
 0x7e4   : > { %5700 = vmatmul.mubr.f32.vlgmr.msra.gmra.mrb[64].mxu0 %v4038_v49  ;;  %6782 = vrcp.f32 %v4012_v58 }
 0x7e5   : > { %5702 = vmatprep.mubr.f32.mxu0 %v4039_v12 }
 0x7e7   : > { %v4014_v14 = vpop.xlane.xlu1 %4013 }
 0x7e8   : > { %5703 = vmatmul.mubr.f32.gmra.mrb[66].mxu0 %v4040_v60  ;;  %6784 = vrcp.f32 %v4014_v14 }
 0x7e9   : > { %5705 = vmatprep.mubr.f32.mxu0 %v4041_v36 }
 0x7eb   : > { %v4018_v41 = vpop.xlane.xlu1 %4017 }
 0x7ec   : > { %5706 = vmatmul.mubr.f32.gmra.mrb[68].mxu0 %v4042_v59  ;;  %6786 = vrcp.f32 %v4018_v41 }
 0x7ed   : > { %5708 = vmatprep.mubr.f32.mxu0 %v4043_v51 }
 0x7ee   : > { %v6783_v7 = vpop.eup %6782 }
 0x7ef   : > { %v4048_v50 = vmul.f32 %v6783_v7, %v9140_v0  ;;  %v4020_v48 = vpop.xlane.xlu1 %4019 }
 0x7f0   : > { %5709 = vmatmul.mubr.f32.gmra.mrb[70].mxu0 %v4044_v33 }
 0x7f1   : > { %5711 = vmatprep.mubr.f32.mxu0 %v4045_v45 }
 0x7f2   : > { %v6785_v46 = vpop.eup %6784 }
 0x7f3   : > { %v4049_v6 = vmul.f32 %v6785_v46, %v9145_v2  ;;  %v1032_v2 = vld [vmem:[%s9318_s6 + $0x30] sm:$0xff] }
 0x7f4   : > { %5712 = vmatmul.mubr.f32.gmra.mrb[72].mxu0 %v4046_v1  ;;  %v6091_v21 = vpack.c.bf16 %v1033_v11, %v1032_v2 }
 0x7f5   : > { %5714 = vmatprep.mubr.f32.mxu0 %v4047_v42  ;;  %v4858_v42 = vld [vmem:[%s9319_s7] ss:$0 sm:$0xff] }
 0x7f6   : > { %v6787_v4 = vpop.eup %6786  ;;  %6092 = vmatprep.subr.bf16.mxu0 %v6091_v21 }
 0x7f7   : > { %v4051_v18 = vmul.f32 %v6787_v4, %v9150_v32  ;;  %6094 = vmatpush3.bf16.msra.mxu0 %v6091_v21 }
 0x7f8   : > { %5715 = vmatmul.mubr.f32.gmra.mrb[74].mxu0 %v4048_v50 }
 0x7f9   : > { %5717 = vmatprep.mubr.f32.mxu0 %v4049_v6 }
 0x80c   : > { %v4016_v35 = vpop.xlane.xlu0 %4015 }
 0x80d   : > { %6788 = vrcp.f32 %v4016_v35 }
 0x80e   : > { %6790 = vrcp.f32 %v4020_v48 }
 0x810   : > { %v4251_v25 = vpop.permute.xlu0 %4250 }
 0x814   : > { %v4265_v56 = vpop.permute.xlu0 %4264 }
 0x817   : > { %v6789_v54 = vpop.eup %6788 }
 0x818   : > { %v4050_v24 = vmul.f32 %v6789_v54, %v9180_v53  ;;  %v6791_v52 = vpop.eup %6790  ;;  %v4247_v53 = vpop.permute.xlu1 %4246 }
 0x819   : > { %v4052_v0 = vmul.f32 %v6791_v52, %v9155_v10  ;;  %v4269_v60 = vpop.permute.xlu0 %4268 }
 0x81a   : > { %5718 = vmatmul.mubr.f32.gmra.mrb[76].mxu0 %v4050_v24 }
 0x81b   : > { %5720 = vmatprep.mubr.f32.mxu0 %v4051_v18 }
 0x81c   : > { %v4249_v31 = vpop.permute.xlu1 %4248 }
 0x81d   : > { %v4273_v8 = vpop.permute.xlu0 %4272 }
 0x81e   : > { %5721 = vmatmul.mubr.f32.gmra.mrb[78].mxu0 %v4052_v0 }
 0x820   : > { %v4253_v26 = vpop.permute.xlu1 %4252 }
 0x821   : > { %v4277_v13 = vpop.permute.xlu0 %4276 }
 0x824   : > { %v4255_v32 = vpop.permute.xlu1 %4254 }
 0x828   : > { %v4257_v47 = vpop.permute.xlu1 %4256 }
 0x82c   : > { %v4259_v29 = vpop.permute.xlu1 %4258 }
 0x830   : > { %v4261_v28 = vpop.permute.xlu1 %4260 }
 0x834   : > { %v4263_v44 = vpop.permute.xlu1 %4262 }
 0x838   : > { %v4267_v12 = vpop.permute.xlu1 %4266 }
 0x83c   : > { %v4271_v36 = vpop.permute.xlu1 %4270 }
 0x840   : > { %v4275_v34 = vpop.permute.xlu1 %4274 }
 0x8b7   : > { %v5701_v55 = vpop.f32.mrb[64].mxu0 }
 0x8b8   : > { %v4167_v57 = vpop.f32.mrb[65].mxu0  ;;  %v4295_v3 = vmul.f32 %v5701_v55, %v4249_v31 }
 0x8b9   : > { %v4294_v10 = vmul.f32 %v4247_v53, %v4167_v57 }
 0x8bb   : > { %v5704_v62 = vpop.f32.mrb[66].mxu0  ;;  %5727 = vmatprep.mubr.msk.f32.mxu0 %vm1082_vm1, %v4294_v10 }
 0x8bc   : > { %v4177_v37 = vpop.f32.mrb[67].mxu0  ;;  %5728 = vmatmul.mubr.msk.f32.vlgmr.msra.gmra.mrb[32].mxu0 %vm1082_vm1, %v4295_v3  ;;  %v4297_v5 = vmul.f32 %v5704_v62, %v4253_v26 }
 0x8bd   : > { %v4296_v63 = vmul.f32 %v4251_v25, %v4177_v37 }
 0x8bf   : > { %v5707_v9 = vpop.f32.mrb[68].mxu0  ;;  %5730 = vmatprep.mubr.msk.f32.mxu0 %vm1082_vm1, %v4296_v63 }
 0x8c0   : > { %v4187_v15 = vpop.f32.mrb[69].mxu0  ;;  %5731 = vmatmul.mubr.msk.f32.gmra.mrb[34].mxu0 %vm1082_vm1, %v4297_v5  ;;  %v4299_v16 = vmul.f32 %v5707_v9, %v4257_v47 }
 0x8c1   : > { %v4298_v23 = vmul.f32 %v4255_v32, %v4187_v15 }
 0x8c3   : > { %v5710_v27 = vpop.f32.mrb[70].mxu0  ;;  %5733 = vmatprep.mubr.msk.f32.mxu0 %vm1082_vm1, %v4298_v23 }
 0x8c4   : > { %v4197_v40 = vpop.f32.mrb[71].mxu0  ;;  %5734 = vmatmul.mubr.msk.f32.gmra.mrb[36].mxu0 %vm1082_vm1, %v4299_v16  ;;  %v4301_v17 = vmul.f32 %v5710_v27, %v4261_v28 }
 0x8c5   : > { %v4300_v20 = vmul.f32 %v4259_v29, %v4197_v40 }
 0x8c7   : > { %v5713_v19 = vpop.f32.mrb[72].mxu0  ;;  %5736 = vmatprep.mubr.msk.f32.mxu0 %vm1082_vm1, %v4300_v20 }
 0x8c8   : > { %v4207_v39 = vpop.f32.mrb[73].mxu0  ;;  %5737 = vmatmul.mubr.msk.f32.gmra.mrb[38].mxu0 %vm1082_vm1, %v4301_v17  ;;  %v4303_v38 = vmul.f32 %v5713_v19, %v4265_v56 }
 0x8c9   : > { %v4302_v49 = vmul.f32 %v4263_v44, %v4207_v39 }
 0x8cb   : > { %v5716_v58 = vpop.f32.mrb[74].mxu0  ;;  %5739 = vmatprep.mubr.msk.f32.mxu0 %vm1082_vm1, %v4302_v49 }
 0x8cc   : > { %v4217_v43 = vpop.f32.mrb[75].mxu0  ;;  %5740 = vmatmul.mubr.msk.f32.gmra.mrb[40].mxu0 %vm1082_vm1, %v4303_v38  ;;  %v4305_v14 = vmul.f32 %v5716_v58, %v4269_v60 }
 0x8cd   : > { %v4304_v30 = vmul.f32 %v4267_v12, %v4217_v43 }
 0x8cf   : > { %5742 = vmatprep.mubr.msk.f32.mxu0 %vm1082_vm1, %v4304_v30 }
 0x8d0   : > { %5743 = vmatmul.mubr.msk.f32.gmra.mrb[42].mxu0 %vm1082_vm1, %v4305_v14 }
 0x8ed   : > { %v5719_v59 = vpop.f32.mrb[76].mxu0 }
 0x8ee   : > { %v4227_v61 = vpop.f32.mrb[77].mxu0  ;;  %v4307_v22 = vmul.f32 %v5719_v59, %v4273_v8 }
 0x8ef   : > { %v4306_v51 = vmul.f32 %v4271_v36, %v4227_v61 }
 0x8f1   : > { %v5722_v33 = vpop.f32.mrb[78].mxu0  ;;  %5745 = vmatprep.mubr.msk.f32.mxu0 %vm1082_vm1, %v4306_v51 }
 0x8f2   : > { %v4237_v45 = vpop.f32.mrb[79].mxu0  ;;  %5746 = vmatmul.mubr.msk.f32.gmra.mrb[44].mxu0 %vm1082_vm1, %v4307_v22  ;;  %v4309_v7 = vmul.f32 %v5722_v33, %v4277_v13 }
 0x8f3   : > { %v4308_v1 = vmul.f32 %v4275_v34, %v4237_v45 }
 0x8f5   : > { %5748 = vmatprep.mubr.msk.f32.mxu0 %vm1082_vm1, %v4308_v1 }
 0x8f6   : > { %5749 = vmatmul.mubr.msk.f32.gmra.mrb[46].mxu0 %vm1082_vm1, %v4309_v7 }
 0x98f   : > { %v5729_v46 = vpop.f32.mrb[32].mxu0 }
 0x990   : > { %v4527_v50 = vadd.f32 %v5729_v46, %v4858_v42  ;;  %v4424_v6 = vpop.f32.mrb[33].mxu0 }
 0x991   : > { %v4526_v41 = vadd.f32 %v4858_v42, %v4424_v6 }
 0x992   : > { %4543 = vst.msk [vmem:[%s9275_s25 + $0x8] sm:$0xff] %vm336_vm0, %v4527_v50 }
 0x993   : > { %4542 = vst.msk [vmem:[%s9275_s25] sm:$0xff] %vm336_vm0, %v4526_v41  ;;  %v5732_v48 = vpop.f32.mrb[34].mxu0 }
 0x994   : > { %v4529_v35 = vadd.f32 %v5732_v48, %v4858_v42  ;;  %v4434_v4 = vpop.f32.mrb[35].mxu0 }
 0x995   : > { %v4528_v54 = vadd.f32 %v4858_v42, %v4434_v4 }
 0x996   : > { %4545 = vst.msk [vmem:[%s9275_s25 + $0x18] sm:$0xff] %vm336_vm0, %v4529_v35 }
 0x997   : > { %4544 = vst.msk [vmem:[%s9275_s25 + $0x10] sm:$0xff] %vm336_vm0, %v4528_v54  ;;  %v5735_v24 = vpop.f32.mrb[36].mxu0 }
 0x998   : > { %v4531_v52 = vadd.f32 %v5735_v24, %v4858_v42  ;;  %v4444_v18 = vpop.f32.mrb[37].mxu0 }
 0x999   : > { %v4530_v0 = vadd.f32 %v4858_v42, %v4444_v18 }
 0x99a   : > { %4547 = vst.msk [vmem:[%s9275_s25 + $0x28] sm:$0xff] %vm336_vm0, %v4531_v52 }
 0x99b   : > { %4546 = vst.msk [vmem:[%s9275_s25 + $0x20] sm:$0xff] %vm336_vm0, %v4530_v0  ;;  %v5738_v2 = vpop.f32.mrb[38].mxu0 }
 0x99c   : > { %v4533_v11 = vadd.f32 %v5738_v2, %v4858_v42  ;;  %v4454_v21 = vpop.f32.mrb[39].mxu0 }
 0x99d   : > { %v4532_v53 = vadd.f32 %v4858_v42, %v4454_v21 }
 0x99e   : > { %4549 = vst.msk [vmem:[%s9275_s25 + $0x38] sm:$0xff] %vm336_vm0, %v4533_v11 }
 0x99f   : > { %4548 = vst.msk [vmem:[%s9275_s25 + $0x30] sm:$0xff] %vm336_vm0, %v4532_v53  ;;  %v5741_v31 = vpop.f32.mrb[40].mxu0 }
 0x9a0   : > { %v4535_v26 = vadd.f32 %v5741_v31, %v4858_v42  ;;  %v4464_v32 = vpop.f32.mrb[41].mxu0 }
 0x9a1   : > { %v4534_v47 = vadd.f32 %v4858_v42, %v4464_v32 }
 0x9a2   : > { %4551 = vst.msk [vmem:[%s9275_s25 + $0x48] sm:$0xff] %vm336_vm0, %v4535_v26 }
 0x9a3   : > { %4550 = vst.msk [vmem:[%s9275_s25 + $0x40] sm:$0xff] %vm336_vm0, %v4534_v47  ;;  %v5744_v55 = vpop.f32.mrb[42].mxu0 }
 0x9a4   : > { %v4537_v57 = vadd.f32 %v5744_v55, %v4858_v42  ;;  %v4474_v10 = vpop.f32.mrb[43].mxu0 }
 0x9a5   : > { %v4536_v29 = vadd.f32 %v4858_v42, %v4474_v10 }
 0x9a6   : > { %4553 = vst.msk [vmem:[%s9275_s25 + $0x58] sm:$0xff] %vm336_vm0, %v4537_v57 }
 0x9a7   : > { %4552 = vst.msk [vmem:[%s9275_s25 + $0x50] sm:$0xff] %vm336_vm0, %v4536_v29 }
 0x9c5   : > { %v5747_v3 = vpop.f32.mrb[44].mxu0 }
 0x9c6   : > { %v4539_v62 = vadd.f32 %v5747_v3, %v4858_v42  ;;  %v4484_v25 = vpop.f32.mrb[45].mxu0 }
 0x9c7   : > { %v4538_v37 = vadd.f32 %v4858_v42, %v4484_v25 }
 0x9c8   : > { %4555 = vst.msk [vmem:[%s9275_s25 + $0x68] sm:$0xff] %vm336_vm0, %v4539_v62 }
 0x9c9   : > { %4554 = vst.msk [vmem:[%s9275_s25 + $0x60] sm:$0xff] %vm336_vm0, %v4538_v37  ;;  %v5750_v63 = vpop.f32.mrb[46].mxu0 }
 0x9ca   : > { %v4541_v5 = vadd.f32 %v5750_v63, %v4858_v42  ;;  %v4494_v9 = vpop.f32.mrb[47].mxu0 }
 0x9cb   : > { %v4540_v28 = vadd.f32 %v4858_v42, %v4494_v9 }
 0x9cc   : > { %4557 = vst.msk [vmem:[%s9275_s25 + $0x78] sm:$0xff] %vm336_vm0, %v4541_v5 }
 0x9cd   : > { %4556 = vst.msk [vmem:[%s9275_s25 + $0x70] sm:$0xff] %vm336_vm0, %v4540_v28 }
 0x9ce PF: > { %s18_s27 = sadd.s32 1, %s6798_s27  }
 0x9cf   : > { %p15_p4 = scmp.ge.s32.totalorder %s18_s27, 4  }
 0x9d1   :  { %17 = sbr.rel (!%p15_p4) target bundleno = 1 (0x1), region = 85 }

</bundles_post_ra>
